<compile_context>
chip_gen: v5e
topology: v5e:2x2
jax: 0.10.0
libtpu: 0.0.40
codegen_flags: <defaults>
</compile_context>

<pallas_src>
import jax
import jax.numpy as jnp
from jax.experimental import pallas as pl
from jax.experimental.pallas import tpu as pltpu

LANE = 128  # channel padding target (TPU lane width)


def _ru(x, m=LANE):
    return ((x + m - 1) // m) * m


# ---------------------------------------------------------------------------
# Pallas kernels
# ---------------------------------------------------------------------------
def _matmul_bias_kernel(x_ref, w_ref, b_ref, o_ref):
    """(TM, K) @ (K, N) + bias; bf16 operands, f32 accumulate."""
    y = jnp.dot(x_ref[...], w_ref[...], preferred_element_type=jnp.float32)
    y = y + b_ref[...].astype(jnp.float32)
    o_ref[...] = y.astype(o_ref.dtype)


def _res_block_kernel(h_ref, w0_ref, b0_ref, w1_ref, b1_ref, o_ref,
                      pad_ref, acc_ref):
    """Fused residual block for one batch element.

    h_ref  : (1, H, W, C) bf16   activation (C zero-padded to LANE multiple)
    wX_ref : (9, C, C)    bf16   3x3 weights, tap-major (ky*3+kx, cin, cout)
    bX_ref : (1, C)       f32
    o_ref  : (1, H, W, C) bf16
    pad_ref: (H+2, W+2, C) f32 VMEM scratch holding the zero-halo image
    acc_ref: (H*W, C)      f32 VMEM accumulator
    """
    _, H, W, C = h_ref.shape

    def conv3x3(w_ref, b_ref):
        acc_ref[...] = jnp.zeros_like(acc_ref)
        for t in range(9):                                   # fused im2col:
            ky, kx = divmod(t, 3)                            # 9 shifted matmuls
            win = pad_ref[ky:ky + H, kx:kx + W, :]           # (H, W, C) f32
            lhs = win.reshape(H * W, C).astype(jnp.bfloat16)
            acc_ref[...] += jnp.dot(lhs, w_ref[t],
                                    preferred_element_type=jnp.float32)
        return acc_ref[...] + b_ref[...].astype(jnp.float32)

    # conv0 -> bias -> relu (intermediate stays in VMEM)
    pad_ref[...] = jnp.zeros_like(pad_ref)                   # zero the halo once
    pad_ref[1:H + 1, 1:W + 1, :] = h_ref[0].astype(jnp.float32)
    t0 = jnp.maximum(conv3x3(w0_ref, b0_ref), 0.0)           # (H*W, C) f32

    # conv1 -> bias -> +skip -> relu (halo untouched, still zero)
    pad_ref[1:H + 1, 1:W + 1, :] = t0.reshape(H, W, C)
    y = conv3x3(w1_ref, b1_ref)
    y = y + h_ref[0].reshape(H * W, C).astype(jnp.float32)
    o_ref[0] = jnp.maximum(y, 0.0).reshape(H, W, C).astype(o_ref.dtype)


# ---------------------------------------------------------------------------
# pallas_call wrappers
# ---------------------------------------------------------------------------
def _matmul_1x1(x_slab, w, b, out_dtype, tm=128):
    """x_slab: (M, K) bf16, w: (K, N) bf16, b: (1, N) f32 -> (M, N) out_dtype."""
    M, K = x_slab.shape
    Nc = w.shape[1]
    Mp = pl.cdiv(M, tm) * tm
    if Mp != M:                                   # keep tiles (8,128)-aligned
        x_slab = jnp.pad(x_slab, ((0, Mp - M), (0, 0)))
    y = pl.pallas_call(
        _matmul_bias_kernel,
        out_shape=jax.ShapeDtypeStruct((Mp, Nc), out_dtype),
        grid=(Mp // tm,),
        in_specs=[
            pl.BlockSpec((tm, K), lambda i: (i, 0)),
            pl.BlockSpec((K, Nc), lambda i: (0, 0)),
            pl.BlockSpec((1, Nc), lambda i: (0, 0)),
        ],
        out_specs=pl.BlockSpec((tm, Nc), lambda i: (i, 0)),
        compiler_params=pltpu.CompilerParams(
            dimension_semantics=("parallel",),
            vmem_limit_bytes=32 * 1024 * 1024),
    )(x_slab, w, b)
    return y if Mp == M else y[:M]


def _res_block(h_nhwc, w0, b0, w1, b1):
    N, H, W, C = h_nhwc.shape
    return pl.pallas_call(
        _res_block_kernel,
        out_shape=jax.ShapeDtypeStruct((N, H, W, C), h_nhwc.dtype),
        grid=(N,),
        in_specs=[
            pl.BlockSpec((1, H, W, C), lambda n: (n, 0, 0, 0)),
            pl.BlockSpec((9, C, C), lambda n: (0, 0, 0)),
            pl.BlockSpec((1, C), lambda n: (0, 0)),
            pl.BlockSpec((9, C, C), lambda n: (0, 0, 0)),
            pl.BlockSpec((1, C), lambda n: (0, 0)),
        ],
        out_specs=pl.BlockSpec((1, H, W, C), lambda n: (n, 0, 0, 0)),
        scratch_shapes=[
            pltpu.VMEM((H + 2, W + 2, C), jnp.float32),   # zero-halo image
            pltpu.VMEM((H * W, C), jnp.float32),          # conv accumulator
        ],
        compiler_params=pltpu.CompilerParams(
            dimension_semantics=("parallel",),
            vmem_limit_bytes=32 * 1024 * 1024),
    )(h_nhwc, w0, b0, w1, b1)


# ---------------------------------------------------------------------------
# Weight preparation (OIHW -> padded, bf16, matmul-ready)
# ---------------------------------------------------------------------------
def _prep_1x1(w, b, k_pad, n_pad):
    cout, cin = w.shape[0], w.shape[1]
    w2 = jnp.transpose(w[:, :, 0, 0], (1, 0))                      # (Cin, Cout)
    w2 = jnp.pad(w2, ((0, k_pad - cin), (0, n_pad - cout))).astype(jnp.bfloat16)
    b2 = jnp.pad(b, (0, n_pad - cout)).reshape(1, n_pad).astype(jnp.float32)
    return w2, b2


def _prep_3x3(w, b, c_pad):
    cout, cin = w.shape[0], w.shape[1]
    w2 = jnp.transpose(w, (2, 3, 1, 0)).reshape(9, cin, cout)      # tap-major
    w2 = jnp.pad(w2, ((0, 0), (0, c_pad - cin),
                      (0, c_pad - cout))).astype(jnp.bfloat16)
    b2 = jnp.pad(b, (0, c_pad - cout)).reshape(1, c_pad).astype(jnp.float32)
    return w2, b2


# ---------------------------------------------------------------------------
# ConvResidualNet forward
# ---------------------------------------------------------------------------
def conv_residual_net(x_nchw, params):
    N, in_ch, H, W = x_nchw.shape
    hidden = params["initial"][0].shape[0]
    out_ch = params["final"][0].shape[0]
    M = N * H * W
    cin_p, c_p, cout_p = _ru(in_ch), _ru(hidden), _ru(out_ch)

    wi, bi = _prep_1x1(*params["initial"], cin_p, c_p)
    wf, bfin = _prep_1x1(*params["final"], c_p, cout_p)
    blocks = [(_prep_3x3(w0, b0, c_p), _prep_3x3(w1, b1, c_p))
              for (w0, b0), (w1, b1) in params["blocks"]]

    # TODO(synk): the NCHW<->NHWC transposes on the tiny in/out tensors (4 ch)
    # stay in XLA; hidden activations remain lane-dense NHWC bf16 end-to-end.
    x_slab = jnp.transpose(x_nchw, (0, 2, 3, 1)).reshape(M, in_ch)
    x_slab = jnp.pad(x_slab, ((0, 0), (0, cin_p - in_ch))).astype(jnp.bfloat16)

    h = _matmul_1x1(x_slab, wi, bi, jnp.bfloat16).reshape(N, H, W, c_p)
    for (w0, b0), (w1, b1) in blocks:
        h = _res_block(h, w0, b0, w1, b1)

    out = _matmul_1x1(h.reshape(M, c_p), wf, bfin, jnp.float32)
    out = out[:, :out_ch].reshape(N, H, W, out_ch)
    return jnp.transpose(out, (0, 3, 1, 2))


# ---------------------------------------------------------------------------
# Deterministic parameter init (PyTorch Conv2d-style uniform bounds)
# ---------------------------------------------------------------------------
def init_params(key, in_ch, out_ch, hidden, num_blocks):
    def conv_init(k, cout, cin, ksz):
        kw, kb = jax.random.split(k)
        fan_in = cin * ksz * ksz
        bound = 1.0 / jnp.sqrt(jnp.float32(fan_in))
        w = jax.random.uniform(kw, (cout, cin, ksz, ksz), jnp.float32, -bound, bound)
        b = jax.random.uniform(kb, (cout,), jnp.float32, -bound, bound)
        return w, b

    keys = jax.random.split(key, 2 + 2 * num_blocks)
    params = {"initial": conv_init(keys[0], hidden, in_ch, 1), "blocks": []}
    for i in range(num_blocks):
        c0 = conv_init(keys[1 + 2 * i], hidden, hidden, 3)
        c1 = conv_init(keys[2 + 2 * i], hidden, hidden, 3)
        params["blocks"].append((c0, c1))
    params["final"] = conv_init(keys[-1], out_ch, hidden, 1)
    return params


# ---------------------------------------------------------------------------
# Pure-JAX f32 reference (for correctness check only)
# ---------------------------------------------------------------------------
def reference_net(x_nchw, params):
    def conv(x, w, b, pad):
        y = jax.lax.conv_general_dilated(
            x, w, (1, 1), pad, dimension_numbers=("NCHW", "OIHW", "NCHW"))
        return y + b.reshape(1, -1, 1, 1)

    w, b = params["initial"]
    h = conv(x_nchw, w, b, "VALID")
    for (w0, b0), (w1, b1) in params["blocks"]:
        t = jax.nn.relu(conv(h, w0, b0, "SAME"))
        h = jax.nn.relu(h + conv(t, w1, b1, "SAME"))
    w, b = params["final"]
    return conv(h, w, b, "VALID")


if __name__ == "__main__":
    key = jax.random.PRNGKey(0)
    k_x, k_p = jax.random.split(key)

    N, in_ch, H, W = 2, 4, 16, 16
    out_ch, hidden, num_blocks = 4, 32, 2

    x = jax.random.normal(k_x, (N, in_ch, H, W), jnp.float32)
    params = init_params(k_p, in_ch, out_ch, hidden, num_blocks)

    net = jax.jit(conv_residual_net)
    out = jax.block_until_ready(net(x, params))
    ref = jax.block_until_ready(reference_net(x, params))

    err = float(jnp.max(jnp.abs(out - ref)))
    ok = (out.shape == (N, out_ch, H, W)
          and bool(jnp.all(jnp.isfinite(out)))
          and err <= 5e-2)
    if not ok:
        raise AssertionError(f"mismatch: shape={out.shape}, max_abs_err={err}")
    print("KERNEL_OK")
</pallas_src>

<mosaic_0001>
module attributes {stable_mosaic.version = 11 : i64} {
  func.func @_matmul_bias_kernel(%arg0: i32, %arg1: memref<128x128xbf16, #tpu.memory_space<vmem>>, %arg2: memref<128x128xbf16, #tpu.memory_space<vmem>>, %arg3: memref<1x128xf32, #tpu.memory_space<vmem>>, %arg4: memref<128x128xbf16, #tpu.memory_space<vmem>>) attributes {dimension_semantics = [#tpu.dimension_semantics<parallel>], iteration_bounds = array<i64: 4>, scalar_prefetch = 0 : i64, scratch_operands = 0 : i64, tpu.core_type = #tpu.core_type<tc>, window_params = [{transform_indices = @transform_0, window_bounds = array<i64: 128, 128>}, {pipeline_mode = #tpu.pipeline_mode<synchronous>, transform_indices = @transform_1, window_bounds = array<i64: 128, 128>}, {pipeline_mode = #tpu.pipeline_mode<synchronous>, transform_indices = @transform_2, window_bounds = array<i64: 1, 128>}, {transform_indices = @transform_3, window_bounds = array<i64: 128, 128>}]} {
    %c0 = arith.constant 0 : index
    %c0_0 = arith.constant 0 : index
    %0 = vector.load %arg1[%c0, %c0_0] : memref<128x128xbf16, #tpu.memory_space<vmem>>, vector<128x128xbf16>
    %c0_1 = arith.constant 0 : index
    %c0_2 = arith.constant 0 : index
    %1 = vector.load %arg2[%c0_1, %c0_2] : memref<128x128xbf16, #tpu.memory_space<vmem>>, vector<128x128xbf16>
    %cst = arith.constant dense<0.000000e+00> : vector<128x128xf32>
    %2 = tpu.matmul %0, %1, %cst {dimension_numbers = #tpu.dot_dimension_numbers<[1], [0], [0], [1], [0, 0, 1, 1], [], []>} : vector<128x128xbf16>, vector<128x128xbf16>, vector<128x128xf32> -> vector<128x128xf32>
    %c0_3 = arith.constant 0 : index
    %c0_4 = arith.constant 0 : index
    %3 = vector.load %arg3[%c0_3, %c0_4] : memref<1x128xf32, #tpu.memory_space<vmem>>, vector<1x128xf32>
    %4 = vector.broadcast %3 : vector<1x128xf32> to vector<128x128xf32>
    %5 = arith.addf %2, %4 : vector<128x128xf32>
    %6 = arith.truncf %5 : vector<128x128xf32> to vector<128x128xbf16>
    %c0_5 = arith.constant 0 : index
    %c0_6 = arith.constant 0 : index
    %7 = vector.load %arg4[%c0_5, %c0_6] : memref<128x128xbf16, #tpu.memory_space<vmem>>, vector<128x128xbf16>
    tpu.vector_store %arg4[%c0_5, %c0_6], %6 {strides = array<i32>} : memref<128x128xbf16, #tpu.memory_space<vmem>>, vector<128x128xbf16>,
    return
  }
  func.func @transform_0(%arg0: i32) -> (i32, i32) {
    %c0_i32 = arith.constant 0 : i32
    %c0_i32_0 = arith.constant 0 : i32
    return %arg0, %c0_i32 : i32, i32
  }
  func.func @transform_1(%arg0: i32) -> (i32, i32) {
    %c0_i32 = arith.constant 0 : i32
    %c0_i32_0 = arith.constant 0 : i32
    %c0_i32_1 = arith.constant 0 : i32
    return %c0_i32, %c0_i32_0 : i32, i32
  }
  func.func @transform_2(%arg0: i32) -> (i32, i32) {
    %c0_i32 = arith.constant 0 : i32
    %c0_i32_0 = arith.constant 0 : i32
    %c0_i32_1 = arith.constant 0 : i32
    return %c0_i32, %c0_i32_0 : i32, i32
  }
  func.func @transform_3(%arg0: i32) -> (i32, i32) {
    %c0_i32 = arith.constant 0 : i32
    %c0_i32_0 = arith.constant 0 : i32
    return %arg0, %c0_i32 : i32, i32
  }
}

module attributes {stable_mosaic.version = 11 : i64} {
  func.func @_res_block_kernel(%arg0: i32, %arg1: memref<1x16x16x128xbf16, #tpu.memory_space<vmem>>, %arg2: memref<9x128x128xbf16, #tpu.memory_space<vmem>>, %arg3: memref<1x128xf32, #tpu.memory_space<vmem>>, %arg4: memref<9x128x128xbf16, #tpu.memory_space<vmem>>, %arg5: memref<1x128xf32, #tpu.memory_space<vmem>>, %arg6: memref<1x16x16x128xbf16, #tpu.memory_space<vmem>>, %arg7: memref<18x18x128xf32, #tpu.memory_space<vmem>>, %arg8: memref<256x128xf32, #tpu.memory_space<vmem>>) attributes {dimension_semantics = [#tpu.dimension_semantics<parallel>], iteration_bounds = array<i64: 2>, scalar_prefetch = 0 : i64, scratch_operands = 2 : i64, tpu.core_type = #tpu.core_type<tc>, window_params = [{transform_indices = @transform_0, window_bounds = array<i64: 1, 16, 16, 128>}, {pipeline_mode = #tpu.pipeline_mode<synchronous>, transform_indices = @transform_1, window_bounds = array<i64: 9, 128, 128>}, {pipeline_mode = #tpu.pipeline_mode<synchronous>, transform_indices = @transform_2, window_bounds = array<i64: 1, 128>}, {pipeline_mode = #tpu.pipeline_mode<synchronous>, transform_indices = @transform_3, window_bounds = array<i64: 9, 128, 128>}, {pipeline_mode = #tpu.pipeline_mode<synchronous>, transform_indices = @transform_4, window_bounds = array<i64: 1, 128>}, {transform_indices = @transform_5, window_bounds = array<i64: 1, 16, 16, 128>}]} {
    %cst = arith.constant 0.000000e+00 : f32
    %0 = vector.broadcast %cst : f32 to vector<18x18x128xf32>
    %c0 = arith.constant 0 : index
    %c0_0 = arith.constant 0 : index
    %c0_1 = arith.constant 0 : index
    %1 = vector.load %arg7[%c0, %c0_0, %c0_1] : memref<18x18x128xf32, #tpu.memory_space<vmem>>, vector<18x18x128xf32>
    tpu.vector_store %arg7[%c0, %c0_0, %c0_1], %0 {strides = array<i32>} : memref<18x18x128xf32, #tpu.memory_space<vmem>>, vector<18x18x128xf32>,
    %c0_2 = arith.constant 0 : index
    %c0_3 = arith.constant 0 : index
    %c0_4 = arith.constant 0 : index
    %c0_5 = arith.constant 0 : index
    %2 = vector.load %arg1[%c0_2, %c0_3, %c0_4, %c0_5] : memref<1x16x16x128xbf16, #tpu.memory_space<vmem>>, vector<1x16x16x128xbf16>
    %3 = vector.shape_cast %2 : vector<1x16x16x128xbf16> to vector<16x16x128xbf16>
    %4 = arith.extf %3 : vector<16x16x128xbf16> to vector<16x16x128xf32>
    %c1 = arith.constant 1 : index
    %c1_6 = arith.constant 1 : index
    %c0_7 = arith.constant 0 : index
    %5 = vector.load %arg7[%c1, %c1_6, %c0_7] : memref<18x18x128xf32, #tpu.memory_space<vmem>>, vector<16x16x128xf32>
    tpu.vector_store %arg7[%c1, %c1_6, %c0_7], %4 {strides = array<i32>} : memref<18x18x128xf32, #tpu.memory_space<vmem>>, vector<16x16x128xf32>,
    %cst_8 = arith.constant 0.000000e+00 : f32
    %6 = vector.broadcast %cst_8 : f32 to vector<256x128xf32>
    %c0_9 = arith.constant 0 : index
    %c0_10 = arith.constant 0 : index
    %7 = vector.load %arg8[%c0_9, %c0_10] : memref<256x128xf32, #tpu.memory_space<vmem>>, vector<256x128xf32>
    tpu.vector_store %arg8[%c0_9, %c0_10], %6 {strides = array<i32>} : memref<256x128xf32, #tpu.memory_space<vmem>>, vector<256x128xf32>,
    %c0_11 = arith.constant 0 : index
    %c0_12 = arith.constant 0 : index
    %c0_13 = arith.constant 0 : index
    %8 = vector.load %arg7[%c0_11, %c0_12, %c0_13] : memref<18x18x128xf32, #tpu.memory_space<vmem>>, vector<16x16x128xf32>
    %9 = vector.shape_cast %8 : vector<16x16x128xf32> to vector<256x128xf32>
    %10 = arith.truncf %9 : vector<256x128xf32> to vector<256x128xbf16>
    %c0_14 = arith.constant 0 : index
    %c0_15 = arith.constant 0 : index
    %11 = vector.load %arg8[%c0_14, %c0_15] : memref<256x128xf32, #tpu.memory_space<vmem>>, vector<256x128xf32>
    %c0_16 = arith.constant 0 : index
    %c0_17 = arith.constant 0 : index
    %c0_18 = arith.constant 0 : index
    %12 = vector.load %arg2[%c0_16, %c0_17, %c0_18] : memref<9x128x128xbf16, #tpu.memory_space<vmem>>, vector<1x128x128xbf16>
    %13 = vector.shape_cast %12 : vector<1x128x128xbf16> to vector<128x128xbf16>
    %cst_19 = arith.constant dense<0.000000e+00> : vector<256x128xf32>
    %14 = tpu.matmul %10, %13, %cst_19 {dimension_numbers = #tpu.dot_dimension_numbers<[1], [0], [0], [1], [0, 0, 1, 1], [], []>} : vector<256x128xbf16>, vector<128x128xbf16>, vector<256x128xf32> -> vector<256x128xf32>
    %15 = arith.addf %11, %14 : vector<256x128xf32>
    %c0_20 = arith.constant 0 : index
    %c0_21 = arith.constant 0 : index
    %16 = vector.load %arg8[%c0_20, %c0_21] : memref<256x128xf32, #tpu.memory_space<vmem>>, vector<256x128xf32>
    tpu.vector_store %arg8[%c0_20, %c0_21], %15 {strides = array<i32>} : memref<256x128xf32, #tpu.memory_space<vmem>>, vector<256x128xf32>,
    %c0_22 = arith.constant 0 : index
    %c1_23 = arith.constant 1 : index
    %c0_24 = arith.constant 0 : index
    %17 = vector.load %arg7[%c0_22, %c1_23, %c0_24] : memref<18x18x128xf32, #tpu.memory_space<vmem>>, vector<16x16x128xf32>
    %18 = vector.shape_cast %17 : vector<16x16x128xf32> to vector<256x128xf32>
    %19 = arith.truncf %18 : vector<256x128xf32> to vector<256x128xbf16>
    %c0_25 = arith.constant 0 : index
    %c0_26 = arith.constant 0 : index
    %20 = vector.load %arg8[%c0_25, %c0_26] : memref<256x128xf32, #tpu.memory_space<vmem>>, vector<256x128xf32>
    %c1_27 = arith.constant 1 : index
    %c0_28 = arith.constant 0 : index
    %c0_29 = arith.constant 0 : index
    %21 = vector.load %arg2[%c1_27, %c0_28, %c0_29] : memref<9x128x128xbf16, #tpu.memory_space<vmem>>, vector<1x128x128xbf16>
    %22 = vector.shape_cast %21 : vector<1x128x128xbf16> to vector<128x128xbf16>
    %cst_30 = arith.constant dense<0.000000e+00> : vector<256x128xf32>
    %23 = tpu.matmul %19, %22, %cst_30 {dimension_numbers = #tpu.dot_dimension_numbers<[1], [0], [0], [1], [0, 0, 1, 1], [], []>} : vector<256x128xbf16>, vector<128x128xbf16>, vector<256x128xf32> -> vector<256x128xf32>
    %24 = arith.addf %20, %23 : vector<256x128xf32>
    %c0_31 = arith.constant 0 : index
    %c0_32 = arith.constant 0 : index
    %25 = vector.load %arg8[%c0_31, %c0_32] : memref<256x128xf32, #tpu.memory_space<vmem>>, vector<256x128xf32>
    tpu.vector_store %arg8[%c0_31, %c0_32], %24 {strides = array<i32>} : memref<256x128xf32, #tpu.memory_space<vmem>>, vector<256x128xf32>,
    %c0_33 = arith.constant 0 : index
    %c2 = arith.constant 2 : index
    %c0_34 = arith.constant 0 : index
    %26 = vector.load %arg7[%c0_33, %c2, %c0_34] : memref<18x18x128xf32, #tpu.memory_space<vmem>>, vector<16x16x128xf32>
    %27 = vector.shape_cast %26 : vector<16x16x128xf32> to vector<256x128xf32>
    %28 = arith.truncf %27 : vector<256x128xf32> to vector<256x128xbf16>
    %c0_35 = arith.constant 0 : index
    %c0_36 = arith.constant 0 : index
    %29 = vector.load %arg8[%c0_35, %c0_36] : memref<256x128xf32, #tpu.memory_space<vmem>>, vector<256x128xf32>
    %c2_37 = arith.constant 2 : index
    %c0_38 = arith.constant 0 : index
    %c0_39 = arith.constant 0 : index
    %30 = vector.load %arg2[%c2_37, %c0_38, %c0_39] : memref<9x128x128xbf16, #tpu.memory_space<vmem>>, vector<1x128x128xbf16>
    %31 = vector.shape_cast %30 : vector<1x128x128xbf16> to vector<128x128xbf16>
    %cst_40 = arith.constant dense<0.000000e+00> : vector<256x128xf32>
    %32 = tpu.matmul %28, %31, %cst_40 {dimension_numbers = #tpu.dot_dimension_numbers<[1], [0], [0], [1], [0, 0, 1, 1], [], []>} : vector<256x128xbf16>, vector<128x128xbf16>, vector<256x128xf32> -> vector<256x128xf32>
    %33 = arith.addf %29, %32 : vector<256x128xf32>
    %c0_41 = arith.constant 0 : index
    %c0_42 = arith.constant 0 : index
    %34 = vector.load %arg8[%c0_41, %c0_42] : memref<256x128xf32, #tpu.memory_space<vmem>>, vector<256x128xf32>
    tpu.vector_store %arg8[%c0_41, %c0_42], %33 {strides = array<i32>} : memref<256x128xf32, #tpu.memory_space<vmem>>, vector<256x128xf32>,
    %c1_43 = arith.constant 1 : index
    %c0_44 = arith.constant 0 : index
    %c0_45 = arith.constant 0 : index
    %35 = vector.load %arg7[%c1_43, %c0_44, %c0_45] : memref<18x18x128xf32, #tpu.memory_space<vmem>>, vector<16x16x128xf32>
    %36 = vector.shape_cast %35 : vector<16x16x128xf32> to vector<256x128xf32>
    %37 = arith.truncf %36 : vector<256x128xf32> to vector<256x128xbf16>
    %c0_46 = arith.constant 0 : index
    %c0_47 = arith.constant 0 : index
    %38 = vector.load %arg8[%c0_46, %c0_47] : memref<256x128xf32, #tpu.memory_space<vmem>>, vector<256x128xf32>
    %c3 = arith.constant 3 : index
    %c0_48 = arith.constant 0 : index
    %c0_49 = arith.constant 0 : index
    %39 = vector.load %arg2[%c3, %c0_48, %c0_49] : memref<9x128x128xbf16, #tpu.memory_space<vmem>>, vector<1x128x128xbf16>
    %40 = vector.shape_cast %39 : vector<1x128x128xbf16> to vector<128x128xbf16>
    %cst_50 = arith.constant dense<0.000000e+00> : vector<256x128xf32>
    %41 = tpu.matmul %37, %40, %cst_50 {dimension_numbers = #tpu.dot_dimension_numbers<[1], [0], [0], [1], [0, 0, 1, 1], [], []>} : vector<256x128xbf16>, vector<128x128xbf16>, vector<256x128xf32> -> vector<256x128xf32>
    %42 = arith.addf %38, %41 : vector<256x128xf32>
    %c0_51 = arith.constant 0 : index
    %c0_52 = arith.constant 0 : index
    %43 = vector.load %arg8[%c0_51, %c0_52] : memref<256x128xf32, #tpu.memory_space<vmem>>, vector<256x128xf32>
    tpu.vector_store %arg8[%c0_51, %c0_52], %42 {strides = array<i32>} : memref<256x128xf32, #tpu.memory_space<vmem>>, vector<256x128xf32>,
    %c1_53 = arith.constant 1 : index
    %c1_54 = arith.constant 1 : index
    %c0_55 = arith.constant 0 : index
    %44 = vector.load %arg7[%c1_53, %c1_54, %c0_55] : memref<18x18x128xf32, #tpu.memory_space<vmem>>, vector<16x16x128xf32>
    %45 = vector.shape_cast %44 : vector<16x16x128xf32> to vector<256x128xf32>
    %46 = arith.truncf %45 : vector<256x128xf32> to vector<256x128xbf16>
    %c0_56 = arith.constant 0 : index
    %c0_57 = arith.constant 0 : index
    %47 = vector.load %arg8[%c0_56, %c0_57] : memref<256x128xf32, #tpu.memory_space<vmem>>, vector<256x128xf32>
    %c4 = arith.constant 4 : index
    %c0_58 = arith.constant 0 : index
    %c0_59 = arith.constant 0 : index
    %48 = vector.load %arg2[%c4, %c0_58, %c0_59] : memref<9x128x128xbf16, #tpu.memory_space<vmem>>, vector<1x128x128xbf16>
    %49 = vector.shape_cast %48 : vector<1x128x128xbf16> to vector<128x128xbf16>
    %cst_60 = arith.constant dense<0.000000e+00> : vector<256x128xf32>
    %50 = tpu.matmul %46, %49, %cst_60 {dimension_numbers = #tpu.dot_dimension_numbers<[1], [0], [0], [1], [0, 0, 1, 1], [], []>} : vector<256x128xbf16>, vector<128x128xbf16>, vector<256x128xf32> -> vector<256x128xf32>
    %51 = arith.addf %47, %50 : vector<256x128xf32>
    %c0_61 = arith.constant 0 : index
    %c0_62 = arith.constant 0 : index
    %52 = vector.load %arg8[%c0_61, %c0_62] : memref<256x128xf32, #tpu.memory_space<vmem>>, vector<256x128xf32>
    tpu.vector_store %arg8[%c0_61, %c0_62], %51 {strides = array<i32>} : memref<256x128xf32, #tpu.memory_space<vmem>>, vector<256x128xf32>,
    %c1_63 = arith.constant 1 : index
    %c2_64 = arith.constant 2 : index
    %c0_65 = arith.constant 0 : index
    %53 = vector.load %arg7[%c1_63, %c2_64, %c0_65] : memref<18x18x128xf32, #tpu.memory_space<vmem>>, vector<16x16x128xf32>
    %54 = vector.shape_cast %53 : vector<16x16x128xf32> to vector<256x128xf32>
    %55 = arith.truncf %54 : vector<256x128xf32> to vector<256x128xbf16>
    %c0_66 = arith.constant 0 : index
    %c0_67 = arith.constant 0 : index
    %56 = vector.load %arg8[%c0_66, %c0_67] : memref<256x128xf32, #tpu.memory_space<vmem>>, vector<256x128xf32>
    %c5 = arith.constant 5 : index
    %c0_68 = arith.constant 0 : index
    %c0_69 = arith.constant 0 : index
    %57 = vector.load %arg2[%c5, %c0_68, %c0_69] : memref<9x128x128xbf16, #tpu.memory_space<vmem>>, vector<1x128x128xbf16>
    %58 = vector.shape_cast %57 : vector<1x128x128xbf16> to vector<128x128xbf16>
    %cst_70 = arith.constant dense<0.000000e+00> : vector<256x128xf32>
    %59 = tpu.matmul %55, %58, %cst_70 {dimension_numbers = #tpu.dot_dimension_numbers<[1], [0], [0], [1], [0, 0, 1, 1], [], []>} : vector<256x128xbf16>, vector<128x128xbf16>, vector<256x128xf32> -> vector<256x128xf32>
    %60 = arith.addf %56, %59 : vector<256x128xf32>
    %c0_71 = arith.constant 0 : index
    %c0_72 = arith.constant 0 : index
    %61 = vector.load %arg8[%c0_71, %c0_72] : memref<256x128xf32, #tpu.memory_space<vmem>>, vector<256x128xf32>
    tpu.vector_store %arg8[%c0_71, %c0_72], %60 {strides = array<i32>} : memref<256x128xf32, #tpu.memory_space<vmem>>, vector<256x128xf32>,
    %c2_73 = arith.constant 2 : index
    %c0_74 = arith.constant 0 : index
    %c0_75 = arith.constant 0 : index
    %62 = vector.load %arg7[%c2_73, %c0_74, %c0_75] : memref<18x18x128xf32, #tpu.memory_space<vmem>>, vector<16x16x128xf32>
    %63 = vector.shape_cast %62 : vector<16x16x128xf32> to vector<256x128xf32>
    %64 = arith.truncf %63 : vector<256x128xf32> to vector<256x128xbf16>
    %c0_76 = arith.constant 0 : index
    %c0_77 = arith.constant 0 : index
    %65 = vector.load %arg8[%c0_76, %c0_77] : memref<256x128xf32, #tpu.memory_space<vmem>>, vector<256x128xf32>
    %c6 = arith.constant 6 : index
    %c0_78 = arith.constant 0 : index
    %c0_79 = arith.constant 0 : index
    %66 = vector.load %arg2[%c6, %c0_78, %c0_79] : memref<9x128x128xbf16, #tpu.memory_space<vmem>>, vector<1x128x128xbf16>
    %67 = vector.shape_cast %66 : vector<1x128x128xbf16> to vector<128x128xbf16>
    %cst_80 = arith.constant dense<0.000000e+00> : vector<256x128xf32>
    %68 = tpu.matmul %64, %67, %cst_80 {dimension_numbers = #tpu.dot_dimension_numbers<[1], [0], [0], [1], [0, 0, 1, 1], [], []>} : vector<256x128xbf16>, vector<128x128xbf16>, vector<256x128xf32> -> vector<256x128xf32>
    %69 = arith.addf %65, %68 : vector<256x128xf32>
    %c0_81 = arith.constant 0 : index
    %c0_82 = arith.constant 0 : index
    %70 = vector.load %arg8[%c0_81, %c0_82] : memref<256x128xf32, #tpu.memory_space<vmem>>, vector<256x128xf32>
    tpu.vector_store %arg8[%c0_81, %c0_82], %69 {strides = array<i32>} : memref<256x128xf32, #tpu.memory_space<vmem>>, vector<256x128xf32>,
    %c2_83 = arith.constant 2 : index
    %c1_84 = arith.constant 1 : index
    %c0_85 = arith.constant 0 : index
    %71 = vector.load %arg7[%c2_83, %c1_84, %c0_85] : memref<18x18x128xf32, #tpu.memory_space<vmem>>, vector<16x16x128xf32>
    %72 = vector.shape_cast %71 : vector<16x16x128xf32> to vector<256x128xf32>
    %73 = arith.truncf %72 : vector<256x128xf32> to vector<256x128xbf16>
    %c0_86 = arith.constant 0 : index
    %c0_87 = arith.constant 0 : index
    %74 = vector.load %arg8[%c0_86, %c0_87] : memref<256x128xf32, #tpu.memory_space<vmem>>, vector<256x128xf32>
    %c7 = arith.constant 7 : index
    %c0_88 = arith.constant 0 : index
    %c0_89 = arith.constant 0 : index
    %75 = vector.load %arg2[%c7, %c0_88, %c0_89] : memref<9x128x128xbf16, #tpu.memory_space<vmem>>, vector<1x128x128xbf16>
    %76 = vector.shape_cast %75 : vector<1x128x128xbf16> to vector<128x128xbf16>
    %cst_90 = arith.constant dense<0.000000e+00> : vector<256x128xf32>
    %77 = tpu.matmul %73, %76, %cst_90 {dimension_numbers = #tpu.dot_dimension_numbers<[1], [0], [0], [1], [0, 0, 1, 1], [], []>} : vector<256x128xbf16>, vector<128x128xbf16>, vector<256x128xf32> -> vector<256x128xf32>
    %78 = arith.addf %74, %77 : vector<256x128xf32>
    %c0_91 = arith.constant 0 : index
    %c0_92 = arith.constant 0 : index
    %79 = vector.load %arg8[%c0_91, %c0_92] : memref<256x128xf32, #tpu.memory_space<vmem>>, vector<256x128xf32>
    tpu.vector_store %arg8[%c0_91, %c0_92], %78 {strides = array<i32>} : memref<256x128xf32, #tpu.memory_space<vmem>>, vector<256x128xf32>,
    %c2_93 = arith.constant 2 : index
    %c2_94 = arith.constant 2 : index
    %c0_95 = arith.constant 0 : index
    %80 = vector.load %arg7[%c2_93, %c2_94, %c0_95] : memref<18x18x128xf32, #tpu.memory_space<vmem>>, vector<16x16x128xf32>
    %81 = vector.shape_cast %80 : vector<16x16x128xf32> to vector<256x128xf32>
    %82 = arith.truncf %81 : vector<256x128xf32> to vector<256x128xbf16>
    %c0_96 = arith.constant 0 : index
    %c0_97 = arith.constant 0 : index
    %83 = vector.load %arg8[%c0_96, %c0_97] : memref<256x128xf32, #tpu.memory_space<vmem>>, vector<256x128xf32>
    %c8 = arith.constant 8 : index
    %c0_98 = arith.constant 0 : index
    %c0_99 = arith.constant 0 : index
    %84 = vector.load %arg2[%c8, %c0_98, %c0_99] : memref<9x128x128xbf16, #tpu.memory_space<vmem>>, vector<1x128x128xbf16>
    %85 = vector.shape_cast %84 : vector<1x128x128xbf16> to vector<128x128xbf16>
    %cst_100 = arith.constant dense<0.000000e+00> : vector<256x128xf32>
    %86 = tpu.matmul %82, %85, %cst_100 {dimension_numbers = #tpu.dot_dimension_numbers<[1], [0], [0], [1], [0, 0, 1, 1], [], []>} : vector<256x128xbf16>, vector<128x128xbf16>, vector<256x128xf32> -> vector<256x128xf32>
    %87 = arith.addf %83, %86 : vector<256x128xf32>
    %c0_101 = arith.constant 0 : index
    %c0_102 = arith.constant 0 : index
    %88 = vector.load %arg8[%c0_101, %c0_102] : memref<256x128xf32, #tpu.memory_space<vmem>>, vector<256x128xf32>
    tpu.vector_store %arg8[%c0_101, %c0_102], %87 {strides = array<i32>} : memref<256x128xf32, #tpu.memory_space<vmem>>, vector<256x128xf32>,
    %c0_103 = arith.constant 0 : index
    %c0_104 = arith.constant 0 : index
    %89 = vector.load %arg8[%c0_103, %c0_104] : memref<256x128xf32, #tpu.memory_space<vmem>>, vector<256x128xf32>
    %c0_105 = arith.constant 0 : index
    %c0_106 = arith.constant 0 : index
    %90 = vector.load %arg3[%c0_105, %c0_106] : memref<1x128xf32, #tpu.memory_space<vmem>>, vector<1x128xf32>
    %91 = vector.broadcast %90 : vector<1x128xf32> to vector<256x128xf32>
    %92 = arith.addf %89, %91 : vector<256x128xf32>
    %cst_107 = arith.constant 0.000000e+00 : f32
    %93 = vector.broadcast %cst_107 : f32 to vector<256x128xf32>
    %94 = arith.maximumf %92, %93 : vector<256x128xf32>
    %95 = vector.shape_cast %94 : vector<256x128xf32> to vector<16x16x128xf32>
    %c1_108 = arith.constant 1 : index
    %c1_109 = arith.constant 1 : index
    %c0_110 = arith.constant 0 : index
    %96 = vector.load %arg7[%c1_108, %c1_109, %c0_110] : memref<18x18x128xf32, #tpu.memory_space<vmem>>, vector<16x16x128xf32>
    tpu.vector_store %arg7[%c1_108, %c1_109, %c0_110], %95 {strides = array<i32>} : memref<18x18x128xf32, #tpu.memory_space<vmem>>, vector<16x16x128xf32>,
    %cst_111 = arith.constant 0.000000e+00 : f32
    %97 = vector.broadcast %cst_111 : f32 to vector<256x128xf32>
    %c0_112 = arith.constant 0 : index
    %c0_113 = arith.constant 0 : index
    %98 = vector.load %arg8[%c0_112, %c0_113] : memref<256x128xf32, #tpu.memory_space<vmem>>, vector<256x128xf32>
    tpu.vector_store %arg8[%c0_112, %c0_113], %97 {strides = array<i32>} : memref<256x128xf32, #tpu.memory_space<vmem>>, vector<256x128xf32>,
    %c0_114 = arith.constant 0 : index
    %c0_115 = arith.constant 0 : index
    %c0_116 = arith.constant 0 : index
    %99 = vector.load %arg7[%c0_114, %c0_115, %c0_116] : memref<18x18x128xf32, #tpu.memory_space<vmem>>, vector<16x16x128xf32>
    %100 = vector.shape_cast %99 : vector<16x16x128xf32> to vector<256x128xf32>
    %101 = arith.truncf %100 : vector<256x128xf32> to vector<256x128xbf16>
    %c0_117 = arith.constant 0 : index
    %c0_118 = arith.constant 0 : index
    %102 = vector.load %arg8[%c0_117, %c0_118] : memref<256x128xf32, #tpu.memory_space<vmem>>, vector<256x128xf32>
    %c0_119 = arith.constant 0 : index
    %c0_120 = arith.constant 0 : index
    %c0_121 = arith.constant 0 : index
    %103 = vector.load %arg4[%c0_119, %c0_120, %c0_121] : memref<9x128x128xbf16, #tpu.memory_space<vmem>>, vector<1x128x128xbf16>
    %104 = vector.shape_cast %103 : vector<1x128x128xbf16> to vector<128x128xbf16>
    %cst_122 = arith.constant dense<0.000000e+00> : vector<256x128xf32>
    %105 = tpu.matmul %101, %104, %cst_122 {dimension_numbers = #tpu.dot_dimension_numbers<[1], [0], [0], [1], [0, 0, 1, 1], [], []>} : vector<256x128xbf16>, vector<128x128xbf16>, vector<256x128xf32> -> vector<256x128xf32>
    %106 = arith.addf %102, %105 : vector<256x128xf32>
    %c0_123 = arith.constant 0 : index
    %c0_124 = arith.constant 0 : index
    %107 = vector.load %arg8[%c0_123, %c0_124] : memref<256x128xf32, #tpu.memory_space<vmem>>, vector<256x128xf32>
    tpu.vector_store %arg8[%c0_123, %c0_124], %106 {strides = array<i32>} : memref<256x128xf32, #tpu.memory_space<vmem>>, vector<256x128xf32>,
    %c0_125 = arith.constant 0 : index
    %c1_126 = arith.constant 1 : index
    %c0_127 = arith.constant 0 : index
    %108 = vector.load %arg7[%c0_125, %c1_126, %c0_127] : memref<18x18x128xf32, #tpu.memory_space<vmem>>, vector<16x16x128xf32>
    %109 = vector.shape_cast %108 : vector<16x16x128xf32> to vector<256x128xf32>
    %110 = arith.truncf %109 : vector<256x128xf32> to vector<256x128xbf16>
    %c0_128 = arith.constant 0 : index
    %c0_129 = arith.constant 0 : index
    %111 = vector.load %arg8[%c0_128, %c0_129] : memref<256x128xf32, #tpu.memory_space<vmem>>, vector<256x128xf32>
    %c1_130 = arith.constant 1 : index
    %c0_131 = arith.constant 0 : index
    %c0_132 = arith.constant 0 : index
    %112 = vector.load %arg4[%c1_130, %c0_131, %c0_132] : memref<9x128x128xbf16, #tpu.memory_space<vmem>>, vector<1x128x128xbf16>
    %113 = vector.shape_cast %112 : vector<1x128x128xbf16> to vector<128x128xbf16>
    %cst_133 = arith.constant dense<0.000000e+00> : vector<256x128xf32>
    %114 = tpu.matmul %110, %113, %cst_133 {dimension_numbers = #tpu.dot_dimension_numbers<[1], [0], [0], [1], [0, 0, 1, 1], [], []>} : vector<256x128xbf16>, vector<128x128xbf16>, vector<256x128xf32> -> vector<256x128xf32>
    %115 = arith.addf %111, %114 : vector<256x128xf32>
    %c0_134 = arith.constant 0 : index
    %c0_135 = arith.constant 0 : index
    %116 = vector.load %arg8[%c0_134, %c0_135] : memref<256x128xf32, #tpu.memory_space<vmem>>, vector<256x128xf32>
    tpu.vector_store %arg8[%c0_134, %c0_135], %115 {strides = array<i32>} : memref<256x128xf32, #tpu.memory_space<vmem>>, vector<256x128xf32>,
    %c0_136 = arith.constant 0 : index
    %c2_137 = arith.constant 2 : index
    %c0_138 = arith.constant 0 : index
    %117 = vector.load %arg7[%c0_136, %c2_137, %c0_138] : memref<18x18x128xf32, #tpu.memory_space<vmem>>, vector<16x16x128xf32>
    %118 = vector.shape_cast %117 : vector<16x16x128xf32> to vector<256x128xf32>
    %119 = arith.truncf %118 : vector<256x128xf32> to vector<256x128xbf16>
    %c0_139 = arith.constant 0 : index
    %c0_140 = arith.constant 0 : index
    %120 = vector.load %arg8[%c0_139, %c0_140] : memref<256x128xf32, #tpu.memory_space<vmem>>, vector<256x128xf32>
    %c2_141 = arith.constant 2 : index
    %c0_142 = arith.constant 0 : index
    %c0_143 = arith.constant 0 : index
    %121 = vector.load %arg4[%c2_141, %c0_142, %c0_143] : memref<9x128x128xbf16, #tpu.memory_space<vmem>>, vector<1x128x128xbf16>
    %122 = vector.shape_cast %121 : vector<1x128x128xbf16> to vector<128x128xbf16>
    %cst_144 = arith.constant dense<0.000000e+00> : vector<256x128xf32>
    %123 = tpu.matmul %119, %122, %cst_144 {dimension_numbers = #tpu.dot_dimension_numbers<[1], [0], [0], [1], [0, 0, 1, 1], [], []>} : vector<256x128xbf16>, vector<128x128xbf16>, vector<256x128xf32> -> vector<256x128xf32>
    %124 = arith.addf %120, %123 : vector<256x128xf32>
    %c0_145 = arith.constant 0 : index
    %c0_146 = arith.constant 0 : index
    %125 = vector.load %arg8[%c0_145, %c0_146] : memref<256x128xf32, #tpu.memory_space<vmem>>, vector<256x128xf32>
    tpu.vector_store %arg8[%c0_145, %c0_146], %124 {strides = array<i32>} : memref<256x128xf32, #tpu.memory_space<vmem>>, vector<256x128xf32>,
    %c1_147 = arith.constant 1 : index
    %c0_148 = arith.constant 0 : index
    %c0_149 = arith.constant 0 : index
    %126 = vector.load %arg7[%c1_147, %c0_148, %c0_149] : memref<18x18x128xf32, #tpu.memory_space<vmem>>, vector<16x16x128xf32>
    %127 = vector.shape_cast %126 : vector<16x16x128xf32> to vector<256x128xf32>
    %128 = arith.truncf %127 : vector<256x128xf32> to vector<256x128xbf16>
    %c0_150 = arith.constant 0 : index
    %c0_151 = arith.constant 0 : index
    %129 = vector.load %arg8[%c0_150, %c0_151] : memref<256x128xf32, #tpu.memory_space<vmem>>, vector<256x128xf32>
    %c3_152 = arith.constant 3 : index
    %c0_153 = arith.constant 0 : index
    %c0_154 = arith.constant 0 : index
    %130 = vector.load %arg4[%c3_152, %c0_153, %c0_154] : memref<9x128x128xbf16, #tpu.memory_space<vmem>>, vector<1x128x128xbf16>
    %131 = vector.shape_cast %130 : vector<1x128x128xbf16> to vector<128x128xbf16>
    %cst_155 = arith.constant dense<0.000000e+00> : vector<256x128xf32>
    %132 = tpu.matmul %128, %131, %cst_155 {dimension_numbers = #tpu.dot_dimension_numbers<[1], [0], [0], [1], [0, 0, 1, 1], [], []>} : vector<256x128xbf16>, vector<128x128xbf16>, vector<256x128xf32> -> vector<256x128xf32>
    %133 = arith.addf %129, %132 : vector<256x128xf32>
    %c0_156 = arith.constant 0 : index
    %c0_157 = arith.constant 0 : index
    %134 = vector.load %arg8[%c0_156, %c0_157] : memref<256x128xf32, #tpu.memory_space<vmem>>, vector<256x128xf32>
    tpu.vector_store %arg8[%c0_156, %c0_157], %133 {strides = array<i32>} : memref<256x128xf32, #tpu.memory_space<vmem>>, vector<256x128xf32>,
    %c1_158 = arith.constant 1 : index
    %c1_159 = arith.constant 1 : index
    %c0_160 = arith.constant 0 : index
    %135 = vector.load %arg7[%c1_158, %c1_159, %c0_160] : memref<18x18x128xf32, #tpu.memory_space<vmem>>, vector<16x16x128xf32>
    %136 = vector.shape_cast %135 : vector<16x16x128xf32> to vector<256x128xf32>
    %137 = arith.truncf %136 : vector<256x128xf32> to vector<256x128xbf16>
    %c0_161 = arith.constant 0 : index
    %c0_162 = arith.constant 0 : index
    %138 = vector.load %arg8[%c0_161, %c0_162] : memref<256x128xf32, #tpu.memory_space<vmem>>, vector<256x128xf32>
    %c4_163 = arith.constant 4 : index
    %c0_164 = arith.constant 0 : index
    %c0_165 = arith.constant 0 : index
    %139 = vector.load %arg4[%c4_163, %c0_164, %c0_165] : memref<9x128x128xbf16, #tpu.memory_space<vmem>>, vector<1x128x128xbf16>
    %140 = vector.shape_cast %139 : vector<1x128x128xbf16> to vector<128x128xbf16>
    %cst_166 = arith.constant dense<0.000000e+00> : vector<256x128xf32>
    %141 = tpu.matmul %137, %140, %cst_166 {dimension_numbers = #tpu.dot_dimension_numbers<[1], [0], [0], [1], [0, 0, 1, 1], [], []>} : vector<256x128xbf16>, vector<128x128xbf16>, vector<256x128xf32> -> vector<256x128xf32>
    %142 = arith.addf %138, %141 : vector<256x128xf32>
    %c0_167 = arith.constant 0 : index
    %c0_168 = arith.constant 0 : index
    %143 = vector.load %arg8[%c0_167, %c0_168] : memref<256x128xf32, #tpu.memory_space<vmem>>, vector<256x128xf32>
    tpu.vector_store %arg8[%c0_167, %c0_168], %142 {strides = array<i32>} : memref<256x128xf32, #tpu.memory_space<vmem>>, vector<256x128xf32>,
    %c1_169 = arith.constant 1 : index
    %c2_170 = arith.constant 2 : index
    %c0_171 = arith.constant 0 : index
    %144 = vector.load %arg7[%c1_169, %c2_170, %c0_171] : memref<18x18x128xf32, #tpu.memory_space<vmem>>, vector<16x16x128xf32>
    %145 = vector.shape_cast %144 : vector<16x16x128xf32> to vector<256x128xf32>
    %146 = arith.truncf %145 : vector<256x128xf32> to vector<256x128xbf16>
    %c0_172 = arith.constant 0 : index
    %c0_173 = arith.constant 0 : index
    %147 = vector.load %arg8[%c0_172, %c0_173] : memref<256x128xf32, #tpu.memory_space<vmem>>, vector<256x128xf32>
    %c5_174 = arith.constant 5 : index
    %c0_175 = arith.constant 0 : index
    %c0_176 = arith.constant 0 : index
    %148 = vector.load %arg4[%c5_174, %c0_175, %c0_176] : memref<9x128x128xbf16, #tpu.memory_space<vmem>>, vector<1x128x128xbf16>
    %149 = vector.shape_cast %148 : vector<1x128x128xbf16> to vector<128x128xbf16>
    %cst_177 = arith.constant dense<0.000000e+00> : vector<256x128xf32>
    %150 = tpu.matmul %146, %149, %cst_177 {dimension_numbers = #tpu.dot_dimension_numbers<[1], [0], [0], [1], [0, 0, 1, 1], [], []>} : vector<256x128xbf16>, vector<128x128xbf16>, vector<256x128xf32> -> vector<256x128xf32>
    %151 = arith.addf %147, %150 : vector<256x128xf32>
    %c0_178 = arith.constant 0 : index
    %c0_179 = arith.constant 0 : index
    %152 = vector.load %arg8[%c0_178, %c0_179] : memref<256x128xf32, #tpu.memory_space<vmem>>, vector<256x128xf32>
    tpu.vector_store %arg8[%c0_178, %c0_179], %151 {strides = array<i32>} : memref<256x128xf32, #tpu.memory_space<vmem>>, vector<256x128xf32>,
    %c2_180 = arith.constant 2 : index
    %c0_181 = arith.constant 0 : index
    %c0_182 = arith.constant 0 : index
    %153 = vector.load %arg7[%c2_180, %c0_181, %c0_182] : memref<18x18x128xf32, #tpu.memory_space<vmem>>, vector<16x16x128xf32>
    %154 = vector.shape_cast %153 : vector<16x16x128xf32> to vector<256x128xf32>
    %155 = arith.truncf %154 : vector<256x128xf32> to vector<256x128xbf16>
    %c0_183 = arith.constant 0 : index
    %c0_184 = arith.constant 0 : index
    %156 = vector.load %arg8[%c0_183, %c0_184] : memref<256x128xf32, #tpu.memory_space<vmem>>, vector<256x128xf32>
    %c6_185 = arith.constant 6 : index
    %c0_186 = arith.constant 0 : index
    %c0_187 = arith.constant 0 : index
    %157 = vector.load %arg4[%c6_185, %c0_186, %c0_187] : memref<9x128x128xbf16, #tpu.memory_space<vmem>>, vector<1x128x128xbf16>
    %158 = vector.shape_cast %157 : vector<1x128x128xbf16> to vector<128x128xbf16>
    %cst_188 = arith.constant dense<0.000000e+00> : vector<256x128xf32>
    %159 = tpu.matmul %155, %158, %cst_188 {dimension_numbers = #tpu.dot_dimension_numbers<[1], [0], [0], [1], [0, 0, 1, 1], [], []>} : vector<256x128xbf16>, vector<128x128xbf16>, vector<256x128xf32> -> vector<256x128xf32>
    %160 = arith.addf %156, %159 : vector<256x128xf32>
    %c0_189 = arith.constant 0 : index
    %c0_190 = arith.constant 0 : index
    %161 = vector.load %arg8[%c0_189, %c0_190] : memref<256x128xf32, #tpu.memory_space<vmem>>, vector<256x128xf32>
    tpu.vector_store %arg8[%c0_189, %c0_190], %160 {strides = array<i32>} : memref<256x128xf32, #tpu.memory_space<vmem>>, vector<256x128xf32>,
    %c2_191 = arith.constant 2 : index
    %c1_192 = arith.constant 1 : index
    %c0_193 = arith.constant 0 : index
    %162 = vector.load %arg7[%c2_191, %c1_192, %c0_193] : memref<18x18x128xf32, #tpu.memory_space<vmem>>, vector<16x16x128xf32>
    %163 = vector.shape_cast %162 : vector<16x16x128xf32> to vector<256x128xf32>
    %164 = arith.truncf %163 : vector<256x128xf32> to vector<256x128xbf16>
    %c0_194 = arith.constant 0 : index
    %c0_195 = arith.constant 0 : index
    %165 = vector.load %arg8[%c0_194, %c0_195] : memref<256x128xf32, #tpu.memory_space<vmem>>, vector<256x128xf32>
    %c7_196 = arith.constant 7 : index
    %c0_197 = arith.constant 0 : index
    %c0_198 = arith.constant 0 : index
    %166 = vector.load %arg4[%c7_196, %c0_197, %c0_198] : memref<9x128x128xbf16, #tpu.memory_space<vmem>>, vector<1x128x128xbf16>
    %167 = vector.shape_cast %166 : vector<1x128x128xbf16> to vector<128x128xbf16>
    %cst_199 = arith.constant dense<0.000000e+00> : vector<256x128xf32>
    %168 = tpu.matmul %164, %167, %cst_199 {dimension_numbers = #tpu.dot_dimension_numbers<[1], [0], [0], [1], [0, 0, 1, 1], [], []>} : vector<256x128xbf16>, vector<128x128xbf16>, vector<256x128xf32> -> vector<256x128xf32>
    %169 = arith.addf %165, %168 : vector<256x128xf32>
    %c0_200 = arith.constant 0 : index
    %c0_201 = arith.constant 0 : index
    %170 = vector.load %arg8[%c0_200, %c0_201] : memref<256x128xf32, #tpu.memory_space<vmem>>, vector<256x128xf32>
    tpu.vector_store %arg8[%c0_200, %c0_201], %169 {strides = array<i32>} : memref<256x128xf32, #tpu.memory_space<vmem>>, vector<256x128xf32>,
    %c2_202 = arith.constant 2 : index
    %c2_203 = arith.constant 2 : index
    %c0_204 = arith.constant 0 : index
    %171 = vector.load %arg7[%c2_202, %c2_203, %c0_204] : memref<18x18x128xf32, #tpu.memory_space<vmem>>, vector<16x16x128xf32>
    %172 = vector.shape_cast %171 : vector<16x16x128xf32> to vector<256x128xf32>
    %173 = arith.truncf %172 : vector<256x128xf32> to vector<256x128xbf16>
    %c0_205 = arith.constant 0 : index
    %c0_206 = arith.constant 0 : index
    %174 = vector.load %arg8[%c0_205, %c0_206] : memref<256x128xf32, #tpu.memory_space<vmem>>, vector<256x128xf32>
    %c8_207 = arith.constant 8 : index
    %c0_208 = arith.constant 0 : index
    %c0_209 = arith.constant 0 : index
    %175 = vector.load %arg4[%c8_207, %c0_208, %c0_209] : memref<9x128x128xbf16, #tpu.memory_space<vmem>>, vector<1x128x128xbf16>
    %176 = vector.shape_cast %175 : vector<1x128x128xbf16> to vector<128x128xbf16>
    %cst_210 = arith.constant dense<0.000000e+00> : vector<256x128xf32>
    %177 = tpu.matmul %173, %176, %cst_210 {dimension_numbers = #tpu.dot_dimension_numbers<[1], [0], [0], [1], [0, 0, 1, 1], [], []>} : vector<256x128xbf16>, vector<128x128xbf16>, vector<256x128xf32> -> vector<256x128xf32>
    %178 = arith.addf %174, %177 : vector<256x128xf32>
    %c0_211 = arith.constant 0 : index
    %c0_212 = arith.constant 0 : index
    %179 = vector.load %arg8[%c0_211, %c0_212] : memref<256x128xf32, #tpu.memory_space<vmem>>, vector<256x128xf32>
    tpu.vector_store %arg8[%c0_211, %c0_212], %178 {strides = array<i32>} : memref<256x128xf32, #tpu.memory_space<vmem>>, vector<256x128xf32>,
    %c0_213 = arith.constant 0 : index
    %c0_214 = arith.constant 0 : index
    %180 = vector.load %arg8[%c0_213, %c0_214] : memref<256x128xf32, #tpu.memory_space<vmem>>, vector<256x128xf32>
    %c0_215 = arith.constant 0 : index
    %c0_216 = arith.constant 0 : index
    %181 = vector.load %arg5[%c0_215, %c0_216] : memref<1x128xf32, #tpu.memory_space<vmem>>, vector<1x128xf32>
    %182 = vector.broadcast %181 : vector<1x128xf32> to vector<256x128xf32>
    %183 = arith.addf %180, %182 : vector<256x128xf32>
    %c0_217 = arith.constant 0 : index
    %c0_218 = arith.constant 0 : index
    %c0_219 = arith.constant 0 : index
    %c0_220 = arith.constant 0 : index
    %184 = vector.load %arg1[%c0_217, %c0_218, %c0_219, %c0_220] : memref<1x16x16x128xbf16, #tpu.memory_space<vmem>>, vector<1x16x16x128xbf16>
    %185 = vector.shape_cast %184 : vector<1x16x16x128xbf16> to vector<16x16x128xbf16>
    %186 = vector.shape_cast %185 : vector<16x16x128xbf16> to vector<256x128xbf16>
    %187 = arith.extf %186 : vector<256x128xbf16> to vector<256x128xf32>
    %188 = arith.addf %183, %187 : vector<256x128xf32>
    %cst_221 = arith.constant 0.000000e+00 : f32
    %189 = vector.broadcast %cst_221 : f32 to vector<256x128xf32>
    %190 = arith.maximumf %188, %189 : vector<256x128xf32>
    %191 = vector.shape_cast %190 : vector<256x128xf32> to vector<16x16x128xf32>
    %192 = arith.truncf %191 : vector<16x16x128xf32> to vector<16x16x128xbf16>
    %c0_222 = arith.constant 0 : index
    %c0_223 = arith.constant 0 : index
    %c0_224 = arith.constant 0 : index
    %c0_225 = arith.constant 0 : index
    %193 = vector.load %arg6[%c0_222, %c0_223, %c0_224, %c0_225] : memref<1x16x16x128xbf16, #tpu.memory_space<vmem>>, vector<1x16x16x128xbf16>
    %194 = vector.shape_cast %193 : vector<1x16x16x128xbf16> to vector<16x16x128xbf16>
    %195 = vector.shape_cast %192 : vector<16x16x128xbf16> to vector<1x16x16x128xbf16>
    tpu.vector_store %arg6[%c0_222, %c0_223, %c0_224, %c0_225], %195 {strides = array<i32>} : memref<1x16x16x128xbf16, #tpu.memory_space<vmem>>, vector<1x16x16x128xbf16>,
    return
  }
  func.func @transform_0(%arg0: i32) -> (i32, i32, i32, i32) {
    %c0_i32 = arith.constant 0 : i32
    %c0_i32_0 = arith.constant 0 : i32
    %c0_i32_1 = arith.constant 0 : i32
    %c0_i32_2 = arith.constant 0 : i32
    return %arg0, %c0_i32, %c0_i32_0, %c0_i32_1 : i32, i32, i32, i32
  }
  func.func @transform_1(%arg0: i32) -> (i32, i32, i32) {
    %c0_i32 = arith.constant 0 : i32
    %c0_i32_0 = arith.constant 0 : i32
    %c0_i32_1 = arith.constant 0 : i32
    %c0_i32_2 = arith.constant 0 : i32
    return %c0_i32, %c0_i32_0, %c0_i32_1 : i32, i32, i32
  }
  func.func @transform_2(%arg0: i32) -> (i32, i32) {
    %c0_i32 = arith.constant 0 : i32
    %c0_i32_0 = arith.constant 0 : i32
    %c0_i32_1 = arith.constant 0 : i32
    return %c0_i32, %c0_i32_0 : i32, i32
  }
  func.func @transform_3(%arg0: i32) -> (i32, i32, i32) {
    %c0_i32 = arith.constant 0 : i32
    %c0_i32_0 = arith.constant 0 : i32
    %c0_i32_1 = arith.constant 0 : i32
    %c0_i32_2 = arith.constant 0 : i32
    return %c0_i32, %c0_i32_0, %c0_i32_1 : i32, i32, i32
  }
  func.func @transform_4(%arg0: i32) -> (i32, i32) {
    %c0_i32 = arith.constant 0 : i32
    %c0_i32_0 = arith.constant 0 : i32
    %c0_i32_1 = arith.constant 0 : i32
    return %c0_i32, %c0_i32_0 : i32, i32
  }
  func.func @transform_5(%arg0: i32) -> (i32, i32, i32, i32) {
    %c0_i32 = arith.constant 0 : i32
    %c0_i32_0 = arith.constant 0 : i32
    %c0_i32_1 = arith.constant 0 : i32
    %c0_i32_2 = arith.constant 0 : i32
    return %arg0, %c0_i32, %c0_i32_0, %c0_i32_1 : i32, i32, i32, i32
  }
}

module attributes {stable_mosaic.version = 11 : i64} {
  func.func @_matmul_bias_kernel(%arg0: i32, %arg1: memref<128x128xbf16, #tpu.memory_space<vmem>>, %arg2: memref<128x128xbf16, #tpu.memory_space<vmem>>, %arg3: memref<1x128xf32, #tpu.memory_space<vmem>>, %arg4: memref<128x128xf32, #tpu.memory_space<vmem>>) attributes {dimension_semantics = [#tpu.dimension_semantics<parallel>], iteration_bounds = array<i64: 4>, scalar_prefetch = 0 : i64, scratch_operands = 0 : i64, tpu.core_type = #tpu.core_type<tc>, window_params = [{transform_indices = @transform_0, window_bounds = array<i64: 128, 128>}, {pipeline_mode = #tpu.pipeline_mode<synchronous>, transform_indices = @transform_1, window_bounds = array<i64: 128, 128>}, {pipeline_mode = #tpu.pipeline_mode<synchronous>, transform_indices = @transform_2, window_bounds = array<i64: 1, 128>}, {transform_indices = @transform_3, window_bounds = array<i64: 128, 128>}]} {
    %c0 = arith.constant 0 : index
    %c0_0 = arith.constant 0 : index
    %0 = vector.load %arg1[%c0, %c0_0] : memref<128x128xbf16, #tpu.memory_space<vmem>>, vector<128x128xbf16>
    %c0_1 = arith.constant 0 : index
    %c0_2 = arith.constant 0 : index
    %1 = vector.load %arg2[%c0_1, %c0_2] : memref<128x128xbf16, #tpu.memory_space<vmem>>, vector<128x128xbf16>
    %cst = arith.constant dense<0.000000e+00> : vector<128x128xf32>
    %2 = tpu.matmul %0, %1, %cst {dimension_numbers = #tpu.dot_dimension_numbers<[1], [0], [0], [1], [0, 0, 1, 1], [], []>} : vector<128x128xbf16>, vector<128x128xbf16>, vector<128x128xf32> -> vector<128x128xf32>
    %c0_3 = arith.constant 0 : index
    %c0_4 = arith.constant 0 : index
    %3 = vector.load %arg3[%c0_3, %c0_4] : memref<1x128xf32, #tpu.memory_space<vmem>>, vector<1x128xf32>
    %4 = vector.broadcast %3 : vector<1x128xf32> to vector<128x128xf32>
    %5 = arith.addf %2, %4 : vector<128x128xf32>
    %c0_5 = arith.constant 0 : index
    %c0_6 = arith.constant 0 : index
    %6 = vector.load %arg4[%c0_5, %c0_6] : memref<128x128xf32, #tpu.memory_space<vmem>>, vector<128x128xf32>
    tpu.vector_store %arg4[%c0_5, %c0_6], %5 {strides = array<i32>} : memref<128x128xf32, #tpu.memory_space<vmem>>, vector<128x128xf32>,
    return
  }
  func.func @transform_0(%arg0: i32) -> (i32, i32) {
    %c0_i32 = arith.constant 0 : i32
    %c0_i32_0 = arith.constant 0 : i32
    return %arg0, %c0_i32 : i32, i32
  }
  func.func @transform_1(%arg0: i32) -> (i32, i32) {
    %c0_i32 = arith.constant 0 : i32
    %c0_i32_0 = arith.constant 0 : i32
    %c0_i32_1 = arith.constant 0 : i32
    return %c0_i32, %c0_i32_0 : i32, i32
  }
  func.func @transform_2(%arg0: i32) -> (i32, i32) {
    %c0_i32 = arith.constant 0 : i32
    %c0_i32_0 = arith.constant 0 : i32
    %c0_i32_1 = arith.constant 0 : i32
    return %c0_i32, %c0_i32_0 : i32, i32
  }
  func.func @transform_3(%arg0: i32) -> (i32, i32) {
    %c0_i32 = arith.constant 0 : i32
    %c0_i32_0 = arith.constant 0 : i32
    return %arg0, %c0_i32 : i32, i32
  }
}

</mosaic_0001>

<bundles_post_ra>
// kernel: conv_residual_net.7
= control target key start
LH: loop header
LB: loop body
LE: loop exit
PB: predicated region body
PF: predicated region fallthrough
CT: control target
= control target key end

     0   :  { %s579_s12 = smov 0   ;;  %s645_s0 = inlined_call_operand.vmem [shape: bf16[512,128], index: 0, kind: input, shape index: {}]   ;;  %s646_s1 = inlined_call_operand.vmem [shape: bf16[128,128], index: 1, kind: input, shape index: {}]   ;;  %s647_s2 = inlined_call_operand.vmem [shape: f32[1,128], index: 2, kind: input, shape index: {}]   ;;  %s648_s3 = inlined_call_operand.vmem [shape: f32[512,128], index: 3, kind: output, shape index: {}]  }
   0x1 LB: > { %s427_s13 = sadd.s32 4294967295, %s557_s12   ;;  %p431_p0 = scmp.ge.s32.totalorder %s557_s12, 1  ;;  %s557_s12 = sphi %s579_s12, %s13_s12  }
   0x2   : > { %p138_p1 = scmp.lt.s32.totalorder %s557_s12, 5 }
   0x4   : > { %p139_p2 = pnand %p431_p0, %p138_p1 }
   0x5   : > { %s432_s22 = sshll.u32 (!%p139_p2), %s427_s13, 4 }
   0x6   : > { %142 = sbr.rel (%p139_p2) target bundleno = 204 (0xcc), region = 32  ;;  %p163_p3 = scmp.lt.s32.totalorder (!%p139_p2), %s432_s22, 63 }
   0xb   : > { %v517_v0 = vld [vmem:[%s646_s1 + $0x38] sm:$0xff]  ;;  %v516_v1 = vld [vmem:[%s646_s1 + $0x30] sm:$0xff]  ;;  %v515_v2 = vld [vmem:[%s646_s1 + $0x28] sm:$0xff]  ;;  %s650_s22 = smov (!%p163_p3, %s432_s22), 63 }
   0xc   : > { %306 = vmatpush.bf16.msra.mxu0 %v517_v0  ;;  %518 = vmatpush.bf16.msra.mxu1 %v517_v0  ;;  %v514_v3 = vld [vmem:[%s646_s1 + $0x20] sm:$0xff]  ;;  %v513_v4 = vld [vmem:[%s646_s1 + $0x18] sm:$0xff]  ;;  %v512_v5 = vld [vmem:[%s646_s1 + $0x10] sm:$0xff]  ;;  %s433_s29 = sshll.u32 %s650_s22, 2  ;;  %s435_s8 = sshll.u32 %s650_s22, 3 }
   0xd   : > { %519 = vmatpush.bf16.msra.mxu2 %v517_v0  ;;  %520 = vmatpush.bf16.msra.mxu3 %v517_v0  ;;  %v511_v6 = vld [vmem:[%s646_s1 + $0x8] sm:$0xff]  ;;  %v510_v7 = vld [vmem:[%s646_s1] sm:$0xff]  ;;  %s166_s7 = scalar_lea.vmem %s645_s0, %s433_s29  ;;  %s624_s14 = scalar_lea.vmem %s648_s3, %s435_s8 }
   0xe   : > { %v502_v8 = vld [vmem:[%s166_s7] sm:$0xff]  ;;  %v504_v9 = vld [vmem:[%s166_s7 + $0x10] sm:$0xff]  ;;  %v503_v12 = vld [vmem:[%s166_s7 + $0x8] sm:$0xff] }
   0xf   : > { %v506_v10 = vld [vmem:[%s166_s7 + $0x20] sm:$0xff]  ;;  %v508_v11 = vld [vmem:[%s166_s7 + $0x30] sm:$0xff]  ;;  %v505_v13 = vld [vmem:[%s166_s7 + $0x18] sm:$0xff] }
  0x10   : > { %307 = vmatpush.bf16.msra.mxu0 %v516_v1  ;;  %521 = vmatpush.bf16.msra.mxu1 %v516_v1  ;;  %v507_v14 = vld [vmem:[%s166_s7 + $0x28] sm:$0xff]  ;;  %v509_v15 = vld [vmem:[%s166_s7 + $0x38] sm:$0xff]  ;;  %v550_v16 = vld [vmem:[%s647_s2] ss:$0 sm:$0xff] }
  0x11   : > { %522 = vmatpush.bf16.msra.mxu2 %v516_v1  ;;  %523 = vmatpush.bf16.msra.mxu3 %v516_v1 }
  0x14   : > { %308 = vmatpush.bf16.msra.mxu0 %v515_v2  ;;  %524 = vmatpush.bf16.msra.mxu1 %v515_v2 }
  0x15   : > { %525 = vmatpush.bf16.msra.mxu2 %v515_v2  ;;  %526 = vmatpush.bf16.msra.mxu3 %v515_v2 }
  0x18   : > { %309 = vmatpush.bf16.msra.mxu0 %v514_v3  ;;  %527 = vmatpush.bf16.msra.mxu1 %v514_v3 }
  0x19   : > { %528 = vmatpush.bf16.msra.mxu2 %v514_v3  ;;  %529 = vmatpush.bf16.msra.mxu3 %v514_v3 }
  0x1c   : > { %310 = vmatpush.bf16.msra.mxu0 %v513_v4  ;;  %530 = vmatpush.bf16.msra.mxu1 %v513_v4 }
  0x1d   : > { %531 = vmatpush.bf16.msra.mxu2 %v513_v4  ;;  %532 = vmatpush.bf16.msra.mxu3 %v513_v4 }
  0x20   : > { %311 = vmatpush.bf16.msra.mxu0 %v512_v5  ;;  %533 = vmatpush.bf16.msra.mxu1 %v512_v5 }
  0x21   : > { %534 = vmatpush.bf16.msra.mxu2 %v512_v5  ;;  %535 = vmatpush.bf16.msra.mxu3 %v512_v5 }
  0x24   : > { %312 = vmatpush.bf16.msra.mxu0 %v511_v6  ;;  %536 = vmatpush.bf16.msra.mxu1 %v511_v6 }
  0x25   : > { %537 = vmatpush.bf16.msra.mxu2 %v511_v6  ;;  %538 = vmatpush.bf16.msra.mxu3 %v511_v6 }
  0x28   : > { %313 = vmatpush.bf16.msra.mxu0 %v510_v7  ;;  %539 = vmatpush.bf16.msra.mxu1 %v510_v7 }
  0x29   : > { %540 = vmatpush.bf16.msra.mxu2 %v510_v7  ;;  %541 = vmatpush.bf16.msra.mxu3 %v510_v7 }
  0x2b   : > { %314 = vmatmul.bf16.vlgmr.msra.gmra.mxu0 %v502_v8  ;;  %324 = vmatmul.bf16.vlgmr.msra.gmra.mxu1 %v504_v9 }
  0x2c   : > { %334 = vmatmul.bf16.vlgmr.msra.gmra.mxu2 %v506_v10  ;;  %344 = vmatmul.bf16.vlgmr.msra.gmra.mxu3 %v508_v11 }
  0x3b   : > { %319 = vmatmul.bf16.gmra.mxu0 %v503_v12  ;;  %329 = vmatmul.bf16.gmra.mxu1 %v505_v13 }
  0x3c   : > { %339 = vmatmul.bf16.gmra.mxu2 %v507_v14  ;;  %349 = vmatmul.bf16.gmra.mxu3 %v509_v15 }
  0xa8   : > { %v315_v17 = vpop.f32.mrf.mxu0  ;;  %v325_v18 = vpop.f32.mrf.mxu1 }
  0xa9   : > { %v316_v19 = vadd.f32 %v550_v16, %v315_v17  ;;  %v326_v20 = vadd.f32 %v550_v16, %v325_v18 }
  0xab   : > { %355 = vst [vmem:[%s624_s14] sm:$0xff] %v316_v19 }
  0xac   : > { %359 = vst [vmem:[%s624_s14 + $0x20] sm:$0xff] %v326_v20 }
  0xaf   : > { %v335_v21 = vpop.f32.mrf.mxu2  ;;  %v345_v22 = vpop.f32.mrf.mxu3 }
  0xb0   : > { %v336_v23 = vadd.f32 %v550_v16, %v335_v21  ;;  %v346_v24 = vadd.f32 %v550_v16, %v345_v22  ;;  %v317_v25 = vpop.f32.mrf.mxu0  ;;  %v327_v26 = vpop.f32.mrf.mxu1 }
  0xb1   : > { %v318_v27 = vadd.f32 %v550_v16, %v317_v25  ;;  %v328_v28 = vadd.f32 %v550_v16, %v327_v26 }
  0xb2   : > { %363 = vst [vmem:[%s624_s14 + $0x40] sm:$0xff] %v336_v23 }
  0xb3   : > { %367 = vst [vmem:[%s624_s14 + $0x60] sm:$0xff] %v346_v24 }
  0xb4   : > { %356 = vst [vmem:[%s624_s14 + $0x8] sm:$0xff] %v318_v27 }
  0xb5   : > { %360 = vst [vmem:[%s624_s14 + $0x28] sm:$0xff] %v328_v28 }
  0xb7   : > { %v337_v29 = vpop.f32.mrf.mxu2  ;;  %v347_v30 = vpop.f32.mrf.mxu3 }
  0xb8   : > { %v338_v31 = vadd.f32 %v550_v16, %v337_v29  ;;  %v348_v32 = vadd.f32 %v550_v16, %v347_v30  ;;  %v320_v33 = vpop.f32.mrf.mxu0  ;;  %v330_v34 = vpop.f32.mrf.mxu1 }
  0xb9   : > { %v321_v35 = vadd.f32 %v550_v16, %v320_v33  ;;  %v331_v36 = vadd.f32 %v550_v16, %v330_v34 }
  0xba   : > { %364 = vst [vmem:[%s624_s14 + $0x48] sm:$0xff] %v338_v31 }
  0xbb   : > { %368 = vst [vmem:[%s624_s14 + $0x68] sm:$0xff] %v348_v32 }
  0xbc   : > { %357 = vst [vmem:[%s624_s14 + $0x10] sm:$0xff] %v321_v35 }
  0xbd   : > { %361 = vst [vmem:[%s624_s14 + $0x30] sm:$0xff] %v331_v36 }
  0xbf   : > { %v340_v37 = vpop.f32.mrf.mxu2  ;;  %v350_v38 = vpop.f32.mrf.mxu3 }
  0xc0   : > { %v341_v39 = vadd.f32 %v550_v16, %v340_v37  ;;  %v351_v40 = vadd.f32 %v550_v16, %v350_v38  ;;  %v322_v41 = vpop.f32.mrf.mxu0  ;;  %v332_v42 = vpop.f32.mrf.mxu1 }
  0xc1   : > { %v323_v43 = vadd.f32 %v550_v16, %v322_v41  ;;  %v333_v44 = vadd.f32 %v550_v16, %v332_v42 }
  0xc2   : > { %365 = vst [vmem:[%s624_s14 + $0x50] sm:$0xff] %v341_v39 }
  0xc3   : > { %369 = vst [vmem:[%s624_s14 + $0x70] sm:$0xff] %v351_v40 }
  0xc4   : > { %358 = vst [vmem:[%s624_s14 + $0x18] sm:$0xff] %v323_v43 }
  0xc5   : > { %362 = vst [vmem:[%s624_s14 + $0x38] sm:$0xff] %v333_v44 }
  0xc7   : > { %v342_v45 = vpop.f32.mrf.mxu2  ;;  %v352_v46 = vpop.f32.mrf.mxu3 }
  0xc8   : > { %v343_v47 = vadd.f32 %v550_v16, %v342_v45  ;;  %v353_v48 = vadd.f32 %v550_v16, %v352_v46 }
  0xca   : > { %366 = vst [vmem:[%s624_s14 + $0x58] sm:$0xff] %v343_v47 }
  0xcb   : > { %370 = vst [vmem:[%s624_s14 + $0x78] sm:$0xff] %v353_v48 }
  0xcc PF: > { %s13_s12 = sadd.s32 1, %s557_s12  }
  0xcd   : > { %p10_p4 = scmp.ge.s32.totalorder %s13_s12, 6  }
  0xcf   :  { %12 = sbr.rel (!%p10_p4) target bundleno = 1 (0x1), region = 62 }

// kernel: conv_residual_net.4
= control target key start
LH: loop header
LB: loop body
LE: loop exit
PB: predicated region body
PF: predicated region fallthrough
CT: control target
= control target key end

     0   :  { %s642_s12 = smov 0   ;;  %s703_s0 = inlined_call_operand.vmem [shape: bf16[512,128], index: 0, kind: input, shape index: {}]   ;;  %s704_s1 = inlined_call_operand.vmem [shape: bf16[128,128], index: 1, kind: input, shape index: {}]   ;;  %s705_s2 = inlined_call_operand.vmem [shape: f32[1,128], index: 2, kind: input, shape index: {}]   ;;  %s706_s3 = inlined_call_operand.vmem [shape: bf16[512,128], index: 3, kind: output, shape index: {}]  }
   0x1 LB: > { %s443_s13 = sadd.s32 4294967295, %s620_s12   ;;  %p447_p0 = scmp.ge.s32.totalorder %s620_s12, 1  ;;  %s620_s12 = sphi %s642_s12, %s13_s12  }
   0x2   : > { %p138_p1 = scmp.lt.s32.totalorder %s620_s12, 5 }
   0x4   : > { %p139_p2 = pnand %p447_p0, %p138_p1 }
   0x5   : > { %s448_s22 = sshll.u32 (!%p139_p2), %s443_s13, 4 }
   0x6   : > { %142 = sbr.rel (%p139_p2) target bundleno = 206 (0xce), region = 32  ;;  %p163_p3 = scmp.lt.s32.totalorder (!%p139_p2), %s448_s22, 63 }
   0xb   : > { %v533_v0 = vld [vmem:[%s704_s1 + $0x38] sm:$0xff]  ;;  %v532_v1 = vld [vmem:[%s704_s1 + $0x30] sm:$0xff]  ;;  %v531_v2 = vld [vmem:[%s704_s1 + $0x28] sm:$0xff]  ;;  %s708_s22 = smov (!%p163_p3, %s448_s22), 63 }
   0xc   : > { %306 = vmatpush.bf16.msra.mxu0 %v533_v0  ;;  %581 = vmatpush.bf16.msra.mxu1 %v533_v0  ;;  %v530_v3 = vld [vmem:[%s704_s1 + $0x20] sm:$0xff]  ;;  %v529_v4 = vld [vmem:[%s704_s1 + $0x18] sm:$0xff]  ;;  %v528_v5 = vld [vmem:[%s704_s1 + $0x10] sm:$0xff]  ;;  %s449_s29 = sshll.u32 %s708_s22, 2 }
   0xd   : > { %582 = vmatpush.bf16.msra.mxu2 %v533_v0  ;;  %583 = vmatpush.bf16.msra.mxu3 %v533_v0  ;;  %v527_v6 = vld [vmem:[%s704_s1 + $0x8] sm:$0xff]  ;;  %v526_v7 = vld [vmem:[%s704_s1] sm:$0xff]  ;;  %s166_s7 = scalar_lea.vmem %s703_s0, %s449_s29  ;;  %s690_s13 = scalar_lea.vmem %s706_s3, %s449_s29 }
   0xe   : > { %v518_v8 = vld [vmem:[%s166_s7] sm:$0xff]  ;;  %v520_v9 = vld [vmem:[%s166_s7 + $0x10] sm:$0xff]  ;;  %v519_v12 = vld [vmem:[%s166_s7 + $0x8] sm:$0xff] }
   0xf   : > { %v522_v10 = vld [vmem:[%s166_s7 + $0x20] sm:$0xff]  ;;  %v524_v11 = vld [vmem:[%s166_s7 + $0x30] sm:$0xff]  ;;  %v521_v13 = vld [vmem:[%s166_s7 + $0x18] sm:$0xff] }
  0x10   : > { %307 = vmatpush.bf16.msra.mxu0 %v532_v1  ;;  %584 = vmatpush.bf16.msra.mxu1 %v532_v1  ;;  %v523_v14 = vld [vmem:[%s166_s7 + $0x28] sm:$0xff]  ;;  %v525_v15 = vld [vmem:[%s166_s7 + $0x38] sm:$0xff]  ;;  %v613_v18 = vld [vmem:[%s705_s2] ss:$0 sm:$0xff] }
  0x11   : > { %585 = vmatpush.bf16.msra.mxu2 %v532_v1  ;;  %586 = vmatpush.bf16.msra.mxu3 %v532_v1 }
  0x14   : > { %308 = vmatpush.bf16.msra.mxu0 %v531_v2  ;;  %587 = vmatpush.bf16.msra.mxu1 %v531_v2 }
  0x15   : > { %588 = vmatpush.bf16.msra.mxu2 %v531_v2  ;;  %589 = vmatpush.bf16.msra.mxu3 %v531_v2 }
  0x18   : > { %309 = vmatpush.bf16.msra.mxu0 %v530_v3  ;;  %590 = vmatpush.bf16.msra.mxu1 %v530_v3 }
  0x19   : > { %591 = vmatpush.bf16.msra.mxu2 %v530_v3  ;;  %592 = vmatpush.bf16.msra.mxu3 %v530_v3 }
  0x1c   : > { %310 = vmatpush.bf16.msra.mxu0 %v529_v4  ;;  %593 = vmatpush.bf16.msra.mxu1 %v529_v4 }
  0x1d   : > { %594 = vmatpush.bf16.msra.mxu2 %v529_v4  ;;  %595 = vmatpush.bf16.msra.mxu3 %v529_v4 }
  0x20   : > { %311 = vmatpush.bf16.msra.mxu0 %v528_v5  ;;  %596 = vmatpush.bf16.msra.mxu1 %v528_v5 }
  0x21   : > { %597 = vmatpush.bf16.msra.mxu2 %v528_v5  ;;  %598 = vmatpush.bf16.msra.mxu3 %v528_v5 }
  0x24   : > { %312 = vmatpush.bf16.msra.mxu0 %v527_v6  ;;  %599 = vmatpush.bf16.msra.mxu1 %v527_v6 }
  0x25   : > { %600 = vmatpush.bf16.msra.mxu2 %v527_v6  ;;  %601 = vmatpush.bf16.msra.mxu3 %v527_v6 }
  0x28   : > { %313 = vmatpush.bf16.msra.mxu0 %v526_v7  ;;  %602 = vmatpush.bf16.msra.mxu1 %v526_v7 }
  0x29   : > { %603 = vmatpush.bf16.msra.mxu2 %v526_v7  ;;  %604 = vmatpush.bf16.msra.mxu3 %v526_v7 }
  0x2b   : > { %314 = vmatmul.bf16.vlgmr.msra.gmra.mxu0 %v518_v8  ;;  %324 = vmatmul.bf16.vlgmr.msra.gmra.mxu1 %v520_v9 }
  0x2c   : > { %334 = vmatmul.bf16.vlgmr.msra.gmra.mxu2 %v522_v10  ;;  %344 = vmatmul.bf16.vlgmr.msra.gmra.mxu3 %v524_v11 }
  0x3b   : > { %319 = vmatmul.bf16.gmra.mxu0 %v519_v12  ;;  %329 = vmatmul.bf16.gmra.mxu1 %v521_v13 }
  0x3c   : > { %339 = vmatmul.bf16.gmra.mxu2 %v523_v14  ;;  %349 = vmatmul.bf16.gmra.mxu3 %v525_v15 }
  0xa8   : > { %v315_v16 = vpop.f32.mrf.mxu0  ;;  %v325_v17 = vpop.f32.mrf.mxu1 }
  0xa9   : > { %v316_v23 = vadd.f32 %v613_v18, %v315_v16  ;;  %v326_v24 = vadd.f32 %v613_v18, %v325_v17 }
  0xaf   : > { %v335_v19 = vpop.f32.mrf.mxu2  ;;  %v345_v20 = vpop.f32.mrf.mxu3 }
  0xb0   : > { %v317_v21 = vpop.f32.mrf.mxu0  ;;  %v327_v22 = vpop.f32.mrf.mxu1  ;;  %v336_v31 = vadd.f32 %v613_v18, %v335_v19  ;;  %v346_v32 = vadd.f32 %v613_v18, %v345_v20 }
  0xb1   : > { %v318_v25 = vadd.f32 %v613_v18, %v317_v21  ;;  %v328_v26 = vadd.f32 %v613_v18, %v327_v22 }
  0xb3   : > { %v537_v27 = vpack.c.bf16 %v318_v25, %v316_v23  ;;  %v547_v28 = vpack.c.bf16 %v328_v26, %v326_v24 }
  0xb5   : > { %538 = vst [vmem:[%s690_s13] sm:$0xff] %v537_v27  }
  0xb6   : > { %575 = vst [vmem:[%s690_s13 + $0x10] sm:$0xff] %v547_v28  }
  0xb7   : > { %v337_v29 = vpop.f32.mrf.mxu2  ;;  %v347_v30 = vpop.f32.mrf.mxu3 }
  0xb8   : > { %v338_v33 = vadd.f32 %v613_v18, %v337_v29  ;;  %v348_v34 = vadd.f32 %v613_v18, %v347_v30  ;;  %v320_v35 = vpop.f32.mrf.mxu0  ;;  %v330_v36 = vpop.f32.mrf.mxu1 }
  0xb9   : > { %v321_v43 = vadd.f32 %v613_v18, %v320_v35  ;;  %v331_v44 = vadd.f32 %v613_v18, %v330_v36 }
  0xba   : > { %v557_v37 = vpack.c.bf16 %v338_v33, %v336_v31  ;;  %v567_v38 = vpack.c.bf16 %v348_v34, %v346_v32 }
  0xbc   : > { %577 = vst [vmem:[%s690_s13 + $0x20] sm:$0xff] %v557_v37  }
  0xbd   : > { %579 = vst [vmem:[%s690_s13 + $0x30] sm:$0xff] %v567_v38  }
  0xbf   : > { %v340_v39 = vpop.f32.mrf.mxu2  ;;  %v350_v40 = vpop.f32.mrf.mxu3 }
  0xc0   : > { %v322_v41 = vpop.f32.mrf.mxu0  ;;  %v332_v42 = vpop.f32.mrf.mxu1  ;;  %v341_v51 = vadd.f32 %v613_v18, %v340_v39  ;;  %v351_v52 = vadd.f32 %v613_v18, %v350_v40 }
  0xc1   : > { %v323_v45 = vadd.f32 %v613_v18, %v322_v41  ;;  %v333_v46 = vadd.f32 %v613_v18, %v332_v42 }
  0xc3   : > { %v542_v47 = vpack.c.bf16 %v323_v45, %v321_v43  ;;  %v552_v48 = vpack.c.bf16 %v333_v46, %v331_v44 }
  0xc5   : > { %574 = vst [vmem:[%s690_s13 + $0x8] sm:$0xff] %v542_v47  }
  0xc6   : > { %576 = vst [vmem:[%s690_s13 + $0x18] sm:$0xff] %v552_v48  }
  0xc7   : > { %v342_v49 = vpop.f32.mrf.mxu2  ;;  %v352_v50 = vpop.f32.mrf.mxu3 }
  0xc8   : > { %v343_v53 = vadd.f32 %v613_v18, %v342_v49  ;;  %v353_v54 = vadd.f32 %v613_v18, %v352_v50 }
  0xca   : > { %v562_v55 = vpack.c.bf16 %v343_v53, %v341_v51  ;;  %v572_v56 = vpack.c.bf16 %v353_v54, %v351_v52 }
  0xcc   : > { %578 = vst [vmem:[%s690_s13 + $0x28] sm:$0xff] %v562_v55  }
  0xcd   : > { %580 = vst [vmem:[%s690_s13 + $0x38] sm:$0xff] %v572_v56  }
  0xce PF: > { %s13_s12 = sadd.s32 1, %s620_s12  }
  0xcf   : > { %p10_p4 = scmp.ge.s32.totalorder %s13_s12, 6  }
  0xd1   :  { %12 = sbr.rel (!%p10_p4) target bundleno = 1 (0x1), region = 62 }

// kernel: conv_residual_net.5
= control target key start
LH: loop header
LB: loop body
LE: loop exit
PB: predicated region body
PF: predicated region fallthrough
CT: control target
= control target key end

     0   :  { %s7578_s18 = smov 0   ;;  %s9352_s0 = inlined_call_operand.vmem [shape: bf16[2,16,16,128], index: 0, kind: input, shape index: {}]   ;;  %s9353_s1 = inlined_call_operand.vmem [shape: bf16[9,128,128], index: 1, kind: input, shape index: {}]   ;;  %s9354_s2 = inlined_call_operand.vmem [shape: f32[1,128], index: 2, kind: input, shape index: {}]   ;;  %s9355_s3 = inlined_call_operand.vmem [shape: bf16[9,128,128], index: 3, kind: input, shape index: {}]   ;;  %s9356_s4 = inlined_call_operand.vmem [shape: f32[1,128], index: 4, kind: input, shape index: {}]   ;;  %s9357_s5 = inlined_call_operand.vmem [shape: bf16[2,16,16,128], index: 5, kind: output, shape index: {}]  }
   0x1 LB: > { %s6250_s19 = sadd.s32 4294967295, %s7544_s18   ;;  %p6254_p0 = scmp.ge.s32.totalorder %s7544_s18, 1  ;;  %s7544_s18 = sphi %s7578_s18, %s15_s18  }
   0x2   : > { %p187_p1 = scmp.lt.s32.totalorder %s7544_s18, 3 }
   0x4   : > { %p188_p2 = pnand %p6254_p0, %p187_p1 }
   0x6   : > { %191 = sbr.rel (%p188_p2) target bundleno = 1502 (0x5de), region = 40 }
   0xb   : > { %v7102_v0 = vld [vmem:[%s9353_s1 + $0x38] sm:$0xff]  ;;  %v7546_v2 = vmov 0.0   ;;  %v7101_v3 = vld [vmem:[%s9353_s1 + $0x30] sm:$0xff]  ;;  %v7100_v5 = vld [vmem:[%s9353_s1 + $0x28] sm:$0xff]  ;;  %p215_p3 = scmp.lt.s32.totalorder %s6250_s19, 1  ;;  %v7547_v18 = vmov 0.0|0.0  }
   0xc   : > { %v7110_v1 = vld [vmem:[%s9353_s1 + $0x78] sm:$0xff]  ;;  %225 = vst [vmem:[#allocation2] sm:$0xff] %v7546_v2  ;;  %552 = vmatpush.bf16.msra.mxu0 %v7102_v0  ;;  %7492 = vmatpush.bf16.msra.mxu2 %v7102_v0  ;;  %v7109_v4 = vld [vmem:[%s9353_s1 + $0x70] sm:$0xff]  ;;  %v7108_v6 = vld [vmem:[%s9353_s1 + $0x68] sm:$0xff] }
   0xd   : > { %226 = vst [vmem:[#allocation2 + $0x8] sm:$0xff] %v7546_v2  ;;  %7500 = vmatpush.bf16.msra.mxu3 %v7110_v1  ;;  %850 = vmatpush.bf16.msra.mxu1 %v7110_v1  ;;  %v7099_v7 = vld [vmem:[%s9353_s1 + $0x20] sm:$0xff]  ;;  %v7098_v9 = vld [vmem:[%s9353_s1 + $0x18] sm:$0xff]  ;;  %v7097_v11 = vld [vmem:[%s9353_s1 + $0x10] sm:$0xff]  ;;  %s9388_s19 = smov (!%p215_p3, %s6250_s19), 1 }
   0xe   : > { %227 = vst [vmem:[#allocation2 + $0x10] sm:$0x3] %v7546_v2  ;;  %v7107_v8 = vld [vmem:[%s9353_s1 + $0x60] sm:$0xff]  ;;  %v7106_v10 = vld [vmem:[%s9353_s1 + $0x58] sm:$0xff]  ;;  %v7105_v12 = vld [vmem:[%s9353_s1 + $0x50] sm:$0xff]  ;;  %s7093_s29 = sshll.u32 %s9388_s19, 7 }
   0xf   : > { %228 = vst [vmem:[#allocation2 + $0x18] sm:$0xff] %v7546_v2  ;;  %v7096_v13 = vld [vmem:[%s9353_s1 + $0x8] sm:$0xff]  ;;  %v7095_v15 = vld [vmem:[%s9353_s1] sm:$0xff]  ;;  %s7677_s7 = scalar_lea.vmem %s9352_s0, %s7093_s29  ;;  %v7118_v21 = vld [vmem:[%s9353_s1 + $0xb8] sm:$0xff]  ;;  %s9204_s22 = scalar_lea.vmem %s9357_s5, %s7093_s29 }
  0x10   : > { %229 = vst [vmem:[#allocation2 + $0x20] sm:$0xff] %v7546_v2  ;;  %553 = vmatpush.bf16.msra.mxu0 %v7101_v3  ;;  %7493 = vmatpush.bf16.msra.mxu2 %v7101_v3  ;;  %v7104_v14 = vld [vmem:[%s9353_s1 + $0x48] sm:$0xff]  ;;  %v7103_v16 = vld [vmem:[%s9353_s1 + $0x40] sm:$0xff]  ;;  %v7517_v17 = vld [vmem:[%s7677_s7 + $0x38] sm:$0xff] }
  0x11   : > { %230 = vst [vmem:[#allocation2 + $0x28] sm:$0x3] %v7546_v2  ;;  %7501 = vmatpush.bf16.msra.mxu3 %v7109_v4  ;;  %851 = vmatpush.bf16.msra.mxu1 %v7109_v4  ;;  %v7126_v23 = vld [vmem:[%s9353_s1 + $0xf8] sm:$0xff]  ;;  %v7518_v26 = vld [vmem:[%s7677_s7 + $0x40] sm:$0xff]  ;;  %v7117_v28 = vld [vmem:[%s9353_s1 + $0xb0] sm:$0xff] }
  0x12   : > { %231 = vst [vmem:[#allocation2 + $0x30] sm:$0xff] %v7546_v2  ;;  %v7134_v24 = vld [vmem:[%s9353_s1 + $0x138] sm:$0xff]  ;;  %v7240_v27 = vld [vmem:[%s7677_s7] sm:$0xff]   ;;  %v7125_v30 = vld [vmem:[%s9353_s1 + $0xf0] sm:$0xff] }
  0x13   : > { %232 = vst [vmem:[#allocation2 + $0x38] sm:$0xff] %v7546_v2  ;;  %v7453_v25 = vld [vmem:[%s7677_s7 + $0x38] sm:$0xff]   ;;  %v7715_v29 = vld [vmem:[%s7677_s7] sm:$0xff]  ;;  %v7133_v32 = vld [vmem:[%s9353_s1 + $0x130] sm:$0xff]  ;;  %v7241_v35 = vunpack.c.l.bf16 %v7240_v27  ;;  %v7242_v36 = vunpack.c.h.bf16 %v7240_v27 }
  0x14   : > { %233 = vst [vmem:[#allocation2 + $0x40] sm:$0x3] %v7546_v2  ;;  %554 = vmatpush.bf16.msra.mxu0 %v7100_v5  ;;  %7494 = vmatpush.bf16.msra.mxu2 %v7100_v5  ;;  %v705_v19 = vld [vmem:[#allocation2 + $0x1] sm:$0xff]  ;;  %v7269_v31 = vunpack.c.l.bf16 %v7453_v25  ;;  %v7270_v33 = vunpack.c.h.bf16 %v7453_v25  ;;  %v7448_v56 = vld [vmem:[%s7677_s7 + $0x10] sm:$0xff]   ;;  %v7130_v25 = vld [vmem:[%s9353_s1 + $0x118] sm:$0xff] }
  0x15   : > { %234 = vst [vmem:[#allocation2 + $0x48] sm:$0xff] %v7546_v2  ;;  %7502 = vmatpush.bf16.msra.mxu3 %v7108_v6  ;;  %852 = vmatpush.bf16.msra.mxu1 %v7108_v6  ;;  %v706_v20 = vld [vmem:[#allocation2 + $0x9] sm:$0xff]  ;;  %v7454_v34 = vld [vmem:[%s7677_s7 + $0x40] sm:$0xff]   ;;  %v7249_v58 = vunpack.c.l.bf16 %v7448_v56  ;;  %v7250_v59 = vunpack.c.h.bf16 %v7448_v56 }
  0x16   : > { %235 = vst [vmem:[#allocation2 + $0x50] sm:$0xff] %v7546_v2  ;;  %v737_v22 = vpack.c.bf16 %v706_v20, %v705_v19  ;;  %v7447_v37 = vld [vmem:[%s7677_s7 + $0x8] sm:$0xff]   ;;  %v7273_v38 = vunpack.c.l.bf16 %v7454_v34  ;;  %v7274_v39 = vunpack.c.h.bf16 %v7454_v34  ;;  %v7456_v57 = vld [vmem:[%s7677_s7 + $0x50] sm:$0xff]   ;;  %v7115_v5 = vld [vmem:[%s9353_s1 + $0xa0] sm:$0xff] }
  0x17   : > { %236 = vst [vmem:[#allocation2 + $0x58] sm:$0x3] %v7546_v2  ;;  %v7455_v40 = vld [vmem:[%s7677_s7 + $0x48] sm:$0xff]   ;;  %v7245_v41 = vunpack.c.l.bf16 %v7447_v37  ;;  %v7246_v42 = vunpack.c.h.bf16 %v7447_v37  ;;  %v7281_v60 = vunpack.c.l.bf16 %v7456_v57  ;;  %v7282_v61 = vunpack.c.h.bf16 %v7456_v57  ;;  %v7522_v4 = vld [vmem:[%s7677_s7 + $0x50] sm:$0xff] }
  0x18   : > { %237 = vst [vmem:[#allocation2 + $0x60] sm:$0xff] %v7546_v2  ;;  %555 = vmatpush.bf16.msra.mxu0 %v7099_v7  ;;  %7495 = vmatpush.bf16.msra.mxu2 %v7099_v7  ;;  %v7277_v43 = vunpack.c.l.bf16 %v7455_v40  ;;  %v7278_v44 = vunpack.c.h.bf16 %v7455_v40  ;;  %v7520_v49 = vld [vmem:[%s7677_s7 + $0x48] sm:$0xff]  ;;  %v7757_v6 = vld [vmem:[%s7677_s7 + $0x10] sm:$0xff]  ;;  %v7123_v7 = vld [vmem:[%s9353_s1 + $0xe0] sm:$0xff] }
  0x19   : > { %238 = vst [vmem:[#allocation2 + $0x68] sm:$0xff] %v7546_v2  ;;  %7503 = vmatpush.bf16.msra.mxu3 %v7107_v8  ;;  %853 = vmatpush.bf16.msra.mxu1 %v7107_v8  ;;  %v7116_v52 = vld [vmem:[%s9353_s1 + $0xa8] sm:$0xff]  ;;  %v7131_v8 = vld [vmem:[%s9353_s1 + $0x120] sm:$0xff]  ;;  %v7113_v40 = vld [vmem:[%s9353_s1 + $0x90] sm:$0xff] }
  0x1a   : > { %239 = vst [vmem:[#allocation2 + $0x70] sm:$0x3] %v7546_v2  ;;  %v7738_v53 = vld [vmem:[%s7677_s7 + $0x8] sm:$0xff] }
  0x1b   : > { %240 = vst [vmem:[#allocation2 + $0x78] sm:$0xff] %v7546_v2  ;;  %v7124_v54 = vld [vmem:[%s9353_s1 + $0xe8] sm:$0xff] }
  0x1c   : > { %241 = vst [vmem:[#allocation2 + $0x80] sm:$0xff] %v7546_v2  ;;  %556 = vmatpush.bf16.msra.mxu0 %v7098_v9  ;;  %7496 = vmatpush.bf16.msra.mxu2 %v7098_v9  ;;  %v7132_v55 = vld [vmem:[%s9353_s1 + $0x128] sm:$0xff]  ;;  %v7449_v9 = vld [vmem:[%s7677_s7 + $0x18] sm:$0xff]  }
  0x1d   : > { %242 = vst [vmem:[#allocation2 + $0x88] sm:$0x3] %v7546_v2  ;;  %7504 = vmatpush.bf16.msra.mxu3 %v7106_v10  ;;  %854 = vmatpush.bf16.msra.mxu1 %v7106_v10  ;;  %v7253_v10 = vunpack.c.l.bf16 %v7449_v9 }
  0x1e   : > { %243 = vst [vmem:[#allocation2 + $0x90] sm:$0xff] %v7546_v2 }
  0x1f   : > { %244 = vst [vmem:[#allocation2 + $0x98] sm:$0xff] %v7546_v2 }
  0x20   : > { %245 = vst [vmem:[#allocation2 + $0xa0] sm:$0x3] %v7546_v2  ;;  %557 = vmatpush.bf16.msra.mxu0 %v7097_v11  ;;  %7497 = vmatpush.bf16.msra.mxu2 %v7097_v11  ;;  %v7254_v11 = vunpack.c.h.bf16 %v7449_v9 }
  0x21   : > { %246 = vst [vmem:[#allocation2 + $0xa8] sm:$0xff] %v7546_v2  ;;  %7505 = vmatpush.bf16.msra.mxu3 %v7105_v12  ;;  %855 = vmatpush.bf16.msra.mxu1 %v7105_v12  ;;  %v7457_v12 = vld [vmem:[%s7677_s7 + $0x58] sm:$0xff]  }
  0x22   : > { %247 = vst [vmem:[#allocation2 + $0xb0] sm:$0xff] %v7546_v2 }
  0x23   : > { %248 = vst [vmem:[#allocation2 + $0xb8] sm:$0x3] %v7546_v2 }
  0x24   : > { %249 = vst [vmem:[#allocation2 + $0xc0] sm:$0xff] %v7546_v2  ;;  %558 = vmatpush.bf16.msra.mxu0 %v7096_v13  ;;  %7498 = vmatpush.bf16.msra.mxu2 %v7096_v13  ;;  %v7285_v13 = vunpack.c.l.bf16 %v7457_v12 }
  0x25   : > { %250 = vst [vmem:[#allocation2 + $0xc8] sm:$0xff] %v7546_v2  ;;  %7506 = vmatpush.bf16.msra.mxu3 %v7104_v14  ;;  %856 = vmatpush.bf16.msra.mxu1 %v7104_v14  ;;  %v7286_v14 = vunpack.c.h.bf16 %v7457_v12 }
  0x26   : > { %251 = vst [vmem:[#allocation2 + $0xd0] sm:$0x3] %v7546_v2 }
  0x27   : > { %252 = vst [vmem:[#allocation2 + $0xd8] sm:$0xff] %v7546_v2 }
  0x28   : > { %253 = vst [vmem:[#allocation2 + $0xe0] sm:$0xff] %v7546_v2  ;;  %559 = vmatpush.bf16.msra.mxu0 %v7095_v15  ;;  %7499 = vmatpush.bf16.msra.mxu2 %v7095_v15 }
  0x29   : > { %254 = vst [vmem:[#allocation2 + $0xe8] sm:$0x3] %v7546_v2  ;;  %7507 = vmatpush.bf16.msra.mxu3 %v7103_v16  ;;  %857 = vmatpush.bf16.msra.mxu1 %v7103_v16 }
  0x2a   : > { %255 = vst [vmem:[#allocation2 + $0xf0] sm:$0xff] %v7546_v2 }
  0x2b   : > { %256 = vst [vmem:[#allocation2 + $0xf8] sm:$0xff] %v7546_v2  ;;  %560 = vmatmul.bf16.vlgmr.msra.gmra.mxu0 %v7547_v18 }
  0x2c   : > { %257 = vst [vmem:[#allocation2 + $0x100] sm:$0x3] %v7546_v2  ;;  %898 = vmatmul.bf16.vlgmr.msra.gmra.mxu3 %v7517_v17  ;;  %1148 = vmatpush.bf16.msrb.mxu2 %v7118_v21  ;;  %v7524_v21 = vld [vmem:[%s7677_s7 + $0x58] sm:$0xff] }
  0x2d   : > { %258 = vst [vmem:[#allocation2 + $0x108] sm:$0xff] %v7546_v2  ;;  %858 = vmatmul.bf16.vlgmr.msra.gmra.mxu1 %v737_v22  ;;  %1446 = vmatpush.bf16.msrb.mxu3 %v7126_v23  ;;  %v7114_v22 = vld [vmem:[%s9353_s1 + $0x98] sm:$0xff] }
  0x2e   : > { %259 = vst [vmem:[#allocation2 + $0x110] sm:$0xff] %v7546_v2  ;;  %1744 = vmatpush.bf16.msrb.mxu0 %v7134_v24  ;;  %v7776_v23 = vld [vmem:[%s7677_s7 + $0x18] sm:$0xff] }
  0x2f   : > { %260 = vst [vmem:[#allocation2 + $0x118] sm:$0x3] %v7546_v2  ;;  %v7122_v24 = vld [vmem:[%s9353_s1 + $0xd8] sm:$0xff] }
  0x30   : > { %261 = vst [vmem:[#allocation2 + $0x120] sm:$0xff] %v7546_v2  ;;  %1149 = vmatpush.bf16.msrb.mxu2 %v7117_v28 }
  0x31   : > { %262 = vst [vmem:[#allocation2 + $0x128] sm:$0xff] %v7546_v2  ;;  %1447 = vmatpush.bf16.msrb.mxu3 %v7125_v30  ;;  %v7458_v30 = vld [vmem:[%s7677_s7 + $0x60] sm:$0xff]  }
  0x32   : > { %263 = vst [vmem:[#allocation2 + $0x130] sm:$0x3] %v7546_v2  ;;  %1745 = vmatpush.bf16.msrb.mxu0 %v7133_v32  ;;  %v7290_v32 = vunpack.c.h.bf16 %v7458_v30 }
  0x33   : > { %264 = vst [vmem:[#allocation2 + $0x138] sm:$0xff] %v7546_v2 }
  0x34   : > { %265 = vst [vmem:[#allocation2 + $0x140] sm:$0xff] %v7546_v2  ;;  %1150 = vmatpush.bf16.msrb.mxu2 %v7116_v52 }
  0x35   : > { %266 = vst [vmem:[#allocation2 + $0x148] sm:$0x3] %v7546_v2  ;;  %1448 = vmatpush.bf16.msrb.mxu3 %v7124_v54 }
  0x36   : > { %267 = vst [vmem:[#allocation2 + $0x150] sm:$0xff] %v7546_v2  ;;  %1746 = vmatpush.bf16.msrb.mxu0 %v7132_v55 }
  0x37   : > { %268 = vst [vmem:[#allocation2 + $0x158] sm:$0xff] %v7546_v2 }
  0x38   : > { %269 = vst [vmem:[#allocation2 + $0x160] sm:$0x3] %v7546_v2  ;;  %1151 = vmatpush.bf16.msrb.mxu2 %v7115_v5 }
  0x39   : > { %270 = vst [vmem:[#allocation2 + $0x168] sm:$0xff] %v7546_v2  ;;  %1449 = vmatpush.bf16.msrb.mxu3 %v7123_v7 }
  0x3a   : > { %271 = vst [vmem:[#allocation2 + $0x170] sm:$0xff] %v7546_v2  ;;  %1747 = vmatpush.bf16.msrb.mxu0 %v7131_v8 }
  0x3b   : > { %272 = vst [vmem:[#allocation2 + $0x178] sm:$0x3] %v7546_v2 }
  0x3c   : > { %273 = vst [vmem:[#allocation2 + $0x180] sm:$0xff] %v7546_v2  ;;  %903 = vmatmul.bf16.gmra.mxu3 %v7518_v26  ;;  %v7450_v26 = vld [vmem:[%s7677_s7 + $0x20] sm:$0xff]   ;;  %1152 = vmatpush.bf16.msrb.mxu2 %v7114_v22 }
  0x3d   : > { %274 = vst [vmem:[#allocation2 + $0x188] sm:$0xff] %v7546_v2  ;;  %863 = vmatmul.bf16.gmra.mxu1 %v7715_v29  ;;  %v7257_v27 = vunpack.c.l.bf16 %v7450_v26  ;;  %v7258_v28 = vunpack.c.h.bf16 %v7450_v26  ;;  %1450 = vmatpush.bf16.msrb.mxu3 %v7122_v24  ;;  %v7139_v22 = vld [vmem:[%s9353_s1 + $0x160] sm:$0xff]  ;;  %v7138_v26 = vld [vmem:[%s9353_s1 + $0x158] sm:$0xff] }
  0x3e   : > { %275 = vst [vmem:[#allocation2 + $0x190] sm:$0x3] %v7546_v2  ;;  %1748 = vmatpush.bf16.msrb.mxu0 %v7130_v25 }
  0x3f   : > { %276 = vst [vmem:[#allocation2 + $0x198] sm:$0xff] %v7546_v2 }
  0x40   : > { %277 = vst [vmem:[#allocation2 + $0x1a0] sm:$0xff] %v7546_v2  ;;  %1153 = vmatpush.bf16.msrb.mxu2 %v7113_v40  ;;  %v7136_v40 = vld [vmem:[%s9353_s1 + $0x148] sm:$0xff] }
  0x41   : > { %278 = vst [vmem:[#allocation2 + $0x1a8] sm:$0x3] %v7546_v2 }
  0x42   : > { %358 = vst [vmem:[#allocation2 + $0xc1] sm:$0xff] %v7269_v31  ;;  %v7289_v31 = vunpack.c.l.bf16 %v7458_v30 }
  0x43   : > { %359 = vst [vmem:[#allocation2 + $0xc9] sm:$0xff] %v7270_v33 }
  0x44   : > { %344 = vst [vmem:[#allocation2 + $0x19] sm:$0xff] %v7241_v35 }
  0x45   : > { %345 = vst [vmem:[#allocation2 + $0x21] sm:$0xff] %v7242_v36 }
  0x46   : > { %360 = vst [vmem:[#allocation2 + $0xd9] sm:$0xff] %v7273_v38 }
  0x47   : > { %361 = vst [vmem:[#allocation2 + $0xe1] sm:$0xff] %v7274_v39  ;;  %v7526_v39 = vld [vmem:[%s7677_s7 + $0x60] sm:$0xff] }
  0x48   : > { %346 = vst [vmem:[#allocation2 + $0x31] sm:$0xff] %v7245_v41  ;;  %v7795_v41 = vld [vmem:[%s7677_s7 + $0x20] sm:$0xff] }
  0x49   : > { %v424_v45 = vld [vmem:[#allocation2 + $0xc0] sm:$0xff]  ;;  %347 = vst [vmem:[#allocation2 + $0x39] sm:$0xff] %v7246_v42  ;;  %v7121_v42 = vld [vmem:[%s9353_s1 + $0xd0] sm:$0xff] }
  0x4a   : > { %v425_v46 = vld [vmem:[#allocation2 + $0xc8] sm:$0xff]  ;;  %362 = vst [vmem:[#allocation2 + $0xf1] sm:$0xff] %v7277_v43  ;;  %v7129_v43 = vld [vmem:[%s9353_s1 + $0x110] sm:$0xff]  ;;  %1451 = vmatpush.bf16.msrb.mxu3 %v7121_v42  ;;  %v7135_v42 = vld [vmem:[%s9353_s1 + $0x140] sm:$0xff] }
  0x4b   : > { %v448_v47 = vpack.c.bf16 %v425_v46, %v424_v45  ;;  %v410_v48 = vld [vmem:[#allocation2 + $0x18] sm:$0xff]  ;;  %363 = vst [vmem:[#allocation2 + $0xf9] sm:$0xff] %v7278_v44  ;;  %v7451_v44 = vld [vmem:[%s7677_s7 + $0x28] sm:$0xff]   ;;  %1749 = vmatpush.bf16.msrb.mxu0 %v7129_v43 }
  0x4c   : > { %v411_v50 = vld [vmem:[#allocation2 + $0x20] sm:$0xff]  ;;  %908 = vmatmul.bf16.gmra.mxu3 %v7520_v49  ;;  %348 = vst [vmem:[#allocation2 + $0x49] sm:$0xff] %v7249_v58  ;;  %v7261_v45 = vunpack.c.l.bf16 %v7451_v44  ;;  %v7262_v46 = vunpack.c.h.bf16 %v7451_v44  ;;  %v7528_v58 = vld [vmem:[%s7677_s7 + $0x68] sm:$0xff] }
  0x4d   : > { %600 = vmatmul.bf16.vlgmr.msra.gmra.mxu2 %v448_v47  ;;  %v7732_v51 = vpack.c.bf16 %v411_v50, %v410_v48  ;;  %868 = vmatmul.bf16.gmra.mxu1 %v7738_v53  ;;  %349 = vst [vmem:[#allocation2 + $0x51] sm:$0xff] %v7250_v59  ;;  %v426_v62 = vld [vmem:[#allocation2 + $0xd8] sm:$0xff]  ;;  %v7459_v47 = vld [vmem:[%s7677_s7 + $0x68] sm:$0xff]  }
  0x4e   : > { %364 = vst [vmem:[#allocation2 + $0x109] sm:$0xff] %v7281_v60  ;;  %v427_v63 = vld [vmem:[#allocation2 + $0xe0] sm:$0xff]  ;;  %v7293_v48 = vunpack.c.l.bf16 %v7459_v47  ;;  %v7294_v49 = vunpack.c.h.bf16 %v7459_v47  ;;  %v7112_v59 = vld [vmem:[%s9353_s1 + $0x88] sm:$0xff] }
  0x4f   : > { %565 = vmatmul.bf16.gmra.mxu0 %v7732_v51  ;;  %365 = vst [vmem:[#allocation2 + $0x111] sm:$0xff] %v7282_v61  ;;  %v412_v0 = vld [vmem:[#allocation2 + $0x30] sm:$0xff]  ;;  %v449_v2 = vpack.c.bf16 %v427_v63, %v426_v62  ;;  %v7814_v60 = vld [vmem:[%s7677_s7 + $0x28] sm:$0xff]  ;;  %v7142_v63 = vld [vmem:[%s9353_s1 + $0x178] sm:$0xff]  ;;  %1154 = vmatpush.bf16.msrb.mxu2 %v7112_v59 }
  0x50   : > { %v413_v1 = vld [vmem:[#allocation2 + $0x38] sm:$0xff]  ;;  %350 = vst [vmem:[#allocation2 + $0x61] sm:$0xff] %v7253_v10  ;;  %v7120_v61 = vld [vmem:[%s9353_s1 + $0xc8] sm:$0xff]  ;;  %2042 = vmatpush.bf16.msrb.mxu1 %v7142_v63 }
  0x51   : > { %v7750_v3 = vpack.c.bf16 %v413_v1, %v412_v0  ;;  %351 = vst [vmem:[#allocation2 + $0x69] sm:$0xff] %v7254_v11  ;;  %v428_v15 = vld [vmem:[#allocation2 + $0xf0] sm:$0xff]  ;;  %v7128_v62 = vld [vmem:[%s9353_s1 + $0x108] sm:$0xff]  ;;  %1452 = vmatpush.bf16.msrb.mxu3 %v7120_v61 }
  0x52   : > { %366 = vst [vmem:[#allocation2 + $0x121] sm:$0xff] %v7285_v13  ;;  %v429_v16 = vld [vmem:[#allocation2 + $0xf8] sm:$0xff]  ;;  %v7452_v0 = vld [vmem:[%s7677_s7 + $0x30] sm:$0xff]   ;;  %1750 = vmatpush.bf16.msrb.mxu0 %v7128_v62  ;;  %v1898_v47 = vld [vmem:[#allocation2 + $0x22] sm:$0xff] }
  0x53   : > { %367 = vst [vmem:[#allocation2 + $0x129] sm:$0xff] %v7286_v14  ;;  %v414_v17 = vld [vmem:[#allocation2 + $0x48] sm:$0xff]  ;;  %v450_v19 = vpack.c.bf16 %v429_v16, %v428_v15  ;;  %v7265_v1 = vunpack.c.l.bf16 %v7452_v0  ;;  %v7530_v14 = vld [vmem:[%s7677_s7 + $0x70] sm:$0xff]  ;;  %v7111_v16 = vld [vmem:[%s9353_s1 + $0x80] sm:$0xff] }
  0x54   : > { %v415_v18 = vld [vmem:[#allocation2 + $0x50] sm:$0xff]  ;;  %352 = vst [vmem:[#allocation2 + $0x79] sm:$0xff] %v7257_v27  ;;  %1155 = vmatpush.bf16.msrb.mxu2 %v7111_v16  ;;  %v1900_v62 = vld [vmem:[#allocation2 + $0x3a] sm:$0xff] }
  0x55   : > { %v7769_v20 = vpack.c.bf16 %v415_v18, %v414_v17  ;;  %353 = vst [vmem:[#allocation2 + $0x81] sm:$0xff] %v7258_v28  ;;  %v430_v33 = vld [vmem:[#allocation2 + $0x108] sm:$0xff]  ;;  %v7141_v15 = vld [vmem:[%s9353_s1 + $0x170] sm:$0xff]  ;;  %v7119_v18 = vld [vmem:[%s9353_s1 + $0xc0] sm:$0xff] }
  0x56   : > { %368 = vst [vmem:[#allocation2 + $0x139] sm:$0xff] %v7289_v31  ;;  %v431_v34 = vld [vmem:[#allocation2 + $0x110] sm:$0xff]  ;;  %2043 = vmatpush.bf16.msrb.mxu1 %v7141_v15  ;;  %1453 = vmatpush.bf16.msrb.mxu3 %v7119_v18 }
  0x57   : > { %369 = vst [vmem:[#allocation2 + $0x141] sm:$0xff] %v7290_v32  ;;  %v416_v35 = vld [vmem:[#allocation2 + $0x60] sm:$0xff]  ;;  %v451_v37 = vpack.c.bf16 %v431_v34, %v430_v33  ;;  %v7839_v17 = vld [vmem:[%s7677_s7 + $0x30] sm:$0xff] }
  0x58   : > { %v417_v36 = vld [vmem:[#allocation2 + $0x68] sm:$0xff]  ;;  %354 = vst [vmem:[#allocation2 + $0x91] sm:$0xff] %v7261_v45  ;;  %v7137_v34 = vld [vmem:[%s9353_s1 + $0x150] sm:$0xff] }
  0x59   : > { %v7788_v38 = vpack.c.bf16 %v417_v36, %v416_v35  ;;  %355 = vst [vmem:[#allocation2 + $0x99] sm:$0xff] %v7262_v46  ;;  %v432_v50 = vld [vmem:[#allocation2 + $0x120] sm:$0xff]  ;;  %v7150_v36 = vld [vmem:[%s9353_s1 + $0x1b8] sm:$0xff]  ;;  %v1004_v59 = vld [vmem:[#allocation2 + $0xa] sm:$0xff] }
  0x5a   : > { %370 = vst [vmem:[#allocation2 + $0x151] sm:$0xff] %v7293_v48  ;;  %v433_v52 = vld [vmem:[#allocation2 + $0x128] sm:$0xff]  ;;  %2341 = vmatpush.bf16.msra.mxu2 %v7150_v36  ;;  %v1897_v46 = vld [vmem:[#allocation2 + $0x1a] sm:$0xff]  ;;  %v1899_v61 = vld [vmem:[#allocation2 + $0x32] sm:$0xff] }
  0x5b   : > { %371 = vst [vmem:[#allocation2 + $0x159] sm:$0xff] %v7294_v49  ;;  %v418_v54 = vld [vmem:[#allocation2 + $0x78] sm:$0xff]  ;;  %v452_v56 = vpack.c.bf16 %v433_v52, %v432_v50  ;;  %v1929_v48 = vpack.c.bf16 %v1898_v47, %v1897_v46  ;;  %v1930_v63 = vpack.c.bf16 %v1900_v62, %v1899_v61 }
  0x5c   : > { %913 = vmatmul.bf16.gmra.mxu3 %v7522_v4  ;;  %v419_v55 = vld [vmem:[#allocation2 + $0x80] sm:$0xff]  ;;  %v7460_v4 = vld [vmem:[%s7677_s7 + $0x70] sm:$0xff]   ;;  %356 = vst [vmem:[#allocation2 + $0xa9] sm:$0xff] %v7265_v1 }
  0x5d   : > { %605 = vmatmul.bf16.gmra.mxu2 %v449_v2  ;;  %873 = vmatmul.bf16.gmra.mxu1 %v7757_v6  ;;  %v7807_v57 = vpack.c.bf16 %v419_v55, %v418_v54  ;;  %v7266_v2 = vunpack.c.h.bf16 %v7452_v0  ;;  %v7297_v5 = vunpack.c.l.bf16 %v7460_v4  ;;  %v7298_v7 = vunpack.c.h.bf16 %v7460_v4  ;;  %v434_v8 = vld [vmem:[#allocation2 + $0x138] sm:$0xff] }
  0x5e   : > { %v435_v9 = vld [vmem:[#allocation2 + $0x140] sm:$0xff]  ;;  %v1902_v15 = vld [vmem:[#allocation2 + $0x52] sm:$0xff] }
  0x5f   : > { %570 = vmatmul.bf16.gmra.mxu0 %v7750_v3  ;;  %357 = vst [vmem:[#allocation2 + $0xb1] sm:$0xff] %v7266_v2  ;;  %v420_v10 = vld [vmem:[#allocation2 + $0x90] sm:$0xff]  ;;  %v453_v12 = vpack.c.bf16 %v435_v9, %v434_v8 }
  0x60   : > { %372 = vst [vmem:[#allocation2 + $0x169] sm:$0xff] %v7297_v5  ;;  %v421_v11 = vld [vmem:[#allocation2 + $0x98] sm:$0xff] }
  0x61   : > { %373 = vst [vmem:[#allocation2 + $0x171] sm:$0xff] %v7298_v7  ;;  %v7829_v13 = vpack.c.bf16 %v421_v11, %v420_v10  ;;  %v436_v24 = vld [vmem:[#allocation2 + $0x150] sm:$0xff] }
  0x62   : > { %v437_v25 = vld [vmem:[#allocation2 + $0x158] sm:$0xff] }
  0x63   : > { %v422_v27 = vld [vmem:[#allocation2 + $0xa8] sm:$0xff]  ;;  %v454_v30 = vpack.c.bf16 %v437_v25, %v436_v24 }
  0x66   : > { %v423_v28 = vld [vmem:[#allocation2 + $0xb0] sm:$0xff] }
  0x67   : > { %v7858_v31 = vpack.c.bf16 %v423_v28, %v422_v27  ;;  %v438_v44 = vld [vmem:[#allocation2 + $0x168] sm:$0xff] }
  0x68   : > { %v439_v45 = vld [vmem:[#allocation2 + $0x170] sm:$0xff] }
  0x69   : > { %v455_v50 = vpack.c.bf16 %v439_v45, %v438_v44  ;;  %v7156_v44 = vld [vmem:[%s9353_s1 + $0x1e8] sm:$0xff] }
  0x6c   : > { %918 = vmatmul.bf16.gmra.mxu3 %v7524_v21  ;;  %v7127_v21 = vld [vmem:[%s9353_s1 + $0x100] sm:$0xff] }
  0x6d   : > { %610 = vmatmul.bf16.gmra.mxu2 %v450_v19  ;;  %878 = vmatmul.bf16.gmra.mxu1 %v7776_v23  ;;  %v7140_v19 = vld [vmem:[%s9353_s1 + $0x168] sm:$0xff] }
  0x6e   : > { %1751 = vmatpush.bf16.msrb.mxu0 %v7127_v21  ;;  %2044 = vmatpush.bf16.msrb.mxu1 %v7140_v19 }
  0x6f   : > { %575 = vmatmul.bf16.gmra.mxu0 %v7769_v20 }
  0x72   : > { %2045 = vmatpush.bf16.msrb.mxu1 %v7139_v22 }
  0x76   : > { %2046 = vmatpush.bf16.msrb.mxu1 %v7138_v26 }
  0x7a   : > { %2047 = vmatpush.bf16.msrb.mxu1 %v7137_v34  ;;  %v1904_v34 = vld [vmem:[#allocation2 + $0x6a] sm:$0xff] }
  0x7c   : > { %923 = vmatmul.bf16.gmra.mxu3 %v7526_v39 }
  0x7d   : > { %615 = vmatmul.bf16.gmra.mxu2 %v451_v37  ;;  %883 = vmatmul.bf16.gmra.mxu1 %v7795_v41  ;;  %v7158_v37 = vld [vmem:[%s9353_s1 + $0x1f8] sm:$0xff] }
  0x7e   : > { %2639 = vmatpush.bf16.msra.mxu3 %v7158_v37  ;;  %2048 = vmatpush.bf16.msrb.mxu1 %v7136_v40 }
  0x7f   : > { %580 = vmatmul.bf16.gmra.mxu0 %v7788_v38 }
  0x82   : > { %2049 = vmatpush.bf16.msrb.mxu1 %v7135_v42  ;;  %v7148_v42 = vld [vmem:[%s9353_s1 + $0x1a8] sm:$0xff] }
  0x8c   : > { %928 = vmatmul.bf16.gmra.mxu3 %v7528_v58  ;;  %v1003_v58 = vld [vmem:[#allocation2 + $0x2] sm:$0xff] }
  0x8d   : > { %620 = vmatmul.bf16.gmra.mxu2 %v452_v56  ;;  %888 = vmatmul.bf16.gmra.mxu1 %v7814_v60  ;;  %v1035_v1 = vpack.c.bf16 %v1004_v59, %v1003_v58 }
  0x8f   : > { %585 = vmatmul.bf16.gmra.mxu0 %v7807_v57 }
  0x9c   : > { %933 = vmatmul.bf16.gmra.mxu3 %v7530_v14  ;;  %v1901_v14 = vld [vmem:[#allocation2 + $0x4a] sm:$0xff] }
  0x9d   : > { %625 = vmatmul.bf16.gmra.mxu2 %v453_v12  ;;  %893 = vmatmul.bf16.gmra.mxu1 %v7839_v17  ;;  %v1931_v16 = vpack.c.bf16 %v1902_v15, %v1901_v14 }
  0x9f   : > { %590 = vmatmul.bf16.gmra.mxu0 %v7829_v13 }
  0xa8   : > { %v561_v32 = vpop.f32.mrf.mxu0 }
  0xaa   : > { %v859_v33 = vpop.f32.mrf.mxu1 }
  0xab   : > { %v7863_v35 = vadd.f32 %v859_v33, %v561_v32  ;;  %v1903_v33 = vld [vmem:[#allocation2 + $0x62] sm:$0xff] }
  0xac   : > { %1454 = vmatmul.bf16.vlgmr.msrb.gmra.mxu3 %v7732_v51  ;;  %v7166_v51 = vld [vmem:[%s9353_s1 + $0x238] sm:$0xff]  ;;  %v1932_v36 = vpack.c.bf16 %v1904_v34, %v1903_v33 }
  0xad   : > { %630 = vmatmul.bf16.gmra.mxu2 %v454_v30  ;;  %2937 = vmatpush.bf16.msra.mxu0 %v7166_v51 }
  0xae   : > { %2050 = vmatmul.bf16.vlgmr.msrb.gmra.mxu1 %v1929_v48 }
  0xaf   : > { %595 = vmatmul.bf16.gmra.mxu0 %v7858_v31  ;;  %v899_v39 = vpop.f32.mrf.mxu3 }
  0xb0   : > { %v7886_v55 = vpop.f32.mrf.mxu0 }
  0xb2   : > { %v7882_v43 = vpop.f32.mrf.mxu1 }
  0xb7   : > { %v901_v49 = vpop.f32.mrf.mxu3 }
  0xba   : > { %v864_v52 = vpop.f32.mrf.mxu1 }
  0xbc   : > { %1459 = vmatmul.bf16.gmra.mxu3 %v7750_v3  ;;  %v7157_v3 = vld [vmem:[%s9353_s1 + $0x1f0] sm:$0xff] }
  0xbd   : > { %635 = vmatmul.bf16.gmra.mxu2 %v455_v50  ;;  %2640 = vmatpush.bf16.msra.mxu3 %v7157_v3 }
  0xbe   : > { %2055 = vmatmul.bf16.gmra.mxu1 %v1930_v63 }
  0xbf   : > { %1752 = vmatmul.bf16.vlgmr.msrb.gmra.mxu0 %v7715_v29  ;;  %v904_v54 = vpop.f32.mrf.mxu3  ;;  %v7149_v29 = vld [vmem:[%s9353_s1 + $0x1b0] sm:$0xff] }
  0xc0   : > { %2342 = vmatpush.bf16.msra.mxu2 %v7149_v29 }
  0xc1   : > { %2641 = vmatpush.bf16.msra.mxu3 %v7156_v44 }
  0xc2   : > { %v866_v56 = vpop.f32.mrf.mxu1 }
  0xc4   : > { %2343 = vmatpush.bf16.msra.mxu2 %v7148_v42 }
  0xc7   : > { %v906_v0 = vpop.f32.mrf.mxu3 }
  0xca   : > { %v869_v5 = vpop.f32.mrf.mxu1 }
  0xcc   : > { %v566_v2 = vpop.f32.mrf.mxu0  ;;  %1464 = vmatmul.bf16.gmra.mxu3 %v7769_v20  ;;  %v7165_v20 = vld [vmem:[%s9353_s1 + $0x230] sm:$0xff] }
  0xcd   : > { %1156 = vmatmul.bf16.vlgmr.msrb.gmra.mxu2 %v1035_v1  ;;  %v7888_v4 = vadd.f32 %v864_v52, %v566_v2  ;;  %2938 = vmatpush.bf16.msra.mxu0 %v7165_v20  ;;  %v1905_v52 = vld [vmem:[#allocation2 + $0x7a] sm:$0xff] }
  0xce   : > { %2060 = vmatmul.bf16.gmra.mxu1 %v1931_v16 }
  0xcf   : > { %1757 = vmatmul.bf16.gmra.mxu0 %v7738_v53  ;;  %v909_v8 = vpop.f32.mrf.mxu3 }
  0xd0   : > { %v601_v7 = vpop.f32.mrf.mxu2 }
  0xd1   : > { %v7898_v9 = vadd.f32 %v899_v39, %v601_v7  ;;  %v1907_v7 = vld [vmem:[#allocation2 + $0x92] sm:$0xff] }
  0xd2   : > { %v871_v12 = vpop.f32.mrf.mxu1 }
  0xd4   : > { %v568_v10 = vpop.f32.mrf.mxu0 }
  0xd5   : > { %v7903_v11 = vadd.f32 %v866_v56, %v568_v10 }
  0xd7   : > { %v911_v53 = vpop.f32.mrf.mxu3 }
  0xd8   : > { %v603_v18 = vpop.f32.mrf.mxu2 }
  0xd9   : > { %v7905_v19 = vadd.f32 %v901_v49, %v603_v18 }
  0xda   : > { %v874_v24 = vpop.f32.mrf.mxu1 }
  0xdc   : > { %v571_v21 = vpop.f32.mrf.mxu0  ;;  %1469 = vmatmul.bf16.gmra.mxu3 %v7788_v38 }
  0xdd   : > { %1161 = vmatmul.bf16.gmra.mxu2 %v1929_v48  ;;  %v7907_v22 = vadd.f32 %v869_v5, %v571_v21 }
  0xde   : > { %2065 = vmatmul.bf16.gmra.mxu1 %v1932_v36 }
  0xdf   : > { %1762 = vmatmul.bf16.gmra.mxu0 %v7757_v6  ;;  %v914_v26 = vpop.f32.mrf.mxu3 }
  0xe0   : > { %v606_v25 = vpop.f32.mrf.mxu2 }
  0xe1   : > { %v7911_v27 = vadd.f32 %v904_v54, %v606_v25  ;;  %v1906_v54 = vld [vmem:[#allocation2 + $0x82] sm:$0xff] }
  0xe2   : > { %v876_v32 = vpop.f32.mrf.mxu1  ;;  %v1933_v56 = vpack.c.bf16 %v1906_v54, %v1905_v52  ;;  %v1911_v54 = vld [vmem:[#allocation2 + $0xc2] sm:$0xff] }
  0xe4   : > { %v573_v28 = vpop.f32.mrf.mxu0 }
  0xe5   : > { %v7913_v30 = vadd.f32 %v871_v12, %v573_v28  ;;  %v1909_v28 = vld [vmem:[#allocation2 + $0xaa] sm:$0xff] }
  0xe7   : > { %v916_v39 = vpop.f32.mrf.mxu3 }
  0xe8   : > { %v608_v37 = vpop.f32.mrf.mxu2 }
  0xe9   : > { %v7915_v40 = vadd.f32 %v906_v0, %v608_v37 }
  0xea   : > { %v879_v6 = vpop.f32.mrf.mxu1 }
  0xec   : > { %v576_v51 = vpop.f32.mrf.mxu0  ;;  %1474 = vmatmul.bf16.gmra.mxu3 %v7807_v57  ;;  %v7164_v57 = vld [vmem:[%s9353_s1 + $0x228] sm:$0xff] }
  0xed   : > { %1166 = vmatmul.bf16.gmra.mxu2 %v1930_v63  ;;  %v7917_v38 = vadd.f32 %v874_v24, %v576_v51  ;;  %2939 = vmatpush.bf16.msra.mxu0 %v7164_v57  ;;  %v1316_v51 = vld [vmem:[#allocation2 + $0xc8] sm:$0xff] }
  0xee   : > { %2070 = vmatmul.bf16.gmra.mxu1 %v1933_v56 }
  0xef   : > { %1767 = vmatmul.bf16.gmra.mxu0 %v7776_v23  ;;  %v919_v46 = vpop.f32.mrf.mxu3 }
  0xf0   : > { %v611_v45 = vpop.f32.mrf.mxu2 }
  0xf1   : > { %v7927_v47 = vadd.f32 %v909_v8, %v611_v45  ;;  %v1908_v8 = vld [vmem:[#allocation2 + $0x9a] sm:$0xff] }
  0xf2   : > { %v881_v50 = vpop.f32.mrf.mxu1  ;;  %v1934_v20 = vpack.c.bf16 %v1908_v8, %v1907_v7 }
  0xf4   : > { %v578_v48 = vpop.f32.mrf.mxu0 }
  0xf5   : > { %v7932_v49 = vadd.f32 %v876_v32, %v578_v48  ;;  %v1910_v32 = vld [vmem:[#allocation2 + $0xb2] sm:$0xff] }
  0xf6   : > { %v7963_v33 = vpack.c.bf16 %v1910_v32, %v1909_v28  ;;  %v1913_v28 = vld [vmem:[#allocation2 + $0xda] sm:$0xff]  ;;  %v1914_v32 = vld [vmem:[#allocation2 + $0xe2] sm:$0xff] }
  0xf7   : > { %v921_v23 = vpop.f32.mrf.mxu3 }
  0xf8   : > { %v613_v58 = vpop.f32.mrf.mxu2 }
  0xf9   : > { %v7934_v59 = vadd.f32 %v911_v53, %v613_v58  ;;  %v1912_v58 = vld [vmem:[#allocation2 + $0xca] sm:$0xff] }
  0xfa   : > { %v884_v63 = vpop.f32.mrf.mxu1 }
  0xfc   : > { %v581_v61 = vpop.f32.mrf.mxu0  ;;  %1479 = vmatmul.bf16.gmra.mxu3 %v7829_v13 }
  0xfd   : > { %1171 = vmatmul.bf16.gmra.mxu2 %v1931_v16  ;;  %v7936_v62 = vadd.f32 %v879_v6, %v581_v61  ;;  %v7155_v16 = vld [vmem:[%s9353_s1 + $0x1e0] sm:$0xff] }
  0xfe   : > { %2075 = vmatmul.bf16.gmra.mxu1 %v1934_v20  ;;  %2642 = vmatpush.bf16.msra.mxu3 %v7155_v16 }
  0xff   : > { %1772 = vmatmul.bf16.gmra.mxu0 %v7795_v41  ;;  %v924_v1 = vpop.f32.mrf.mxu3  ;;  %v7147_v41 = vld [vmem:[%s9353_s1 + $0x1a0] sm:$0xff] }
 0x100   : > { %v616_v0 = vpop.f32.mrf.mxu2  ;;  %2344 = vmatpush.bf16.msra.mxu2 %v7147_v41 }
 0x101   : > { %v7940_v2 = vadd.f32 %v914_v26, %v616_v0 }
 0x102   : > { %v886_v3 = vpop.f32.mrf.mxu1 }
 0x104   : > { %v583_v5 = vpop.f32.mrf.mxu0 }
 0x105   : > { %v7942_v29 = vadd.f32 %v881_v50, %v583_v5 }
 0x107   : > { %v926_v12 = vpop.f32.mrf.mxu3 }
 0x108   : > { %v618_v10 = vpop.f32.mrf.mxu2 }
 0x109   : > { %v7944_v14 = vadd.f32 %v916_v39, %v618_v10  ;;  %v1315_v39 = vld [vmem:[#allocation2 + $0xc0] sm:$0xff] }
 0x10a   : > { %v889_v18 = vpop.f32.mrf.mxu1  ;;  %v1340_v6 = vpack.c.bf16 %v1316_v51, %v1315_v39  ;;  %v1615_v51 = vld [vmem:[#allocation2 + $0xd9] sm:$0xff] }
 0x10c   : > { %v586_v15 = vpop.f32.mrf.mxu0  ;;  %1484 = vmatmul.bf16.gmra.mxu3 %v7858_v31  ;;  %v7163_v31 = vld [vmem:[%s9353_s1 + $0x220] sm:$0xff] }
 0x10d   : > { %1176 = vmatmul.bf16.gmra.mxu2 %v1932_v36  ;;  %v7946_v13 = vadd.f32 %v884_v63, %v586_v15  ;;  %2940 = vmatpush.bf16.msra.mxu0 %v7163_v31  ;;  %v1613_v63 = vld [vmem:[#allocation2 + $0xc1] sm:$0xff]  ;;  %v7146_v15 = vld [vmem:[%s9353_s1 + $0x198] sm:$0xff] }
 0x10e   : > { %2080 = vmatmul.bf16.gmra.mxu1 %v7963_v33  ;;  %2345 = vmatpush.bf16.msra.mxu2 %v7146_v15 }
 0x10f   : > { %1777 = vmatmul.bf16.gmra.mxu0 %v7814_v60  ;;  %v929_v21 = vpop.f32.mrf.mxu3 }
 0x110   : > { %v621_v53 = vpop.f32.mrf.mxu2 }
 0x111   : > { %v7956_v24 = vadd.f32 %v919_v46, %v621_v53 }
 0x112   : > { %v891_v37 = vpop.f32.mrf.mxu1 }
 0x114   : > { %v588_v25 = vpop.f32.mrf.mxu0 }
 0x115   : > { %v7961_v26 = vadd.f32 %v886_v3, %v588_v25  ;;  %v1318_v3 = vld [vmem:[#allocation2 + $0xe0] sm:$0xff] }
 0x117   : > { %v931_v34 = vpop.f32.mrf.mxu3 }
 0x118   : > { %v623_v60 = vpop.f32.mrf.mxu2 }
 0x119   : > { %v7965_v36 = vadd.f32 %v921_v23, %v623_v60  ;;  %v7975_v23 = vpack.c.bf16 %v1912_v58, %v1911_v54  ;;  %v7162_v60 = vld [vmem:[%s9353_s1 + $0x218] sm:$0xff] }
 0x11a   : > { %v894_v50 = vpop.f32.mrf.mxu1  ;;  %2941 = vmatpush.bf16.msra.mxu0 %v7162_v60  ;;  %v1322_v60 = vld [vmem:[#allocation2 + $0x110] sm:$0xff] }
 0x11c   : > { %v591_v42 = vpop.f32.mrf.mxu0  ;;  %1489 = vmatmul.bf16.gmra.mxu3 %v1340_v6  ;;  %v1616_v6 = vld [vmem:[#allocation2 + $0xe1] sm:$0xff] }
 0x11d   : > { %1181 = vmatmul.bf16.gmra.mxu2 %v1933_v56  ;;  %v7968_v44 = vadd.f32 %v889_v18, %v591_v42  ;;  %v1614_v56 = vld [vmem:[#allocation2 + $0xc9] sm:$0xff] }
 0x11e   : > { %2085 = vmatmul.bf16.gmra.mxu1 %v7975_v23 }
 0x11f   : > { %1782 = vmatmul.bf16.gmra.mxu0 %v7839_v17  ;;  %v934_v46 = vpop.f32.mrf.mxu3  ;;  %v1317_v17 = vld [vmem:[#allocation2 + $0xd8] sm:$0xff] }
 0x120   : > { %v626_v45 = vpop.f32.mrf.mxu2  ;;  %v1341_v7 = vpack.c.bf16 %v1318_v3, %v1317_v17 }
 0x121   : > { %v7971_v57 = vadd.f32 %v924_v1, %v626_v45  ;;  %v1638_v1 = vpack.c.bf16 %v1614_v56, %v1613_v63 }
 0x122   : > { %v896_v41 = vpop.f32.mrf.mxu1 }
 0x124   : > { %v593_v48 = vpop.f32.mrf.mxu0 }
 0x125   : > { %v7973_v52 = vadd.f32 %v891_v37, %v593_v48  ;;  %v7995_v37 = vpack.c.bf16 %v1914_v32, %v1913_v28  ;;  %v1320_v48 = vld [vmem:[#allocation2 + $0xf8] sm:$0xff]  ;;  %v1321_v32 = vld [vmem:[#allocation2 + $0x108] sm:$0xff] }
 0x127   : > { %v936_v0 = vpop.f32.mrf.mxu3 }
 0x128   : > { %v628_v61 = vpop.f32.mrf.mxu2 }
 0x129   : > { %v7977_v5 = vadd.f32 %v926_v12, %v628_v61  ;;  %v7154_v12 = vld [vmem:[%s9353_s1 + $0x1d8] sm:$0xff] }
 0x12a   : > { %2643 = vmatpush.bf16.msra.mxu3 %v7154_v12  ;;  %v7174_v61 = vld [vmem:[%s9355_s3 + $0x38] sm:$0xff] }
 0x12b   : > { %v2051_v25 = vpop.f32.mrf.mxu1  ;;  %3398 = vmatpush.bf16.msra.mxu1 %v7174_v61 }
 0x12c   : > { %v596_v8 = vpop.f32.mrf.mxu0  ;;  %1494 = vmatmul.bf16.gmra.mxu3 %v1341_v7  ;;  %v1915_v7 = vld [vmem:[#allocation2 + $0xf2] sm:$0xff] }
 0x12d   : > { %1186 = vmatmul.bf16.gmra.mxu2 %v1934_v20  ;;  %v7980_v10 = vadd.f32 %v894_v50, %v596_v8  ;;  %v1639_v50 = vpack.c.bf16 %v1616_v6, %v1615_v51  ;;  %v1916_v8 = vld [vmem:[#allocation2 + $0xfa] sm:$0xff]  ;;  %v7145_v6 = vld [vmem:[%s9353_s1 + $0x190] sm:$0xff] }
 0x12e   : > { %2090 = vmatmul.bf16.gmra.mxu1 %v7995_v37  ;;  %v8012_v15 = vpack.c.bf16 %v1916_v8, %v1915_v7  ;;  %2346 = vmatpush.bf16.msra.mxu2 %v7145_v6  ;;  %v1917_v8 = vld [vmem:[#allocation2 + $0x10a] sm:$0xff]  ;;  %v1323_v6 = vld [vmem:[#allocation2 + $0x120] sm:$0xff] }
 0x12f   : > { %1787 = vmatmul.bf16.gmra.mxu0 %v1638_v1  ;;  %v1455_v18 = vpop.f32.mrf.mxu3 }
 0x130   : > { %v631_v16 = vpop.f32.mrf.mxu2 }
 0x131   : > { %v7988_v53 = vadd.f32 %v929_v21, %v631_v16  ;;  %v1319_v21 = vld [vmem:[#allocation2 + $0xf0] sm:$0xff]  ;;  %v1618_v16 = vld [vmem:[#allocation2 + $0xf9] sm:$0xff] }
 0x132   : > { %v1342_v54 = vpack.c.bf16 %v1320_v48, %v1319_v21 }
 0x133   : > { %v2053_v63 = vpop.f32.mrf.mxu1 }
 0x134   : > { %v598_v20 = vpop.f32.mrf.mxu0 }
 0x135   : > { %v7990_v31 = vadd.f32 %v896_v41, %v598_v20  ;;  %v1617_v41 = vld [vmem:[#allocation2 + $0xf1] sm:$0xff] }
 0x137   : > { %v7997_v42 = vpop.f32.mrf.mxu3 }
 0x138   : > { %v633_v39 = vpop.f32.mrf.mxu2 }
 0x139   : > { %v7999_v45 = vadd.f32 %v931_v34, %v633_v39  ;;  %v1343_v39 = vpack.c.bf16 %v1322_v60, %v1321_v32  ;;  %v7161_v32 = vld [vmem:[%s9353_s1 + $0x210] sm:$0xff] }
 0x13a   : > { %2942 = vmatpush.bf16.msra.mxu0 %v7161_v32 }
 0x13b   : > { %v8010_v1 = vpop.f32.mrf.mxu1 }
 0x13c   : > { %v1753_v58 = vpop.f32.mrf.mxu0  ;;  %1499 = vmatmul.bf16.gmra.mxu3 %v1342_v54 }
 0x13d   : > { %1191 = vmatmul.bf16.gmra.mxu2 %v7963_v33 }
 0x13e   : > { %2095 = vmatmul.bf16.gmra.mxu1 %v8012_v15 }
 0x13f   : > { %1792 = vmatmul.bf16.gmra.mxu0 %v1639_v50  ;;  %v8006_v56 = vpop.f32.mrf.mxu3 }
 0x140   : > { %v636_v34 = vpop.f32.mrf.mxu2 }
 0x141   : > { %v8008_v17 = vadd.f32 %v934_v46, %v636_v34  ;;  %v1640_v46 = vpack.c.bf16 %v1618_v16, %v1617_v41  ;;  %v940_v41 = vadd.f32 %v7882_v43, %v7886_v55 }
 0x143   : > { %v8023_v21 = vpop.f32.mrf.mxu1 }
 0x144   : > { %v1755_v3 = vpop.f32.mrf.mxu0 }
 0x147   : > { %v8014_v20 = vpop.f32.mrf.mxu3 }
 0x148   : > { %v638_v12 = vpop.f32.mrf.mxu2 }
 0x149   : > { %v8016_v28 = vadd.f32 %v936_v0, %v638_v12  ;;  %v7153_v0 = vld [vmem:[%s9353_s1 + $0x1d0] sm:$0xff] }
 0x14a   : > { %2644 = vmatpush.bf16.msra.mxu3 %v7153_v0  ;;  %v1918_v12 = vld [vmem:[#allocation2 + $0x112] sm:$0xff]  ;;  %v1324_v0 = vld [vmem:[#allocation2 + $0x128] sm:$0xff] }
 0x14b   : > { %v8031_v7 = vpop.f32.mrf.mxu1  ;;  %v8040_v60 = vpack.c.bf16 %v1918_v12, %v1917_v8 }
 0x14c   : > { %v1758_v51 = vpop.f32.mrf.mxu0  ;;  %1504 = vmatmul.bf16.gmra.mxu3 %v1343_v39 }
 0x14d   : > { %1196 = vmatmul.bf16.gmra.mxu2 %v7975_v23 }
 0x14e   : > { %2100 = vmatmul.bf16.gmra.mxu1 %v8040_v60 }
 0x14f   : > { %1797 = vmatmul.bf16.gmra.mxu0 %v1640_v46  ;;  %v8028_v50 = vpop.f32.mrf.mxu3  ;;  %v1619_v46 = vld [vmem:[#allocation2 + $0x109] sm:$0xff] }
 0x150   : > { %v1157_v48 = vpop.f32.mrf.mxu2 }
 0x151   : > { %v1237_v54 = vadd.f32 %v1157_v48, %v7863_v35 }
 0x153   : > { %v1535_v23 = vadd.f32 %v1455_v18, %v1237_v54  ;;  %v1620_v18 = vld [vmem:[#allocation2 + $0x111] sm:$0xff] }
 0x154   : > { %v1760_v61 = vpop.f32.mrf.mxu0  ;;  %v1641_v55 = vpack.c.bf16 %v1620_v18, %v1619_v46  ;;  %v1919_v18 = vld [vmem:[#allocation2 + $0x122] sm:$0xff] }
 0x155   : > { %v1833_v34 = vadd.f32 %v1753_v58, %v1535_v23  ;;  %v7173_v23 = vld [vmem:[%s9355_s3 + $0x30] sm:$0xff] }
 0x156   : > { %3399 = vmatpush.bf16.msra.mxu1 %v7173_v23 }
 0x157   : > { %v8035_v16 = vadd.f32 %v2051_v25, %v1833_v34  ;;  %v8042_v39 = vpop.f32.mrf.mxu3  ;;  %v1344_v25 = vpack.c.bf16 %v1324_v0, %v1323_v6  ;;  %v8050_v34 = vpop.f32.mrf.mxu1 }
 0x158   : > { %v1159_v35 = vpop.f32.mrf.mxu2 }
 0x159   : > { %v1238_v58 = vadd.f32 %v1159_v35, %v940_v41 }
 0x15b   : > { %v1536_v43 = vadd.f32 %v7997_v42, %v1238_v58  ;;  %v1920_v58 = vld [vmem:[#allocation2 + $0x12a] sm:$0xff] }
 0x15c   : > { %v1763_v48 = vpop.f32.mrf.mxu0  ;;  %1509 = vmatmul.bf16.gmra.mxu3 %v1344_v25 }
 0x15d   : > { %1201 = vmatmul.bf16.gmra.mxu2 %v7995_v37  ;;  %v1834_v54 = vadd.f32 %v1755_v3, %v1536_v43  ;;  %v1621_v43 = vld [vmem:[#allocation2 + $0x121] sm:$0xff] }
 0x15f   : > { %v8052_v8 = vadd.f32 %v2053_v63, %v1834_v54  ;;  %1802 = vmatmul.bf16.gmra.mxu0 %v1641_v55  ;;  %v8054_v41 = vpop.f32.mrf.mxu3  ;;  %v8058_v46 = vpop.f32.mrf.mxu1  ;;  %v8063_v63 = vpack.c.bf16 %v1920_v58, %v1919_v18  ;;  %v1622_v55 = vld [vmem:[#allocation2 + $0x129] sm:$0xff] }
 0x160   : > { %v1162_v12 = vpop.f32.mrf.mxu2  ;;  %v1642_v23 = vpack.c.bf16 %v1622_v55, %v1621_v43 }
 0x161   : > { %v1239_v42 = vadd.f32 %v1162_v12, %v7888_v4  ;;  %2105 = vmatmul.bf16.gmra.mxu1 %v8063_v63 }
 0x163   : > { %v1537_v32 = vadd.f32 %v8006_v56, %v1239_v42  ;;  %v1325_v56 = vld [vmem:[#allocation2 + $0x138] sm:$0xff] }
 0x164   : > { %v1765_v35 = vpop.f32.mrf.mxu0 }
 0x165   : > { %v1835_v3 = vadd.f32 %v1758_v51, %v1537_v32  ;;  %v1326_v51 = vld [vmem:[#allocation2 + $0x140] sm:$0xff]  ;;  %v7144_v32 = vld [vmem:[%s9353_s1 + $0x188] sm:$0xff] }
 0x166   : > { %v1345_v12 = vpack.c.bf16 %v1326_v51, %v1325_v56  ;;  %2347 = vmatpush.bf16.msra.mxu2 %v7144_v32  ;;  %v1922_v56 = vld [vmem:[#allocation2 + $0x142] sm:$0xff] }
 0x167   : > { %v8061_v6 = vadd.f32 %v8010_v1, %v1835_v3  ;;  %v8065_v25 = vpop.f32.mrf.mxu3  ;;  %v8074_v3 = vpop.f32.mrf.mxu1 }
 0x168   : > { %v1164_v0 = vpop.f32.mrf.mxu2 }
 0x169   : > { %v1240_v4 = vadd.f32 %v1164_v0, %v7903_v11 }
 0x16b   : > { %v1538_v54 = vadd.f32 %v8014_v20, %v1240_v4  ;;  %v7152_v20 = vld [vmem:[%s9353_s1 + $0x1c8] sm:$0xff] }
 0x16c   : > { %v1768_v42 = vpop.f32.mrf.mxu0  ;;  %1514 = vmatmul.bf16.gmra.mxu3 %v1345_v12 }
 0x16d   : > { %1206 = vmatmul.bf16.gmra.mxu2 %v8012_v15  ;;  %v1836_v1 = vadd.f32 %v1760_v61, %v1538_v54  ;;  %2645 = vmatpush.bf16.msra.mxu3 %v7152_v20  ;;  %v7160_v54 = vld [vmem:[%s9353_s1 + $0x208] sm:$0xff]  ;;  %v1328_v20 = vld [vmem:[#allocation2 + $0x158] sm:$0xff] }
 0x16e   : > { %2943 = vmatpush.bf16.msra.mxu0 %v7160_v54 }
 0x16f   : > { %v8077_v11 = vadd.f32 %v8023_v21, %v1836_v1  ;;  %1807 = vmatmul.bf16.gmra.mxu0 %v1642_v23  ;;  %v8082_v58 = vpop.f32.mrf.mxu3  ;;  %v8086_v4 = vpop.f32.mrf.mxu1  ;;  %v1921_v21 = vld [vmem:[#allocation2 + $0x13a] sm:$0xff] }
 0x170   : > { %v1167_v18 = vpop.f32.mrf.mxu2  ;;  %v8094_v23 = vpack.c.bf16 %v1922_v56, %v1921_v21  ;;  %v1624_v1 = vld [vmem:[#allocation2 + $0x141] sm:$0xff] }
 0x171   : > { %v1241_v61 = vadd.f32 %v1167_v18, %v7907_v22  ;;  %v1623_v22 = vld [vmem:[#allocation2 + $0x139] sm:$0xff]  ;;  %v7172_v21 = vld [vmem:[%s9355_s3 + $0x28] sm:$0xff] }
 0x172   : > { %2110 = vmatmul.bf16.gmra.mxu1 %v8094_v23  ;;  %v1643_v18 = vpack.c.bf16 %v1624_v1, %v1623_v22 }
 0x173   : > { %v1539_v0 = vadd.f32 %v8028_v50, %v1241_v61  ;;  %3400 = vmatpush.bf16.msra.mxu1 %v7172_v21 }
 0x174   : > { %v1770_v43 = vpop.f32.mrf.mxu0 }
 0x175   : > { %v1837_v55 = vadd.f32 %v1763_v48, %v1539_v0  ;;  %v1327_v48 = vld [vmem:[#allocation2 + $0x150] sm:$0xff] }
 0x176   : > { %v1346_v61 = vpack.c.bf16 %v1328_v20, %v1327_v48  ;;  %v1923_v48 = vld [vmem:[#allocation2 + $0x152] sm:$0xff]  ;;  %v1924_v20 = vld [vmem:[#allocation2 + $0x15a] sm:$0xff] }
 0x177   : > { %v8089_v51 = vadd.f32 %v8031_v7, %v1837_v55  ;;  %v8096_v32 = vpop.f32.mrf.mxu3  ;;  %v8105_v56 = vpop.f32.mrf.mxu1 }
 0x178   : > { %v1169_v12 = vpop.f32.mrf.mxu2  ;;  %9359 = vst [vmem:[#allocation4_spill] sm:$0xff] %v8105_v56  ;;  %v2494_v56 = vld [vmem:[#allocation2 + $0x31] sm:$0xff] }
 0x179   : > { %v1242_v50 = vadd.f32 %v1169_v12, %v7913_v30 }
 0x17b   : > { %v1540_v7 = vadd.f32 %v8042_v39, %v1242_v50 }
 0x17c   : > { %v1773_v0 = vpop.f32.mrf.mxu0  ;;  %1519 = vmatmul.bf16.gmra.mxu3 %v1346_v61  ;;  %v1625_v61 = vld [vmem:[#allocation2 + $0x151] sm:$0xff] }
 0x17d   : > { %1211 = vmatmul.bf16.gmra.mxu2 %v8040_v60  ;;  %v1838_v55 = vadd.f32 %v1765_v35, %v1540_v7 }
 0x17f   : > { %v8108_v30 = vadd.f32 %v8050_v34, %v1838_v55  ;;  %1812 = vmatmul.bf16.gmra.mxu0 %v1643_v18  ;;  %v8110_v39 = vpop.f32.mrf.mxu3  ;;  %v8114_v50 = vpop.f32.mrf.mxu1  ;;  %v8119_v34 = vpack.c.bf16 %v1924_v20, %v1923_v48  ;;  %v1626_v55 = vld [vmem:[#allocation2 + $0x159] sm:$0xff] }
 0x180   : > { %v1172_v54 = vpop.f32.mrf.mxu2  ;;  %v7143_v48 = vld [vmem:[%s9353_s1 + $0x180] sm:$0xff] }
 0x181   : > { %v1243_v12 = vadd.f32 %v1172_v54, %v7917_v38  ;;  %2348 = vmatpush.bf16.msra.mxu2 %v7143_v48 }
 0x182   : > { %2115 = vmatmul.bf16.gmra.mxu1 %v8119_v34 }
 0x183   : > { %v1541_v22 = vadd.f32 %v8054_v41, %v1243_v12  ;;  %v1329_v41 = vld [vmem:[#allocation2 + $0x168] sm:$0xff]  ;;  %v1644_v12 = vpack.c.bf16 %v1626_v55, %v1625_v61 }
 0x184   : > { %v1775_v35 = vpop.f32.mrf.mxu0 }
 0x185   : > { %v1839_v1 = vadd.f32 %v1768_v42, %v1541_v22  ;;  %v1330_v42 = vld [vmem:[#allocation2 + $0x170] sm:$0xff] }
 0x186   : > { %v1347_v22 = vpack.c.bf16 %v1330_v42, %v1329_v41 }
 0x187   : > { %v8117_v7 = vadd.f32 %v8058_v46, %v1839_v1  ;;  %v8121_v21 = vpop.f32.mrf.mxu3  ;;  %v8130_v20 = vpop.f32.mrf.mxu1 }
 0x188   : > { %v1174_v18 = vpop.f32.mrf.mxu2  ;;  %9360 = vst [vmem:[#allocation5_spill] sm:$0xff] %v8130_v20  ;;  %v7159_v20 = vld [vmem:[%s9353_s1 + $0x200] sm:$0xff] }
 0x189   : > { %v1244_v38 = vadd.f32 %v1174_v18, %v7932_v49  ;;  %2944 = vmatpush.bf16.msra.mxu0 %v7159_v20 }
 0x18b   : > { %v1542_v54 = vadd.f32 %v8065_v25, %v1244_v38  ;;  %v7151_v25 = vld [vmem:[%s9353_s1 + $0x1c0] sm:$0xff] }
 0x18c   : > { %v1778_v46 = vpop.f32.mrf.mxu0  ;;  %1524 = vmatmul.bf16.gmra.mxu3 %v1347_v22  ;;  %v1925_v22 = vld [vmem:[#allocation2 + $0x16a] sm:$0xff] }
 0x18d   : > { %1216 = vmatmul.bf16.gmra.mxu2 %v8063_v63  ;;  %v1840_v1 = vadd.f32 %v1770_v43, %v1542_v54  ;;  %v7461_v43 = vld [vmem:[%s7677_s7 + $0x78] sm:$0xff]   ;;  %2646 = vmatpush.bf16.msra.mxu3 %v7151_v25 }
 0x18e   : > { %v7301_v38 = vunpack.c.l.bf16 %v7461_v43  ;;  %v7302_v41 = vunpack.c.h.bf16 %v7461_v43  ;;  %v1628_v43 = vld [vmem:[#allocation2 + $0x171] sm:$0xff] }
 0x18f   : > { %v8133_v49 = vadd.f32 %v8074_v3, %v1840_v1  ;;  %1817 = vmatmul.bf16.gmra.mxu0 %v1644_v12  ;;  %v8138_v61 = vpop.f32.mrf.mxu3  ;;  %v2081_v12 = vpop.f32.mrf.mxu1  ;;  %v1926_v1 = vld [vmem:[#allocation2 + $0x172] sm:$0xff] }
 0x190   : > { %v1177_v18 = vpop.f32.mrf.mxu2  ;;  %374 = vst [vmem:[#allocation2 + $0x181] sm:$0xff] %v7301_v38 }
 0x191   : > { %v1245_v55 = vadd.f32 %v1177_v18, %v7936_v62  ;;  %375 = vst [vmem:[#allocation2 + $0x189] sm:$0xff] %v7302_v41  ;;  %v8149_v62 = vpack.c.bf16 %v1926_v1, %v1925_v22  ;;  %v1627_v18 = vld [vmem:[#allocation2 + $0x169] sm:$0xff]  ;;  %v7171_v1 = vld [vmem:[%s9355_s3 + $0x20] sm:$0xff] }
 0x192   : > { %3401 = vmatpush.bf16.msra.mxu1 %v7171_v1 }
 0x193   : > { %v1543_v42 = vadd.f32 %v8082_v58, %v1245_v55  ;;  %2120 = vmatmul.bf16.gmra.mxu1 %v8149_v62 }
 0x194   : > { %v1780_v3 = vpop.f32.mrf.mxu0 }
 0x195   : > { %v1841_v54 = vadd.f32 %v1773_v0, %v1543_v42 }
 0x197   : > { %v8144_v48 = vadd.f32 %v8086_v4, %v1841_v54  ;;  %v1487_v58 = vpop.f32.mrf.mxu3  ;;  %v1331_v0 = vld [vmem:[#allocation2 + $0x180] sm:$0xff]  ;;  %v1645_v4 = vpack.c.bf16 %v1628_v43, %v1627_v18 }
 0x198   : > { %v1179_v25 = vpop.f32.mrf.mxu2  ;;  %v1332_v41 = vld [vmem:[#allocation2 + $0x188] sm:$0xff] }
 0x199   : > { %9361 = vst [vmem:[#allocation6_spill] sm:$0xff] %v8144_v48  ;;  %v1246_v55 = vadd.f32 %v1179_v25, %v7942_v29  ;;  %v1348_v54 = vpack.c.bf16 %v1332_v41, %v1331_v0  ;;  %v8160_v29 = vpop.f32.mrf.mxu1  ;;  %v1927_v0 = vld [vmem:[#allocation2 + $0x182] sm:$0xff] }
 0x19a   : > { %9363 = vst [vmem:[#allocation8_spill] sm:$0xff] %v8160_v29 }
 0x19b   : > { %v1544_v38 = vadd.f32 %v8096_v32, %v1246_v55 }
 0x19c   : > { %v1783_v42 = vpop.f32.mrf.mxu0  ;;  %1529 = vmatmul.bf16.gmra.mxu3 %v1348_v54 }
 0x19d   : > { %1221 = vmatmul.bf16.gmra.mxu2 %v8094_v23  ;;  %v8155_v22 = vadd.f32 %v1775_v35, %v1544_v38  ;;  %v1928_v38 = vld [vmem:[#allocation2 + $0x18a] sm:$0xff] }
 0x19e   : > { %v8167_v54 = vpack.c.bf16 %v1928_v38, %v1927_v0 }
 0x19f   : > { %9362 = vst [vmem:[#allocation7_spill] sm:$0xff] %v8155_v22  ;;  %1822 = vmatmul.bf16.gmra.mxu0 %v1645_v4  ;;  %v1490_v25 = vpop.f32.mrf.mxu3 }
 0x1a0   : > { %v1182_v20 = vpop.f32.mrf.mxu2  ;;  %9365 = vst [vmem:[#allocation10_spill] sm:$0xff] %v8167_v54 }
 0x1a1   : > { %v1247_v32 = vadd.f32 %v1182_v20, %v7946_v13  ;;  %v2086_v35 = vpop.f32.mrf.mxu1  ;;  %v2495_v20 = vld [vmem:[#allocation2 + $0x39] sm:$0xff] }
 0x1a3   : > { %v1545_v18 = vadd.f32 %v8110_v39, %v1247_v32  ;;  %2125 = vmatmul.bf16.gmra.mxu1 %v8167_v54  ;;  %v7532_v39 = vld [vmem:[%s7677_s7 + $0x78] sm:$0xff]  ;;  %v2526_v32 = vpack.c.bf16 %v2495_v20, %v2494_v56 }
 0x1a4   : > { %v1785_v43 = vpop.f32.mrf.mxu0  ;;  %v2792_v20 = vld [vmem:[#allocation2 + $0x32] sm:$0xff]  ;;  %v2793_v54 = vld [vmem:[#allocation2 + $0x3a] sm:$0xff] }
 0x1a5   : > { %v1843_v55 = vadd.f32 %v1778_v46, %v1545_v18 }
 0x1a7   : > { %v8165_v41 = vadd.f32 %v8114_v50, %v1843_v55  ;;  %v1492_v4 = vpop.f32.mrf.mxu3 }
 0x1a8   : > { %v1184_v29 = vpop.f32.mrf.mxu2 }
 0x1a9   : > { %9364 = vst [vmem:[#allocation9_spill] sm:$0xff] %v8165_v41  ;;  %v1248_v1 = vadd.f32 %v1184_v29, %v7961_v26  ;;  %v8176_v50 = vpop.f32.mrf.mxu1 }
 0x1aa   : > { %9367 = vst [vmem:[#allocation12_spill] sm:$0xff] %v8176_v50 }
 0x1ab   : > { %v1546_v13 = vadd.f32 %v8121_v21, %v1248_v1 }
 0x1ac   : > { %v1788_v46 = vpop.f32.mrf.mxu0  ;;  %2647 = vmatmul.bf16.vlgmr.msra.gmra.mxu3 %v2526_v32  ;;  %v2496_v32 = vld [vmem:[#allocation2 + $0x49] sm:$0xff] }
 0x1ad   : > { %1226 = vmatmul.bf16.gmra.mxu2 %v8119_v34  ;;  %v8174_v18 = vadd.f32 %v1780_v3, %v1546_v13 }
 0x1af   : > { %9366 = vst [vmem:[#allocation11_spill] sm:$0xff] %v8174_v18  ;;  %1827 = vmatmul.bf16.gmra.mxu0 %v7532_v39  ;;  %v1495_v0 = vpop.f32.mrf.mxu3  ;;  %v2824_v39 = vpack.c.bf16 %v2793_v54, %v2792_v20  ;;  %v2497_v18 = vld [vmem:[#allocation2 + $0x51] sm:$0xff] }
 0x1b0   : > { %v1187_v55 = vpop.f32.mrf.mxu2  ;;  %v2527_v48 = vpack.c.bf16 %v2497_v18, %v2496_v32  ;;  %v2498_v32 = vld [vmem:[#allocation2 + $0x61] sm:$0xff] }
 0x1b1   : > { %v1249_v26 = vadd.f32 %v1187_v55, %v7968_v44  ;;  %v2091_v41 = vpop.f32.mrf.mxu1 }
 0x1b3   : > { %v1547_v29 = vadd.f32 %v8138_v61, %v1249_v26  ;;  %v7170_v61 = vld [vmem:[%s9355_s3 + $0x18] sm:$0xff]  ;;  %v2196_v26 = vld [vmem:[#allocation2 + $0x30] sm:$0xff] }
 0x1b4   : > { %v1790_v38 = vpop.f32.mrf.mxu0  ;;  %3402 = vmatpush.bf16.msra.mxu1 %v7170_v61 }
 0x1b5   : > { %v1845_v21 = vadd.f32 %v1783_v42, %v1547_v29  ;;  %v2197_v29 = vld [vmem:[#allocation2 + $0x38] sm:$0xff] }
 0x1b7   : > { %v8180_v1 = vadd.f32 %v2081_v12, %v1845_v21  ;;  %v1497_v3 = vpop.f32.mrf.mxu3  ;;  %v2794_v21 = vld [vmem:[#allocation2 + $0x4a] sm:$0xff] }
 0x1b8   : > { %v1189_v56 = vpop.f32.mrf.mxu2 }
 0x1b9   : > { %v1250_v13 = vadd.f32 %v1189_v56, %v7973_v52  ;;  %v2795_v56 = vld [vmem:[#allocation2 + $0x52] sm:$0xff] }
 0x1ba   : > { %v2825_v61 = vpack.c.bf16 %v2795_v56, %v2794_v21  ;;  %v2796_v56 = vld [vmem:[#allocation2 + $0x62] sm:$0xff] }
 0x1bb   : > { %v1548_v50 = vadd.f32 %v1487_v58, %v1250_v13  ;;  %v8190_v58 = vpop.f32.mrf.mxu1  ;;  %v2228_v13 = vpack.c.bf16 %v2197_v29, %v2196_v26  ;;  %v2199_v29 = vld [vmem:[#allocation2 + $0x50] sm:$0xff] }
 0x1bc   : > { %v1793_v22 = vpop.f32.mrf.mxu0  ;;  %2652 = vmatmul.bf16.gmra.mxu3 %v2527_v48  ;;  %9368 = vst [vmem:[#allocation13_spill] sm:$0xff] %v8190_v58 }
 0x1bd   : > { %1231 = vmatmul.bf16.gmra.mxu2 %v8149_v62  ;;  %v8184_v44 = vadd.f32 %v1785_v43, %v1548_v50 }
 0x1bf   : > { %2945 = vmatmul.bf16.vlgmr.msra.gmra.mxu0 %v2824_v39  ;;  %v1500_v42 = vpop.f32.mrf.mxu3 }
 0x1c0   : > { %v1192_v12 = vpop.f32.mrf.mxu2 }
 0x1c1   : > { %v1251_v52 = vadd.f32 %v1192_v12, %v7980_v10  ;;  %v2499_v12 = vld [vmem:[#allocation2 + $0x69] sm:$0xff] }
 0x1c3   : > { %v1549_v54 = vadd.f32 %v1490_v25, %v1251_v52  ;;  %v2096_v10 = vpop.f32.mrf.mxu1  ;;  %v2528_v25 = vpack.c.bf16 %v2499_v12, %v2498_v32 }
 0x1c4   : > { %v1795_v55 = vpop.f32.mrf.mxu0 }
 0x1c5   : > { %v1847_v18 = vadd.f32 %v1788_v46, %v1549_v54 }
 0x1c7   : > { %v8192_v43 = vadd.f32 %v2086_v35, %v1847_v18  ;;  %v1502_v20 = vpop.f32.mrf.mxu3 }
 0x1c8   : > { %v1194_v50 = vpop.f32.mrf.mxu2 }
 0x1c9   : > { %9369 = vst [vmem:[#allocation14_spill] sm:$0xff] %v8192_v43  ;;  %v1252_v48 = vadd.f32 %v1194_v50, %v7990_v31 }
 0x1cb   : > { %v1550_v39 = vadd.f32 %v1492_v4, %v1252_v48  ;;  %v8198_v26 = vpop.f32.mrf.mxu1  ;;  %v2198_v4 = vld [vmem:[#allocation2 + $0x48] sm:$0xff] }
 0x1cc   : > { %v1798_v58 = vpop.f32.mrf.mxu0  ;;  %2657 = vmatmul.bf16.gmra.mxu3 %v2528_v25  ;;  %v2797_v48 = vld [vmem:[#allocation2 + $0x6a] sm:$0xff]  ;;  %v2229_v32 = vpack.c.bf16 %v2199_v29, %v2198_v4  ;;  %v2200_v29 = vld [vmem:[#allocation2 + $0x60] sm:$0xff] }
 0x1cd   : > { %2349 = vmatmul.bf16.vlgmr.msra.gmra.mxu2 %v2228_v13  ;;  %v8195_v46 = vadd.f32 %v1790_v38, %v1550_v39  ;;  %v2500_v39 = vld [vmem:[#allocation2 + $0x79] sm:$0xff]  ;;  %v2826_v12 = vpack.c.bf16 %v2797_v48, %v2796_v56 }
 0x1ce   : > { %v2798_v48 = vld [vmem:[#allocation2 + $0x7a] sm:$0xff] }
 0x1cf   : > { %2950 = vmatmul.bf16.gmra.mxu0 %v2825_v61  ;;  %v1505_v52 = vpop.f32.mrf.mxu3 }
 0x1d0   : > { %v1197_v35 = vpop.f32.mrf.mxu2 }
 0x1d1   : > { %v1253_v54 = vadd.f32 %v1197_v35, %v7898_v9  ;;  %v2501_v9 = vld [vmem:[#allocation2 + $0x81] sm:$0xff] }
 0x1d2   : > { %v2529_v25 = vpack.c.bf16 %v2501_v9, %v2500_v39  ;;  %v2502_v9 = vld [vmem:[#allocation2 + $0x91] sm:$0xff] }
 0x1d3   : > { %v1551_v18 = vadd.f32 %v1495_v0, %v1253_v54  ;;  %v2101_v35 = vpop.f32.mrf.mxu1 }
 0x1d4   : > { %v1800_v43 = vpop.f32.mrf.mxu0 }
 0x1d5   : > { %v1849_v31 = vadd.f32 %v1793_v22, %v1551_v18 }
 0x1d7   : > { %v8200_v50 = vadd.f32 %v2091_v41, %v1849_v31  ;;  %v1507_v38 = vpop.f32.mrf.mxu3  ;;  %v7169_v41 = vld [vmem:[%s9355_s3 + $0x10] sm:$0xff] }
 0x1d8   : > { %v1199_v21 = vpop.f32.mrf.mxu2  ;;  %3403 = vmatpush.bf16.msra.mxu1 %v7169_v41 }
 0x1d9   : > { %v1254_v13 = vadd.f32 %v1199_v21, %v7905_v19  ;;  %v2201_v21 = vld [vmem:[#allocation2 + $0x68] sm:$0xff] }
 0x1db   : > { %v1552_v61 = vadd.f32 %v1497_v3, %v1254_v13  ;;  %v2799_v13 = vld [vmem:[#allocation2 + $0x82] sm:$0xff] }
 0x1dc   : > { %v1803_v0 = vpop.f32.mrf.mxu0  ;;  %2662 = vmatmul.bf16.gmra.mxu3 %v2529_v25  ;;  %v2827_v41 = vpack.c.bf16 %v2799_v13, %v2798_v48  ;;  %v2800_v13 = vld [vmem:[#allocation2 + $0x92] sm:$0xff] }
 0x1dd   : > { %2354 = vmatmul.bf16.gmra.mxu2 %v2229_v32  ;;  %v8203_v22 = vadd.f32 %v1795_v55, %v1552_v61  ;;  %v2230_v61 = vpack.c.bf16 %v2201_v21, %v2200_v29 }
 0x1df   : > { %2955 = vmatmul.bf16.gmra.mxu0 %v2826_v12  ;;  %v1510_v19 = vpop.f32.mrf.mxu3  ;;  %v8212_v12 = vpop.f32.mrf.mxu1 }
 0x1e0   : > { %v1202_v54 = vpop.f32.mrf.mxu2  ;;  %9370 = vst [vmem:[#allocation15_spill] sm:$0xff] %v8212_v12  ;;  %v2203_v12 = vld [vmem:[#allocation2 + $0x80] sm:$0xff] }
 0x1e1   : > { %v1255_v18 = vadd.f32 %v1202_v54, %v7911_v27  ;;  %v2503_v27 = vld [vmem:[#allocation2 + $0x99] sm:$0xff] }
 0x1e2   : > { %v2530_v54 = vpack.c.bf16 %v2503_v27, %v2502_v9 }
 0x1e3   : > { %v1553_v3 = vadd.f32 %v1500_v42, %v1255_v18 }
 0x1e4   : > { %v1805_v31 = vpop.f32.mrf.mxu0 }
 0x1e5   : > { %v1851_v4 = vadd.f32 %v1798_v58, %v1553_v3 }
 0x1e7   : > { %v8209_v56 = vadd.f32 %v2096_v10, %v1851_v4  ;;  %v1512_v32 = vpop.f32.mrf.mxu3 }
 0x1e8   : > { %v1204_v55 = vpop.f32.mrf.mxu2 }
 0x1e9   : > { %v1256_v39 = vadd.f32 %v1204_v55, %v7915_v40  ;;  %v2106_v40 = vpop.f32.mrf.mxu1  ;;  %v2202_v55 = vld [vmem:[#allocation2 + $0x78] sm:$0xff] }
 0x1ea   : > { %v2231_v9 = vpack.c.bf16 %v2203_v12, %v2202_v55  ;;  %v2204_v55 = vld [vmem:[#allocation2 + $0x90] sm:$0xff] }
 0x1eb   : > { %v1554_v25 = vadd.f32 %v1502_v20, %v1256_v39  ;;  %v2801_v39 = vld [vmem:[#allocation2 + $0x9a] sm:$0xff] }
 0x1ec   : > { %v1808_v42 = vpop.f32.mrf.mxu0  ;;  %2667 = vmatmul.bf16.gmra.mxu3 %v2530_v54  ;;  %v2828_v27 = vpack.c.bf16 %v2801_v39, %v2800_v13  ;;  %v2505_v54 = vld [vmem:[#allocation2 + $0xb1] sm:$0xff] }
 0x1ed   : > { %2359 = vmatmul.bf16.gmra.mxu2 %v2230_v61  ;;  %v8214_v58 = vadd.f32 %v1800_v43, %v1554_v25  ;;  %v2504_v25 = vld [vmem:[#allocation2 + $0xa9] sm:$0xff] }
 0x1ef   : > { %2960 = vmatmul.bf16.gmra.mxu0 %v2827_v41  ;;  %v1515_v18 = vpop.f32.mrf.mxu3 }
 0x1f0   : > { %v1207_v10 = vpop.f32.mrf.mxu2 }
 0x1f1   : > { %v1257_v3 = vadd.f32 %v1207_v10, %v7927_v47 }
 0x1f3   : > { %v1555_v4 = vadd.f32 %v1505_v52, %v1257_v3  ;;  %v2531_v52 = vpack.c.bf16 %v2505_v54, %v2504_v25  ;;  %v2507_v54 = vld [vmem:[#allocation2 + $0xc9] sm:$0xff] }
 0x1f4   : > { %v1810_v29 = vpop.f32.mrf.mxu0 }
 0x1f5   : > { %v1853_v21 = vadd.f32 %v1803_v0, %v1555_v4  ;;  %v8222_v0 = vpop.f32.mrf.mxu1 }
 0x1f7   : > { %v8217_v20 = vadd.f32 %v2101_v35, %v1853_v21  ;;  %v1517_v61 = vpop.f32.mrf.mxu3  ;;  %v7168_v35 = vld [vmem:[%s9355_s3 + $0x8] sm:$0xff] }
 0x1f8   : > { %v1209_v48 = vpop.f32.mrf.mxu2  ;;  %3404 = vmatpush.bf16.msra.mxu1 %v7168_v35 }
 0x1f9   : > { %v1258_v43 = vadd.f32 %v1209_v48, %v7934_v59  ;;  %v2205_v48 = vld [vmem:[#allocation2 + $0x98] sm:$0xff] }
 0x1fa   : > { %v2232_v25 = vpack.c.bf16 %v2205_v48, %v2204_v55 }
 0x1fb   : > { %v1556_v41 = vadd.f32 %v1507_v38, %v1258_v43 }
 0x1fc   : > { %v1813_v47 = vpop.f32.mrf.mxu0  ;;  %2672 = vmatmul.bf16.gmra.mxu3 %v2531_v52 }
 0x1fd   : > { %2364 = vmatmul.bf16.gmra.mxu2 %v2231_v9  ;;  %v8220_v10 = vadd.f32 %v1805_v31, %v1556_v41  ;;  %v2111_v13 = vpop.f32.mrf.mxu1  ;;  %v2506_v41 = vld [vmem:[#allocation2 + $0xc1] sm:$0xff] }
 0x1fe   : > { %v2532_v35 = vpack.c.bf16 %v2507_v54, %v2506_v41  ;;  %v2508_v41 = vld [vmem:[#allocation2 + $0xd9] sm:$0xff] }
 0x1ff   : > { %2965 = vmatmul.bf16.gmra.mxu0 %v2828_v27  ;;  %v1520_v12 = vpop.f32.mrf.mxu3 }
 0x200   : > { %v1212_v59 = vpop.f32.mrf.mxu2 }
 0x201   : > { %v1259_v38 = vadd.f32 %v1212_v59, %v7940_v2 }
 0x203   : > { %v1557_v3 = vadd.f32 %v1510_v19, %v1259_v38 }
 0x204   : > { %v1815_v4 = vpop.f32.mrf.mxu0 }
 0x205   : > { %v1855_v21 = vadd.f32 %v1808_v42, %v1557_v3  ;;  %v8235_v59 = vpop.f32.mrf.mxu1 }
 0x207   : > { %v8228_v31 = vadd.f32 %v2106_v40, %v1855_v21  ;;  %v1522_v43 = vpop.f32.mrf.mxu3  ;;  %v2206_v21 = vld [vmem:[#allocation2 + $0xa8] sm:$0xff] }
 0x208   : > { %v1214_v39 = vpop.f32.mrf.mxu2 }
 0x209   : > { %v1260_v9 = vadd.f32 %v1214_v39, %v7944_v14  ;;  %v2804_v39 = vld [vmem:[#allocation2 + $0xc2] sm:$0xff] }
 0x20b   : > { %v1558_v27 = vadd.f32 %v1512_v32, %v1260_v9  ;;  %v2207_v32 = vld [vmem:[#allocation2 + $0xb0] sm:$0xff] }
 0x20c   : > { %v1818_v52 = vpop.f32.mrf.mxu0  ;;  %2677 = vmatmul.bf16.gmra.mxu3 %v2532_v35 }
 0x20d   : > { %2369 = vmatmul.bf16.gmra.mxu2 %v2232_v25  ;;  %v8231_v2 = vadd.f32 %v1810_v29, %v1558_v27  ;;  %v2805_v29 = vld [vmem:[#allocation2 + $0xca] sm:$0xff]  ;;  %v2116_v35 = vpop.f32.mrf.mxu1 }
 0x20e   : > { %v2830_v54 = vpack.c.bf16 %v2805_v29, %v2804_v39 }
 0x20f   : > { %2970 = vmatmul.bf16.gmra.mxu0 %v7963_v33  ;;  %v1525_v42 = vpop.f32.mrf.mxu3  ;;  %v2233_v33 = vpack.c.bf16 %v2207_v32, %v2206_v21  ;;  %v2208_v32 = vld [vmem:[#allocation2 + $0xc0] sm:$0xff] }
 0x210   : > { %v1217_v19 = vpop.f32.mrf.mxu2 }
 0x211   : > { %v1261_v40 = vadd.f32 %v1217_v19, %v7956_v24  ;;  %v2509_v24 = vld [vmem:[#allocation2 + $0xe1] sm:$0xff] }
 0x213   : > { %v1559_v38 = vadd.f32 %v1515_v18, %v1261_v40  ;;  %v2533_v18 = vpack.c.bf16 %v2509_v24, %v2508_v41  ;;  %v2511_v24 = vld [vmem:[#allocation2 + $0xf9] sm:$0xff] }
 0x214   : > { %v1820_v14 = vpop.f32.mrf.mxu0 }
 0x215   : > { %v1857_v3 = vadd.f32 %v1813_v47, %v1559_v38  ;;  %v8246_v39 = vpop.f32.mrf.mxu1 }
 0x217   : > { %v8237_v55 = vadd.f32 %v2111_v13, %v1857_v3  ;;  %v1527_v9 = vpop.f32.mrf.mxu3  ;;  %v7167_v13 = vld [vmem:[%s9355_s3] sm:$0xff] }
 0x218   : > { %v1219_v48 = vpop.f32.mrf.mxu2  ;;  %3405 = vmatpush.bf16.msra.mxu1 %v7167_v13 }
 0x219   : > { %v1262_v25 = vadd.f32 %v1219_v48, %v7965_v36  ;;  %v2209_v48 = vld [vmem:[#allocation2 + $0xc8] sm:$0xff] }
 0x21b   : > { %v1560_v27 = vadd.f32 %v1517_v61, %v1262_v25 }
 0x21c   : > { %v1823_v19 = vpop.f32.mrf.mxu0  ;;  %2682 = vmatmul.bf16.gmra.mxu3 %v2533_v18 }
 0x21d   : > { %2374 = vmatmul.bf16.gmra.mxu2 %v2233_v33  ;;  %v8240_v47 = vadd.f32 %v1815_v4, %v1560_v27  ;;  %v2234_v33 = vpack.c.bf16 %v2209_v48, %v2208_v32  ;;  %v2510_v27 = vld [vmem:[#allocation2 + $0xf1] sm:$0xff]  ;;  %v2121_v13 = vpop.f32.mrf.mxu1  ;;  %v2211_v48 = vld [vmem:[#allocation2 + $0xe0] sm:$0xff] }
 0x21e   : > { %v2210_v32 = vld [vmem:[#allocation2 + $0xd8] sm:$0xff] }
 0x21f   : > { %2975 = vmatmul.bf16.gmra.mxu0 %v2830_v54  ;;  %v1530_v38 = vpop.f32.mrf.mxu3 }
 0x220   : > { %v1222_v40 = vpop.f32.mrf.mxu2 }
 0x221   : > { %v1263_v36 = vadd.f32 %v1222_v40, %v7971_v57  ;;  %v2534_v57 = vpack.c.bf16 %v2511_v24, %v2510_v27  ;;  %v2513_v24 = vld [vmem:[#allocation2 + $0x111] sm:$0xff] }
 0x223   : > { %v1561_v61 = vadd.f32 %v1520_v12, %v1263_v36 }
 0x224   : > { %v1825_v3 = vpop.f32.mrf.mxu0 }
 0x225   : > { %v1859_v21 = vadd.f32 %v1818_v52, %v1561_v61  ;;  %v8261_v27 = vpop.f32.mrf.mxu1 }
 0x227   : > { %v8248_v4 = vadd.f32 %v2116_v35, %v1859_v21  ;;  %v1532_v41 = vpop.f32.mrf.mxu3 }
 0x228   : > { %v1224_v29 = vpop.f32.mrf.mxu2 }
 0x229   : > { %v1264_v25 = vadd.f32 %v1224_v29, %v7977_v5  ;;  %v7535_v5 = vld [vmem:[#allocation2] sm:$0xff] }
 0x22a   : > { %v8255_v61 = vpack.c.bf16 %v7535_v5, %v7535_v5  ;;  %v7198_v5 = vld [vmem:[%s9355_s3 + $0xf8] sm:$0xff] }
 0x22b   : > { %v1562_v54 = vadd.f32 %v1522_v43, %v1264_v25  ;;  %v2235_v25 = vpack.c.bf16 %v2211_v48, %v2210_v32  ;;  %4292 = vmatpush.bf16.msrb.mxu0 %v7198_v5  ;;  %v8293_v5 = vld [vmem:[%s9354_s2] ss:$0 sm:$0xff] }
 0x22c   : > { %v1828_v18 = vpop.f32.mrf.mxu0  ;;  %2687 = vmatmul.bf16.gmra.mxu3 %v2534_v57  ;;  %3406 = vmatmul.bf16.vlgmr.msra.gmra.mxu1 %v8255_v61 }
 0x22d   : > { %2379 = vmatmul.bf16.gmra.mxu2 %v2234_v33  ;;  %v8251_v12 = vadd.f32 %v1820_v14, %v1562_v54  ;;  %v7182_v54 = vld [vmem:[%s9355_s3 + $0x78] sm:$0xff] }
 0x22e   : > { %3696 = vmatpush.bf16.msrb.mxu2 %v7182_v54 }
 0x22f   : > { %2980 = vmatmul.bf16.gmra.mxu0 %v7995_v37  ;;  %v2648_v40 = vpop.f32.mrf.mxu3 }
 0x230   : > { %v1227_v52 = vpop.f32.mrf.mxu2 }
 0x231   : > { %v1265_v35 = vadd.f32 %v1227_v52, %v7988_v53  ;;  %v2512_v53 = vld [vmem:[#allocation2 + $0x109] sm:$0xff] }
 0x232   : > { %v2535_v52 = vpack.c.bf16 %v2513_v24, %v2512_v53 }
 0x233   : > { %v1563_v36 = vadd.f32 %v1525_v42, %v1265_v35 }
 0x234   : > { %v1830_v21 = vpop.f32.mrf.mxu0 }
 0x235   : > { %v1861_v43 = vadd.f32 %v1823_v19, %v1563_v36  ;;  %v7190_v19 = vld [vmem:[%s9355_s3 + $0xb8] sm:$0xff] }
 0x236   : > { %3994 = vmatpush.bf16.msrb.mxu3 %v7190_v19  ;;  %v2515_v19 = vld [vmem:[#allocation2 + $0x129] sm:$0xff] }
 0x237   : > { %v8258_v14 = vadd.f32 %v2121_v13, %v1861_v43  ;;  %v2650_v33 = vpop.f32.mrf.mxu3  ;;  %v7206_v43 = vld [vmem:[%s9355_s3 + $0x138] sm:$0xff] }
 0x238   : > { %v1229_v29 = vpop.f32.mrf.mxu2  ;;  %4590 = vmatpush.bf16.msrb.mxu1 %v7206_v43 }
 0x239   : > { %v1266_v37 = vadd.f32 %v1229_v29, %v7999_v45  ;;  %v2212_v29 = vld [vmem:[#allocation2 + $0xf0] sm:$0xff] }
 0x23b   : > { %v1564_v42 = vadd.f32 %v1527_v9, %v1266_v37 }
 0x23c   : > { %v2946_v57 = vpop.f32.mrf.mxu0  ;;  %2692 = vmatmul.bf16.gmra.mxu3 %v2535_v52 }
 0x23d   : > { %2384 = vmatmul.bf16.gmra.mxu2 %v2235_v25  ;;  %v8269_v13 = vadd.f32 %v1825_v3, %v1564_v42  ;;  %v2126_v3 = vpop.f32.mrf.mxu1  ;;  %v2514_v42 = vld [vmem:[#allocation2 + $0x121] sm:$0xff] }
 0x23e   : > { %v2536_v52 = vpack.c.bf16 %v2515_v19, %v2514_v42  ;;  %v2517_v42 = vld [vmem:[#allocation2 + $0x141] sm:$0xff] }
 0x23f   : > { %2985 = vmatmul.bf16.gmra.mxu0 %v8012_v15  ;;  %v2653_v35 = vpop.f32.mrf.mxu3  ;;  %v2213_v15 = vld [vmem:[#allocation2 + $0xf8] sm:$0xff] }
 0x240   : > { %v1232_v45 = vpop.f32.mrf.mxu2  ;;  %v2236_v25 = vpack.c.bf16 %v2213_v15, %v2212_v29 }
 0x241   : > { %v1267_v9 = vadd.f32 %v1232_v45, %v8008_v17 }
 0x243   : > { %v1565_v36 = vadd.f32 %v1530_v38, %v1267_v9 }
 0x244   : > { %v2948_v32 = vpop.f32.mrf.mxu0 }
 0x245   : > { %v1863_v48 = vadd.f32 %v1828_v18, %v1565_v36 }
 0x247   : > { %v8279_v37 = vadd.f32 %v2126_v3, %v1863_v48  ;;  %v8282_v53 = vpop.f32.mrf.mxu3  ;;  %v2214_v3 = vld [vmem:[#allocation2 + $0x108] sm:$0xff]  ;;  %v2215_v48 = vld [vmem:[#allocation2 + $0x110] sm:$0xff] }
 0x248   : > { %v1234_v17 = vpop.f32.mrf.mxu2 }
 0x249   : > { %v1268_v38 = vadd.f32 %v1234_v17, %v8016_v28  ;;  %v2237_v17 = vpack.c.bf16 %v2215_v48, %v2214_v3  ;;  %v7205_v3 = vld [vmem:[%s9355_s3 + $0x130] sm:$0xff] }
 0x24a   : > { %4591 = vmatpush.bf16.msrb.mxu1 %v7205_v3 }
 0x24b   : > { %v1566_v54 = vadd.f32 %v1532_v41, %v1268_v38  ;;  %v2516_v38 = vld [vmem:[#allocation2 + $0x139] sm:$0xff] }
 0x24c   : > { %v2951_v24 = vpop.f32.mrf.mxu0  ;;  %2697 = vmatmul.bf16.gmra.mxu3 %v2536_v52  ;;  %v2537_v19 = vpack.c.bf16 %v2517_v42, %v2516_v38 }
 0x24d   : > { %2389 = vmatmul.bf16.gmra.mxu2 %v2236_v25  ;;  %v8284_v45 = vadd.f32 %v1830_v21, %v1566_v54  ;;  %v7181_v25 = vld [vmem:[%s9355_s3 + $0x70] sm:$0xff] }
 0x24e   : > { %3697 = vmatpush.bf16.msrb.mxu2 %v7181_v25 }
 0x24f   : > { %9371 = vst [vmem:[#allocation16_spill] sm:$0xff] %v8284_v45  ;;  %2990 = vmatmul.bf16.gmra.mxu0 %v8040_v60  ;;  %v8288_v36 = vpop.f32.mrf.mxu3 }
 0x250   : > { %v2350_v18 = vpop.f32.mrf.mxu2 }
 0x251   : > { %v2430_v9 = vadd.f32 %v2350_v18, %v8035_v16 }
 0x253   : > { %v2728_v28 = vadd.f32 %v2648_v40, %v2430_v9 }
 0x254   : > { %v2953_v41 = vpop.f32.mrf.mxu0 }
 0x255   : > { %v3026_v43 = vadd.f32 %v2946_v57, %v2728_v28  ;;  %v7189_v57 = vld [vmem:[%s9355_s3 + $0xb0] sm:$0xff] }
 0x256   : > { %3995 = vmatpush.bf16.msrb.mxu3 %v7189_v57 }
 0x257   : > { %v3126_v21 = vadd.f32 %v8293_v5, %v3026_v43  ;;  %v8297_v16 = vpop.f32.mrf.mxu3 }
 0x258   : > { %v2352_v29 = vpop.f32.mrf.mxu2 }
 0x259   : > { %v3158_v15 = vmax.f32 %v3126_v21, 0.0  ;;  %v2431_v60 = vadd.f32 %v2352_v29, %v8052_v8  ;;  %v2216_v29 = vld [vmem:[#allocation2 + $0x120] sm:$0xff] }
 0x25b   : > { %3190 = vst [vmem:[#allocation2 + $0x19] sm:$0xff] %v3158_v15  ;;  %v2729_v40 = vadd.f32 %v2650_v33, %v2431_v60 }
 0x25c   : > { %v2956_v54 = vpop.f32.mrf.mxu0  ;;  %2702 = vmatmul.bf16.gmra.mxu3 %v2537_v19 }
 0x25d   : > { %v3027_v52 = vadd.f32 %v2948_v32, %v2729_v40  ;;  %2394 = vmatmul.bf16.gmra.mxu2 %v2237_v17  ;;  %v7197_v32 = vld [vmem:[%s9355_s3 + $0xf0] sm:$0xff] }
 0x25e   : > { %4293 = vmatpush.bf16.msrb.mxu0 %v7197_v32 }
 0x25f   : > { %v3127_v8 = vadd.f32 %v8293_v5, %v3027_v52  ;;  %2995 = vmatmul.bf16.gmra.mxu0 %v8063_v63  ;;  %v8308_v28 = vpop.f32.mrf.mxu3  ;;  %v2519_v52 = vld [vmem:[#allocation2 + $0x159] sm:$0xff] }
 0x260   : > { %v2355_v33 = vpop.f32.mrf.mxu2 }
 0x261   : > { %v3159_v18 = vmax.f32 %v3127_v8, 0.0  ;;  %v2432_v9 = vadd.f32 %v2355_v33, %v8061_v6  ;;  %v2217_v6 = vld [vmem:[#allocation2 + $0x128] sm:$0xff] }
 0x262   : > { %v2238_v40 = vpack.c.bf16 %v2217_v6, %v2216_v29  ;;  %v3256_v57 = vld [vmem:[#allocation2 + $0x18] sm:$0xff] }
 0x263   : > { %3191 = vst [vmem:[#allocation2 + $0x21] sm:$0xff] %v3159_v18  ;;  %v2730_v43 = vadd.f32 %v2653_v35, %v2432_v9  ;;  %v8316_v48 = vpack.c.bf16 %v3159_v18, %v3158_v15  ;;  %v2218_v6 = vld [vmem:[#allocation2 + $0x138] sm:$0xff] }
 0x264   : > { %v2958_v21 = vpop.f32.mrf.mxu0 }
 0x265   : > { %v3028_v63 = vadd.f32 %v2951_v24, %v2730_v43  ;;  %v2518_v24 = vld [vmem:[#allocation2 + $0x151] sm:$0xff] }
 0x266   : > { %v2538_v33 = vpack.c.bf16 %v2519_v52, %v2518_v24  ;;  %v7188_v24 = vld [vmem:[%s9355_s3 + $0xa8] sm:$0xff] }
 0x267   : > { %v3128_v60 = vadd.f32 %v8293_v5, %v3028_v63  ;;  %v8320_v25 = vpop.f32.mrf.mxu3  ;;  %v2520_v52 = vld [vmem:[#allocation2 + $0x169] sm:$0xff]  ;;  %3996 = vmatpush.bf16.msrb.mxu3 %v7188_v24 }
 0x268   : > { %v2357_v17 = vpop.f32.mrf.mxu2 }
 0x269   : > { %v3160_v35 = vmax.f32 %v3128_v60, 0.0  ;;  %v2433_v38 = vadd.f32 %v2357_v17, %v8077_v11  ;;  %v2219_v60 = vld [vmem:[#allocation2 + $0x140] sm:$0xff] }
 0x26a   : > { %v3257_v42 = vld [vmem:[#allocation2 + $0x20] sm:$0xff] }
 0x26b   : > { %3192 = vst [vmem:[#allocation2 + $0x31] sm:$0xff] %v3160_v35  ;;  %v2731_v15 = vadd.f32 %v8282_v53, %v2433_v38  ;;  %v8323_v19 = vpack.c.bf16 %v3257_v42, %v3256_v57  ;;  %v2239_v57 = vpack.c.bf16 %v2219_v60, %v2218_v6  ;;  %v7204_v6 = vld [vmem:[%s9355_s3 + $0x128] sm:$0xff] }
 0x26c   : > { %v2961_v8 = vpop.f32.mrf.mxu0  ;;  %2707 = vmatmul.bf16.gmra.mxu3 %v2538_v33  ;;  %v2521_v33 = vld [vmem:[#allocation2 + $0x171] sm:$0xff]  ;;  %4592 = vmatpush.bf16.msrb.mxu1 %v7204_v6 }
 0x26d   : > { %v3029_v18 = vadd.f32 %v2953_v41, %v2731_v15  ;;  %2399 = vmatmul.bf16.gmra.mxu2 %v2238_v40  ;;  %3411 = vmatmul.bf16.gmra.mxu1 %v8323_v19 }
 0x26f   : > { %v3129_v11 = vadd.f32 %v8293_v5, %v3029_v18  ;;  %3000 = vmatmul.bf16.gmra.mxu0 %v8094_v23  ;;  %v8329_v53 = vpop.f32.mrf.mxu3 }
 0x270   : > { %v2360_v9 = vpop.f32.mrf.mxu2 }
 0x271   : > { %v3161_v43 = vmax.f32 %v3129_v11, 0.0  ;;  %v2434_v32 = vadd.f32 %v2360_v9, %v8089_v51  ;;  %v2539_v11 = vpack.c.bf16 %v2521_v33, %v2520_v52  ;;  %v2523_v33 = vld [vmem:[#allocation2 + $0x189] sm:$0xff] }
 0x272   : > { %v3258_v51 = vld [vmem:[#allocation2 + $0x30] sm:$0xff] }
 0x273   : > { %3193 = vst [vmem:[#allocation2 + $0x39] sm:$0xff] %v3161_v43  ;;  %v2732_v3 = vadd.f32 %v8288_v36, %v2434_v32  ;;  %v8332_v63 = vpack.c.bf16 %v3161_v43, %v3160_v35 }
 0x274   : > { %v2963_v41 = vpop.f32.mrf.mxu0 }
 0x275   : > { %v3030_v29 = vadd.f32 %v2956_v54, %v2732_v3  ;;  %v7180_v54 = vld [vmem:[%s9355_s3 + $0x68] sm:$0xff] }
 0x276   : > { %3698 = vmatpush.bf16.msrb.mxu2 %v7180_v54 }
 0x277   : > { %v3130_v17 = vadd.f32 %v8293_v5, %v3030_v29  ;;  %v8336_v42 = vpop.f32.mrf.mxu3  ;;  %v7196_v29 = vld [vmem:[%s9355_s3 + $0xe8] sm:$0xff] }
 0x278   : > { %v2362_v38 = vpop.f32.mrf.mxu2  ;;  %4294 = vmatpush.bf16.msrb.mxu0 %v7196_v29 }
 0x279   : > { %v3162_v40 = vmax.f32 %v3130_v17, 0.0  ;;  %v2435_v23 = vadd.f32 %v2362_v38, %v8108_v30  ;;  %v2221_v38 = vld [vmem:[#allocation2 + $0x158] sm:$0xff] }
 0x27a   : > { %v3259_v15 = vld [vmem:[#allocation2 + $0x38] sm:$0xff] }
 0x27b   : > { %3194 = vst [vmem:[#allocation2 + $0x49] sm:$0xff] %v3162_v40  ;;  %v2733_v36 = vadd.f32 %v8297_v16, %v2435_v23  ;;  %v8339_v35 = vpack.c.bf16 %v3259_v15, %v3258_v51 }
 0x27c   : > { %v2966_v30 = vpop.f32.mrf.mxu0  ;;  %2712 = vmatmul.bf16.gmra.mxu3 %v2539_v11 }
 0x27d   : > { %v3031_v18 = vadd.f32 %v2958_v21, %v2733_v36  ;;  %2404 = vmatmul.bf16.gmra.mxu2 %v2239_v57  ;;  %3416 = vmatmul.bf16.gmra.mxu1 %v8339_v35 }
 0x27f   : > { %v3131_v16 = vadd.f32 %v8293_v5, %v3031_v18  ;;  %3005 = vmatmul.bf16.gmra.mxu0 %v8119_v34  ;;  %v8351_v3 = vpop.f32.mrf.mxu3 }
 0x280   : > { %v2365_v9 = vpop.f32.mrf.mxu2 }
 0x281   : > { %v3163_v43 = vmax.f32 %v3131_v16, 0.0  ;;  %v2436_v32 = vadd.f32 %v2365_v9, %v8117_v7  ;;  %v2220_v7 = vld [vmem:[#allocation2 + $0x150] sm:$0xff] }
 0x282   : > { %v2240_v15 = vpack.c.bf16 %v2221_v38, %v2220_v7  ;;  %v3260_v54 = vld [vmem:[#allocation2 + $0x48] sm:$0xff]  ;;  %v2223_v38 = vld [vmem:[#allocation2 + $0x170] sm:$0xff] }
 0x283   : > { %3195 = vst [vmem:[#allocation2 + $0x51] sm:$0xff] %v3163_v43  ;;  %v2734_v21 = vadd.f32 %v8308_v28, %v2436_v32  ;;  %v8360_v60 = vpack.c.bf16 %v3163_v43, %v3162_v40  ;;  %v9372_v32 = vld [vmem:[#allocation6_spill] sm:$0xff]  ;;  %v2222_v7 = vld [vmem:[#allocation2 + $0x168] sm:$0xff] }
 0x284   : > { %v8362_v34 = vpop.f32.mrf.mxu0 }
 0x285   : > { %v3032_v17 = vadd.f32 %v2961_v8, %v2734_v21  ;;  %v2522_v8 = vld [vmem:[#allocation2 + $0x181] sm:$0xff] }
 0x286   : > { %v2540_v11 = vpack.c.bf16 %v2523_v33, %v2522_v8 }
 0x287   : > { %v3132_v23 = vadd.f32 %v8293_v5, %v3032_v17  ;;  %v8366_v36 = vpop.f32.mrf.mxu3 }
 0x288   : > { %v2367_v28 = vpop.f32.mrf.mxu2 }
 0x289   : > { %v3164_v57 = vmax.f32 %v3132_v23, 0.0  ;;  %v2437_v51 = vadd.f32 %v2367_v28, %v8133_v49  ;;  %v9373_v23 = vld [vmem:[#allocation7_spill] sm:$0xff]  ;;  %v9374_v28 = vld [vmem:[#allocation4_spill] sm:$0xff] }
 0x28a   : > { %v3261_v24 = vld [vmem:[#allocation2 + $0x50] sm:$0xff] }
 0x28b   : > { %3196 = vst [vmem:[#allocation2 + $0x61] sm:$0xff] %v3164_v57  ;;  %v2735_v40 = vadd.f32 %v8320_v25, %v2437_v51  ;;  %v8369_v52 = vpack.c.bf16 %v3261_v24, %v3260_v54  ;;  %v7179_v54 = vld [vmem:[%s9355_s3 + $0x60] sm:$0xff] }
 0x28c   : > { %v8371_v18 = vpop.f32.mrf.mxu0  ;;  %2717 = vmatmul.bf16.gmra.mxu3 %v2540_v11  ;;  %3699 = vmatpush.bf16.msrb.mxu2 %v7179_v54  ;;  %v9376_v54 = vld [vmem:[#allocation9_spill] sm:$0xff] }
 0x28d   : > { %v3033_v16 = vadd.f32 %v2963_v41, %v2735_v40  ;;  %2409 = vmatmul.bf16.gmra.mxu2 %v2240_v15  ;;  %3421 = vmatmul.bf16.gmra.mxu1 %v8369_v52  ;;  %v2241_v40 = vpack.c.bf16 %v2223_v38, %v2222_v7  ;;  %v7194_v7 = vld [vmem:[%s9355_s3 + $0xd8] sm:$0xff] }
 0x28f   : > { %v3133_v49 = vadd.f32 %v8293_v5, %v3033_v16  ;;  %3010 = vmatmul.bf16.gmra.mxu0 %v8149_v62  ;;  %v8377_v21 = vpop.f32.mrf.mxu3  ;;  %v2140_v62 = vadd.f32 %v9374_v28, %v9373_v23  ;;  %v2524_v16 = vld [vmem:[#allocation2 + $0x199] sm:$0xff] }
 0x290   : > { %v2370_v9 = vpop.f32.mrf.mxu2  ;;  %v9375_v23 = vld [vmem:[#allocation10_spill] sm:$0xff] }
 0x291   : > { %v3165_v43 = vmax.f32 %v3133_v49, 0.0  ;;  %v2438_v25 = vadd.f32 %v2370_v9, %v9372_v32  ;;  %v2525_v49 = vld [vmem:[#allocation2 + $0x1a1] sm:$0xff] }
 0x292   : > { %v3262_v8 = vld [vmem:[#allocation2 + $0x60] sm:$0xff]  ;;  %v2541_v32 = vpack.c.bf16 %v2525_v49, %v2524_v16  ;;  %v7176_v16 = vld [vmem:[%s9355_s3 + $0x48] sm:$0xff] }
 0x293   : > { %3197 = vst [vmem:[#allocation2 + $0x69] sm:$0xff] %v3165_v43  ;;  %v2736_v29 = vadd.f32 %v8329_v53, %v2438_v25  ;;  %v8380_v6 = vpack.c.bf16 %v3165_v43, %v3164_v57  ;;  %v7187_v53 = vld [vmem:[%s9355_s3 + $0xa0] sm:$0xff]  ;;  %v7184_v49 = vld [vmem:[%s9355_s3 + $0x88] sm:$0xff] }
 0x294   : > { %v8382_v41 = vpop.f32.mrf.mxu0  ;;  %3997 = vmatpush.bf16.msrb.mxu3 %v7187_v53 }
 0x295   : > { %v3034_v17 = vadd.f32 %v2966_v30, %v2736_v29  ;;  %v7195_v30 = vld [vmem:[%s9355_s3 + $0xe0] sm:$0xff]  ;;  %v7178_v29 = vld [vmem:[%s9355_s3 + $0x58] sm:$0xff] }
 0x296   : > { %4295 = vmatpush.bf16.msrb.mxu0 %v7195_v30  ;;  %3700 = vmatpush.bf16.msrb.mxu2 %v7178_v29  ;;  %v9377_v29 = vld [vmem:[#allocation11_spill] sm:$0xff] }
 0x297   : > { %v3134_v51 = vadd.f32 %v8293_v5, %v3034_v17  ;;  %v8396_v33 = vpop.f32.mrf.mxu3  ;;  %v7186_v17 = vld [vmem:[%s9355_s3 + $0x98] sm:$0xff] }
 0x298   : > { %v2372_v15 = vpop.f32.mrf.mxu2  ;;  %3998 = vmatpush.bf16.msrb.mxu3 %v7186_v17  ;;  %v9378_v17 = vld [vmem:[#allocation5_spill] sm:$0xff] }
 0x299   : > { %v3166_v57 = vmax.f32 %v3134_v51, 0.0  ;;  %v2439_v24 = vadd.f32 %v2372_v15, %v2140_v62  ;;  %v7177_v62 = vld [vmem:[%s9355_s3 + $0x50] sm:$0xff] }
 0x29a   : > { %v3263_v11 = vld [vmem:[#allocation2 + $0x68] sm:$0xff]  ;;  %4296 = vmatpush.bf16.msrb.mxu0 %v7194_v7  ;;  %v7193_v51 = vld [vmem:[%s9355_s3 + $0xd0] sm:$0xff]  ;;  %3701 = vmatpush.bf16.msrb.mxu2 %v7177_v62  ;;  %v2142_v7 = vadd.f32 %v9378_v17, %v9377_v29  ;;  %v7175_v62 = vld [vmem:[%s9355_s3 + $0x40] sm:$0xff] }
 0x29b   : > { %3198 = vst [vmem:[#allocation2 + $0x79] sm:$0xff] %v3166_v57  ;;  %v2737_v9 = vadd.f32 %v8336_v42, %v2439_v24  ;;  %v8399_v43 = vpack.c.bf16 %v3263_v11, %v3262_v8  ;;  %v3850_v29 = vld [vmem:[#allocation2 + $0xa] sm:$0xff] }
 0x29c   : > { %v8401_v25 = vpop.f32.mrf.mxu0  ;;  %2722 = vmatmul.bf16.gmra.mxu3 %v2541_v32  ;;  %v2225_v32 = vld [vmem:[#allocation2 + $0x188] sm:$0xff] }
 0x29d   : > { %v3035_v42 = vadd.f32 %v8362_v34, %v2737_v9  ;;  %2414 = vmatmul.bf16.gmra.mxu2 %v2241_v40  ;;  %3426 = vmatmul.bf16.gmra.mxu1 %v8399_v43  ;;  %v7185_v34 = vld [vmem:[%s9355_s3 + $0x90] sm:$0xff]  ;;  %v7203_v40 = vld [vmem:[%s9355_s3 + $0x120] sm:$0xff] }
 0x29e   : > { %3999 = vmatpush.bf16.msrb.mxu3 %v7185_v34  ;;  %4297 = vmatpush.bf16.msrb.mxu0 %v7193_v51  ;;  %v7191_v34 = vld [vmem:[%s9355_s3 + $0xc0] sm:$0xff] }
 0x29f   : > { %v3135_v38 = vadd.f32 %v8293_v5, %v3035_v42  ;;  %3015 = vmatmul.bf16.gmra.mxu0 %v9375_v23  ;;  %v8426_v30 = vpop.f32.mrf.mxu3  ;;  %4593 = vmatpush.bf16.msrb.mxu1 %v7203_v40  ;;  %v2823_v23 = vld [vmem:[#allocation2 + $0x1a2] sm:$0xff] }
 0x2a0   : > { %v2375_v28 = vpop.f32.mrf.mxu2  ;;  %3702 = vmatpush.bf16.msrb.mxu2 %v7176_v16 }
 0x2a1   : > { %v3167_v15 = vmax.f32 %v3135_v38, 0.0  ;;  %v2440_v53 = vadd.f32 %v2375_v28, %v9376_v54  ;;  %v2822_v38 = vld [vmem:[#allocation2 + $0x19a] sm:$0xff] }
 0x2a2   : > { %4000 = vmatpush.bf16.msrb.mxu3 %v7184_v49 }
 0x2a3   : > { %3199 = vst [vmem:[#allocation2 + $0x81] sm:$0xff] %v3167_v15  ;;  %v2738_v24 = vadd.f32 %v8351_v3, %v2440_v53  ;;  %v8432_v8 = vpack.c.bf16 %v3167_v15, %v3166_v57  ;;  %v7192_v3 = vld [vmem:[%s9355_s3 + $0xc8] sm:$0xff]  ;;  %v2224_v57 = vld [vmem:[#allocation2 + $0x180] sm:$0xff] }
 0x2a4   : > { %v8434_v11 = vpop.f32.mrf.mxu0  ;;  %4298 = vmatpush.bf16.msrb.mxu0 %v7192_v3  ;;  %v2242_v54 = vpack.c.bf16 %v2225_v32, %v2224_v57  ;;  %3703 = vmatpush.bf16.msrb.mxu2 %v7175_v62  ;;  %v2839_v3 = vpack.c.bf16 %v2823_v23, %v2822_v38 }
 0x2a5   : > { %v3036_v9 = vadd.f32 %v8371_v18, %v2738_v24  ;;  %v7183_v18 = vld [vmem:[%s9355_s3 + $0x80] sm:$0xff]  ;;  %v3264_v24 = vld [vmem:[#allocation2 + $0x78] sm:$0xff] }
 0x2a6   : > { %4001 = vmatpush.bf16.msrb.mxu3 %v7183_v18  ;;  %v9379_v18 = vld [vmem:[#allocation8_spill] sm:$0xff] }
 0x2a7   : > { %v3136_v42 = vadd.f32 %v8293_v5, %v3036_v9  ;;  %v8458_v53 = vpop.f32.mrf.mxu3  ;;  %v3849_v9 = vld [vmem:[#allocation2 + $0x2] sm:$0xff] }
 0x2a8   : > { %v2377_v28 = vpop.f32.mrf.mxu2  ;;  %4299 = vmatpush.bf16.msrb.mxu0 %v7191_v34  ;;  %v3881_v45 = vpack.c.bf16 %v3850_v29, %v3849_v9  ;;  %v2144_v34 = vadd.f32 %v9379_v18, %v8184_v44  ;;  %v3852_v9 = vld [vmem:[#allocation2 + $0x22] sm:$0xff] }
 0x2a9   : > { %v3168_v51 = vmax.f32 %v3136_v42, 0.0  ;;  %v2441_v15 = vadd.f32 %v2377_v28, %v2142_v7 }
 0x2aa   : > { %v3265_v40 = vld [vmem:[#allocation2 + $0x80] sm:$0xff] }
 0x2ab   : > { %3200 = vst [vmem:[#allocation2 + $0x91] sm:$0xff] %v3168_v51  ;;  %v2739_v16 = vadd.f32 %v8366_v36, %v2441_v15  ;;  %v8461_v49 = vpack.c.bf16 %v3265_v40, %v3264_v24 }
 0x2ac   : > { %v2981_v17 = vpop.f32.mrf.mxu0  ;;  %4002 = vmatmul.bf16.vlgmr.msrb.gmra.mxu3 %v3881_v45 }
 0x2ad   : > { %v3037_v7 = vadd.f32 %v8382_v41, %v2739_v16  ;;  %2419 = vmatmul.bf16.gmra.mxu2 %v2242_v54  ;;  %3431 = vmatmul.bf16.gmra.mxu1 %v8461_v49 }
 0x2af   : > { %v3137_v57 = vadd.f32 %v8293_v5, %v3037_v7  ;;  %3020 = vmatmul.bf16.gmra.mxu0 %v2839_v3  ;;  %v8467_v28 = vpop.f32.mrf.mxu3 }
 0x2b0   : > { %v2380_v32 = vpop.f32.mrf.mxu2 }
 0x2b1   : > { %v3169_v42 = vmax.f32 %v3137_v57, 0.0  ;;  %v2442_v36 = vadd.f32 %v2380_v32, %v8180_v1  ;;  %v3851_v1 = vld [vmem:[#allocation2 + $0x1a] sm:$0xff] }
 0x2b2   : > { %v3266_v16 = vld [vmem:[#allocation2 + $0x90] sm:$0xff]  ;;  %v3882_v44 = vpack.c.bf16 %v3852_v9, %v3851_v1 }
 0x2b3   : > { %3201 = vst [vmem:[#allocation2 + $0x99] sm:$0xff] %v3169_v42  ;;  %v2740_v38 = vadd.f32 %v8377_v21, %v2442_v36  ;;  %v8470_v23 = vpack.c.bf16 %v3169_v42, %v3168_v51  ;;  %v9380_v42 = vld [vmem:[#allocation14_spill] sm:$0xff]  ;;  %v3853_v9 = vld [vmem:[#allocation2 + $0x32] sm:$0xff] }
 0x2b4   : > { %v2983_v62 = vpop.f32.mrf.mxu0 }
 0x2b5   : > { %v3038_v41 = vadd.f32 %v8401_v25, %v2740_v38 }
 0x2b7   : > { %v3138_v15 = vadd.f32 %v8293_v5, %v3038_v41  ;;  %v8476_v40 = vpop.f32.mrf.mxu3 }
 0x2b8   : > { %v2382_v45 = vpop.f32.mrf.mxu2 }
 0x2b9   : > { %v3170_v54 = vmax.f32 %v3138_v15, 0.0  ;;  %v2443_v24 = vadd.f32 %v2382_v45, %v2144_v34  ;;  %v3552_v34 = vld [vmem:[#allocation2 + $0x9] sm:$0xff] }
 0x2ba   : > { %v3267_v3 = vld [vmem:[#allocation2 + $0x98] sm:$0xff]  ;;  %v9381_v15 = vld [vmem:[#allocation12_spill] sm:$0xff] }
 0x2bb   : > { %3202 = vst [vmem:[#allocation2 + $0xa9] sm:$0xff] %v3170_v54  ;;  %v2741_v21 = vadd.f32 %v8396_v33, %v2443_v24  ;;  %v8479_v51 = vpack.c.bf16 %v3267_v3, %v3266_v16  ;;  %v2146_v45 = vadd.f32 %v9381_v15, %v8195_v46 }
 0x2bc   : > { %v2986_v25 = vpop.f32.mrf.mxu0  ;;  %4007 = vmatmul.bf16.gmra.mxu3 %v3882_v44 }
 0x2bd   : > { %v3039_v29 = vadd.f32 %v8434_v11, %v2741_v21  ;;  %2424 = vmatmul.bf16.gmra.mxu2 %v8255_v61  ;;  %3436 = vmatmul.bf16.gmra.mxu1 %v8479_v51  ;;  %v7202_v61 = vld [vmem:[%s9355_s3 + $0x118] sm:$0xff] }
 0x2be   : > { %4594 = vmatpush.bf16.msrb.mxu1 %v7202_v61 }
 0x2bf   : > { %v3139_v7 = vadd.f32 %v8293_v5, %v3039_v29  ;;  %4300 = vmatmul.bf16.vlgmr.msrb.gmra.mxu0 %v8323_v19  ;;  %v8487_v33 = vpop.f32.mrf.mxu3  ;;  %v3551_v19 = vld [vmem:[#allocation2 + $0x1] sm:$0xff] }
 0x2c0   : > { %v2385_v57 = vpop.f32.mrf.mxu2 }
 0x2c1   : > { %v3171_v32 = vmax.f32 %v3139_v7, 0.0  ;;  %v2444_v36 = vadd.f32 %v2385_v57, %v9380_v42 }
 0x2c2   : > { %v3268_v21 = vld [vmem:[#allocation2 + $0xa8] sm:$0xff] }
 0x2c3   : > { %3203 = vst [vmem:[#allocation2 + $0xb1] sm:$0xff] %v3171_v32  ;;  %v2742_v38 = vadd.f32 %v8426_v30, %v2444_v36  ;;  %v8493_v11 = vpack.c.bf16 %v3171_v32, %v3170_v54  ;;  %v3583_v30 = vpack.c.bf16 %v3552_v34, %v3551_v19  ;;  %v3854_v54 = vld [vmem:[#allocation2 + $0x3a] sm:$0xff]  ;;  %v8506_v36 = vpop.f32.mrf.mxu1 }
 0x2c4   : > { %v2988_v41 = vpop.f32.mrf.mxu0  ;;  %v3883_v46 = vpack.c.bf16 %v3854_v54, %v3853_v9 }
 0x2c5   : > { %v3040_v18 = vadd.f32 %v2981_v17, %v2742_v38 }
 0x2c7   : > { %v3140_v24 = vadd.f32 %v8293_v5, %v3040_v18  ;;  %v8498_v44 = vpop.f32.mrf.mxu3 }
 0x2c8   : > { %v2387_v1 = vpop.f32.mrf.mxu2 }
 0x2c9   : > { %v3172_v16 = vmax.f32 %v3140_v24, 0.0  ;;  %v2445_v3 = vadd.f32 %v2387_v1, %v2146_v45  ;;  %v9382_v45 = vld [vmem:[#allocation13_spill] sm:$0xff] }
 0x2ca   : > { %v3269_v29 = vld [vmem:[#allocation2 + $0xb0] sm:$0xff]  ;;  %v2148_v24 = vadd.f32 %v9382_v45, %v8203_v22  ;;  %v2150_v45 = vadd.f32 %v8198_v26, %v8214_v58 }
 0x2cb   : > { %3204 = vst [vmem:[#allocation2 + $0xc1] sm:$0xff] %v3172_v16  ;;  %v2743_v17 = vadd.f32 %v8458_v53, %v2445_v3  ;;  %v8501_v7 = vpack.c.bf16 %v3269_v29, %v3268_v21  ;;  %v8517_v1 = vpop.f32.mrf.mxu1 }
 0x2cc   : > { %v2991_v57 = vpop.f32.mrf.mxu0  ;;  %4012 = vmatmul.bf16.gmra.mxu3 %v3883_v46 }
 0x2cd   : > { %v3041_v32 = vadd.f32 %v2983_v62, %v2743_v17  ;;  %3441 = vmatmul.bf16.gmra.mxu1 %v8501_v7  ;;  %3704 = vmatmul.bf16.vlgmr.msrb.gmra.mxu2 %v3583_v30 }
 0x2cf   : > { %v3141_v42 = vadd.f32 %v8293_v5, %v3041_v32  ;;  %4305 = vmatmul.bf16.gmra.mxu0 %v8339_v35  ;;  %v8509_v53 = vpop.f32.mrf.mxu3 }
 0x2d0   : > { %v2390_v38 = vpop.f32.mrf.mxu2 }
 0x2d1   : > { %v3173_v61 = vmax.f32 %v3141_v42, 0.0  ;;  %v2446_v18 = vadd.f32 %v2390_v38, %v8200_v50  ;;  %v3855_v50 = vld [vmem:[#allocation2 + $0x4a] sm:$0xff] }
 0x2d2   : > { %v3270_v21 = vld [vmem:[#allocation2 + $0xc0] sm:$0xff] }
 0x2d3   : > { %3205 = vst [vmem:[#allocation2 + $0xc9] sm:$0xff] %v3173_v61  ;;  %v2744_v62 = vadd.f32 %v8467_v28, %v2446_v18  ;;  %v8512_v19 = vpack.c.bf16 %v3173_v61, %v3172_v16  ;;  %v3856_v28 = vld [vmem:[#allocation2 + $0x52] sm:$0xff]  ;;  %v8529_v18 = vpop.f32.mrf.mxu1 }
 0x2d4   : > { %v2993_v34 = vpop.f32.mrf.mxu0  ;;  %v3884_v32 = vpack.c.bf16 %v3856_v28, %v3855_v50 }
 0x2d5   : > { %v3042_v15 = vadd.f32 %v2986_v25, %v2744_v62 }
 0x2d7   : > { %v3142_v35 = vadd.f32 %v8293_v5, %v3042_v15  ;;  %v8519_v54 = vpop.f32.mrf.mxu3 }
 0x2d8   : > { %v2392_v3 = vpop.f32.mrf.mxu2 }
 0x2d9   : > { %v3174_v30 = vmax.f32 %v3142_v35, 0.0  ;;  %v2447_v9 = vadd.f32 %v2392_v3, %v2148_v24 }
 0x2da   : > { %v3271_v29 = vld [vmem:[#allocation2 + $0xc8] sm:$0xff] }
 0x2db   : > { %3206 = vst [vmem:[#allocation2 + $0xd9] sm:$0xff] %v3174_v30  ;;  %v2745_v16 = vadd.f32 %v8476_v40, %v2447_v9  ;;  %v8522_v25 = vpack.c.bf16 %v3271_v29, %v3270_v21  ;;  %v3857_v9 = vld [vmem:[#allocation2 + $0x62] sm:$0xff] }
 0x2dc   : > { %v2996_v17 = vpop.f32.mrf.mxu0  ;;  %4017 = vmatmul.bf16.gmra.mxu3 %v3884_v32 }
 0x2dd   : > { %v3043_v22 = vadd.f32 %v2988_v41, %v2745_v16  ;;  %3446 = vmatmul.bf16.gmra.mxu1 %v8522_v25  ;;  %3709 = vmatmul.bf16.gmra.mxu2 %v8316_v48  ;;  %v7201_v48 = vld [vmem:[%s9355_s3 + $0x110] sm:$0xff] }
 0x2de   : > { %4595 = vmatpush.bf16.msrb.mxu1 %v7201_v48  ;;  %v9383_v48 = vld [vmem:[#allocation15_spill] sm:$0xff] }
 0x2df   : > { %v3143_v46 = vadd.f32 %v8293_v5, %v3043_v22  ;;  %4310 = vmatmul.bf16.gmra.mxu0 %v8369_v52  ;;  %v8531_v40 = vpop.f32.mrf.mxu3 }
 0x2e0   : > { %v2395_v42 = vpop.f32.mrf.mxu2 }
 0x2e1   : > { %v3175_v38 = vmax.f32 %v3143_v46, 0.0  ;;  %v2448_v61 = vadd.f32 %v2395_v42, %v8209_v56 }
 0x2e3   : > { %3207 = vst [vmem:[#allocation2 + $0xe1] sm:$0xff] %v3175_v38  ;;  %v2746_v41 = vadd.f32 %v8487_v33, %v2448_v61  ;;  %v8537_v62 = vpack.c.bf16 %v3175_v38, %v3174_v30  ;;  %v3272_v33 = vld [vmem:[#allocation2 + $0xd8] sm:$0xff]  ;;  %v3858_v30 = vld [vmem:[#allocation2 + $0x6a] sm:$0xff] }
 0x2e4   : > { %v2998_v15 = vpop.f32.mrf.mxu0  ;;  %v3885_v58 = vpack.c.bf16 %v3858_v30, %v3857_v9 }
 0x2e5   : > { %v3044_v52 = vadd.f32 %v2991_v57, %v2746_v41 }
 0x2e7   : > { %v3144_v56 = vadd.f32 %v8293_v5, %v3044_v52  ;;  %v8544_v29 = vpop.f32.mrf.mxu3  ;;  %v2152_v52 = vadd.f32 %v9383_v48, %v8220_v10 }
 0x2e8   : > { %v2397_v24 = vpop.f32.mrf.mxu2 }
 0x2e9   : > { %v3176_v35 = vmax.f32 %v3144_v56, 0.0  ;;  %v2449_v3 = vadd.f32 %v2397_v24, %v2150_v45 }
 0x2ea   : > { %v8542_v50 = vpop.f32.mrf.mxu1  ;;  %v3273_v21 = vld [vmem:[#allocation2 + $0xe0] sm:$0xff] }
 0x2eb   : > { %3208 = vst [vmem:[#allocation2 + $0xf1] sm:$0xff] %v3176_v35  ;;  %v2747_v57 = vadd.f32 %v8498_v44, %v2449_v3  ;;  %v8547_v28 = vpack.c.bf16 %v3273_v21, %v3272_v33 }
 0x2ec   : > { %v3001_v16 = vpop.f32.mrf.mxu0  ;;  %4022 = vmatmul.bf16.gmra.mxu3 %v3885_v58 }
 0x2ed   : > { %v3045_v26 = vadd.f32 %v2993_v34, %v2747_v57  ;;  %3451 = vmatmul.bf16.gmra.mxu1 %v8547_v28  ;;  %3714 = vmatmul.bf16.gmra.mxu2 %v8332_v63 }
 0x2ef   : > { %v3145_v22 = vadd.f32 %v8293_v5, %v3045_v26  ;;  %4315 = vmatmul.bf16.gmra.mxu0 %v8399_v43  ;;  %v8557_v34 = vpop.f32.mrf.mxu3 }
 0x2f0   : > { %v2400_v32 = vpop.f32.mrf.mxu2 }
 0x2f1   : > { %v3177_v46 = vmax.f32 %v3145_v22, 0.0  ;;  %v2450_v42 = vadd.f32 %v2400_v32, %v8217_v20  ;;  %v3859_v20 = vld [vmem:[#allocation2 + $0x7a] sm:$0xff] }
 0x2f2   : > { %v8554_v38 = vpop.f32.mrf.mxu1  ;;  %v3274_v9 = vld [vmem:[#allocation2 + $0xf0] sm:$0xff] }
 0x2f3   : > { %3209 = vst [vmem:[#allocation2 + $0xf9] sm:$0xff] %v3177_v46  ;;  %v2748_v44 = vadd.f32 %v8509_v53, %v2450_v42  ;;  %v8559_v61 = vpack.c.bf16 %v3177_v46, %v3176_v35  ;;  %v3860_v53 = vld [vmem:[#allocation2 + $0x82] sm:$0xff] }
 0x2f4   : > { %v3003_v63 = vpop.f32.mrf.mxu0  ;;  %v3886_v57 = vpack.c.bf16 %v3860_v53, %v3859_v20 }
 0x2f5   : > { %v3046_v41 = vadd.f32 %v2996_v17, %v2748_v44 }
 0x2f7   : > { %v3146_v43 = vadd.f32 %v8293_v5, %v3046_v41  ;;  %v8569_v17 = vpop.f32.mrf.mxu3  ;;  %v2154_v41 = vadd.f32 %v8222_v0, %v8231_v2 }
 0x2f8   : > { %v2402_v45 = vpop.f32.mrf.mxu2 }
 0x2f9   : > { %v3178_v56 = vmax.f32 %v3146_v43, 0.0  ;;  %v2451_v24 = vadd.f32 %v2402_v45, %v2152_v52 }
 0x2fa   : > { %v8564_v3 = vpop.f32.mrf.mxu1  ;;  %v3275_v33 = vld [vmem:[#allocation2 + $0xf8] sm:$0xff] }
 0x2fb   : > { %3210 = vst [vmem:[#allocation2 + $0x109] sm:$0xff] %v3178_v56  ;;  %v2749_v35 = vadd.f32 %v8519_v54, %v2451_v24  ;;  %v8567_v21 = vpack.c.bf16 %v3275_v33, %v3274_v9  ;;  %v3862_v9 = vld [vmem:[#allocation2 + $0x9a] sm:$0xff] }
 0x2fc   : > { %v3006_v30 = vpop.f32.mrf.mxu0  ;;  %4027 = vmatmul.bf16.gmra.mxu3 %v3886_v57 }
 0x2fd   : > { %v3047_v10 = vadd.f32 %v2998_v15, %v2749_v35  ;;  %3456 = vmatmul.bf16.gmra.mxu1 %v8567_v21  ;;  %3719 = vmatmul.bf16.gmra.mxu2 %v8360_v60  ;;  %v7200_v15 = vld [vmem:[%s9355_s3 + $0x108] sm:$0xff] }
 0x2fe   : > { %4596 = vmatpush.bf16.msrb.mxu1 %v7200_v15 }
 0x2ff   : > { %v3147_v26 = vadd.f32 %v8293_v5, %v3047_v10  ;;  %4320 = vmatmul.bf16.gmra.mxu0 %v8461_v49  ;;  %v8582_v60 = vpop.f32.mrf.mxu3 }
 0x300   : > { %v2405_v58 = vpop.f32.mrf.mxu2 }
 0x301   : > { %v3179_v22 = vmax.f32 %v3147_v26, 0.0  ;;  %v2452_v54 = vadd.f32 %v2405_v58, %v8228_v31 }
 0x302   : > { %v8576_v32 = vpop.f32.mrf.mxu1  ;;  %v3276_v24 = vld [vmem:[#allocation2 + $0x108] sm:$0xff] }
 0x303   : > { %3211 = vst [vmem:[#allocation2 + $0x111] sm:$0xff] %v3179_v22  ;;  %v2750_v46 = vadd.f32 %v8531_v40, %v2452_v54  ;;  %v8584_v42 = vpack.c.bf16 %v3179_v22, %v3178_v56  ;;  %v3861_v40 = vld [vmem:[#allocation2 + $0x92] sm:$0xff] }
 0x304   : > { %v3008_v44 = vpop.f32.mrf.mxu0  ;;  %v3887_v2 = vpack.c.bf16 %v3862_v9, %v3861_v40 }
 0x305   : > { %v3048_v49 = vadd.f32 %v3001_v16, %v2750_v46  ;;  %v2156_v46 = vadd.f32 %v8235_v59, %v8240_v47 }
 0x307   : > { %v3148_v31 = vadd.f32 %v8293_v5, %v3048_v49  ;;  %v8594_v16 = vpop.f32.mrf.mxu3 }
 0x308   : > { %v2407_v48 = vpop.f32.mrf.mxu2 }
 0x309   : > { %v3180_v52 = vmax.f32 %v3148_v31, 0.0  ;;  %v2453_v43 = vadd.f32 %v2407_v48, %v2154_v41 }
 0x30a   : > { %v8589_v45 = vpop.f32.mrf.mxu1  ;;  %v3277_v20 = vld [vmem:[#allocation2 + $0x110] sm:$0xff] }
 0x30b   : > { %3212 = vst [vmem:[#allocation2 + $0x121] sm:$0xff] %v3180_v52  ;;  %v2751_v56 = vadd.f32 %v8544_v29, %v2453_v43  ;;  %v8592_v33 = vpack.c.bf16 %v3277_v20, %v3276_v24 }
 0x30c   : > { %v3011_v53 = vpop.f32.mrf.mxu0  ;;  %4032 = vmatmul.bf16.gmra.mxu3 %v3887_v2 }
 0x30d   : > { %v3049_v0 = vadd.f32 %v3003_v63, %v2751_v56  ;;  %3461 = vmatmul.bf16.gmra.mxu1 %v8592_v33  ;;  %3724 = vmatmul.bf16.gmra.mxu2 %v8380_v6 }
 0x30f   : > { %v3149_v35 = vadd.f32 %v8293_v5, %v3049_v0  ;;  %4325 = vmatmul.bf16.gmra.mxu0 %v8479_v51  ;;  %v8604_v63 = vpop.f32.mrf.mxu3 }
 0x310   : > { %v2410_v10 = vpop.f32.mrf.mxu2 }
 0x311   : > { %v3181_v57 = vmax.f32 %v3149_v35, 0.0  ;;  %v2454_v29 = vadd.f32 %v2410_v10, %v8237_v55  ;;  %v3863_v55 = vld [vmem:[#allocation2 + $0xaa] sm:$0xff] }
 0x312   : > { %v8601_v26 = vpop.f32.mrf.mxu1  ;;  %v3278_v48 = vld [vmem:[#allocation2 + $0x120] sm:$0xff] }
 0x313   : > { %3213 = vst [vmem:[#allocation2 + $0x129] sm:$0xff] %v3181_v57  ;;  %v2752_v58 = vadd.f32 %v8557_v34, %v2454_v29  ;;  %v8606_v22 = vpack.c.bf16 %v3181_v57, %v3180_v52  ;;  %v3864_v34 = vld [vmem:[#allocation2 + $0xb2] sm:$0xff]  ;;  %v2158_v57 = vadd.f32 %v8246_v39, %v8251_v12 }
 0x314   : > { %v3013_v6 = vpop.f32.mrf.mxu0  ;;  %v3888_v47 = vpack.c.bf16 %v3864_v34, %v3863_v55 }
 0x315   : > { %v3050_v54 = vadd.f32 %v3006_v30, %v2752_v58 }
 0x317   : > { %v3150_v51 = vadd.f32 %v8293_v5, %v3050_v54  ;;  %v8616_v30 = vpop.f32.mrf.mxu3 }
 0x318   : > { %v2412_v15 = vpop.f32.mrf.mxu2 }
 0x319   : > { %v3182_v49 = vmax.f32 %v3150_v51, 0.0  ;;  %v2455_v41 = vadd.f32 %v2412_v15, %v2156_v46 }
 0x31a   : > { %v8611_v31 = vpop.f32.mrf.mxu1  ;;  %v3279_v43 = vld [vmem:[#allocation2 + $0x128] sm:$0xff] }
 0x31b   : > { %3214 = vst [vmem:[#allocation2 + $0x139] sm:$0xff] %v3182_v49  ;;  %v2753_v52 = vadd.f32 %v8569_v17, %v2455_v41  ;;  %v8614_v40 = vpack.c.bf16 %v3279_v43, %v3278_v48  ;;  %v3866_v41 = vld [vmem:[#allocation2 + $0xca] sm:$0xff] }
 0x31c   : > { %v3016_v24 = vpop.f32.mrf.mxu0  ;;  %4037 = vmatmul.bf16.gmra.mxu3 %v3888_v47 }
 0x31d   : > { %v3051_v59 = vadd.f32 %v3008_v44, %v2753_v52  ;;  %3466 = vmatmul.bf16.gmra.mxu1 %v8614_v40  ;;  %3729 = vmatmul.bf16.gmra.mxu2 %v8432_v8  ;;  %v7199_v44 = vld [vmem:[%s9355_s3 + $0x100] sm:$0xff] }
 0x31e   : > { %4597 = vmatpush.bf16.msrb.mxu1 %v7199_v44 }
 0x31f   : > { %v3151_v20 = vadd.f32 %v8293_v5, %v3051_v59  ;;  %4330 = vmatmul.bf16.gmra.mxu0 %v8501_v7  ;;  %v8629_v8 = vpop.f32.mrf.mxu3 }
 0x320   : > { %v2415_v9 = vpop.f32.mrf.mxu2 }
 0x321   : > { %v3183_v56 = vmax.f32 %v3151_v20, 0.0  ;;  %v2456_v17 = vadd.f32 %v2415_v9, %v8248_v4 }
 0x322   : > { %v8623_v0 = vpop.f32.mrf.mxu1  ;;  %v3280_v51 = vld [vmem:[#allocation2 + $0x138] sm:$0xff] }
 0x323   : > { %3215 = vst [vmem:[#allocation2 + $0x141] sm:$0xff] %v3183_v56  ;;  %v2754_v2 = vadd.f32 %v8582_v60, %v2456_v17  ;;  %v8631_v35 = vpack.c.bf16 %v3183_v56, %v3182_v49  ;;  %v3865_v60 = vld [vmem:[#allocation2 + $0xc2] sm:$0xff] }
 0x324   : > { %v3018_v10 = vpop.f32.mrf.mxu0  ;;  %v3889_v12 = vpack.c.bf16 %v3866_v41, %v3865_v60  ;;  %v7238_v41 = vld [vmem:[%s9355_s3 + $0x238] sm:$0xff] }
 0x325   : > { %v3052_v7 = vadd.f32 %v3011_v53, %v2754_v2  ;;  %5782 = vmatpush.bf16.msra.mxu1 %v7238_v41 }
 0x327   : > { %v3152_v4 = vadd.f32 %v8293_v5, %v3052_v7  ;;  %v8641_v53 = vpop.f32.mrf.mxu3  ;;  %v3867_v7 = vld [vmem:[#allocation2 + $0xda] sm:$0xff] }
 0x328   : > { %v2417_v29 = vpop.f32.mrf.mxu2 }
 0x329   : > { %v3184_v58 = vmax.f32 %v3152_v4, 0.0  ;;  %v2457_v54 = vadd.f32 %v2417_v29, %v2158_v57 }
 0x32a   : > { %v8636_v46 = vpop.f32.mrf.mxu1  ;;  %v3281_v15 = vld [vmem:[#allocation2 + $0x140] sm:$0xff] }
 0x32b   : > { %3216 = vst [vmem:[#allocation2 + $0x151] sm:$0xff] %v3184_v58  ;;  %v2755_v49 = vadd.f32 %v8594_v16, %v2457_v54  ;;  %v8639_v55 = vpack.c.bf16 %v3281_v15, %v3280_v51 }
 0x32c   : > { %v3021_v48 = vpop.f32.mrf.mxu0  ;;  %4042 = vmatmul.bf16.gmra.mxu3 %v3889_v12 }
 0x32d   : > { %v3053_v39 = vadd.f32 %v3013_v6, %v2755_v49  ;;  %3471 = vmatmul.bf16.gmra.mxu1 %v8639_v55  ;;  %3734 = vmatmul.bf16.gmra.mxu2 %v8470_v23  ;;  %v7214_v23 = vld [vmem:[%s9355_s3 + $0x178] sm:$0xff] }
 0x32e   : > { %4888 = vmatpush.bf16.msra.mxu2 %v7214_v23 }
 0x32f   : > { %v3153_v43 = vadd.f32 %v8293_v5, %v3053_v39  ;;  %4335 = vmatmul.bf16.gmra.mxu0 %v8522_v25  ;;  %v8651_v6 = vpop.f32.mrf.mxu3  ;;  %v7222_v5 = vld [vmem:[%s9355_s3 + $0x1b8] sm:$0xff] }
 0x330   : > { %v2420_v34 = vpop.f32.mrf.mxu2  ;;  %5186 = vmatpush.bf16.msra.mxu3 %v7222_v5 }
 0x331   : > { %v3185_v52 = vmax.f32 %v3153_v43, 0.0  ;;  %v2458_v16 = vadd.f32 %v2420_v34, %v8258_v14  ;;  %v2160_v14 = vadd.f32 %v8261_v27, %v8269_v13  ;;  %v7230_v13 = vld [vmem:[%s9355_s3 + $0x1f8] sm:$0xff] }
 0x332   : > { %v8648_v59 = vpop.f32.mrf.mxu1  ;;  %v3282_v4 = vld [vmem:[#allocation2 + $0x150] sm:$0xff]  ;;  %5484 = vmatpush.bf16.msra.mxu0 %v7230_v13 }
 0x333   : > { %3217 = vst [vmem:[#allocation2 + $0x159] sm:$0xff] %v3185_v52  ;;  %v2756_v47 = vadd.f32 %v8604_v63, %v2458_v16  ;;  %v8659_v25 = vpack.c.bf16 %v3185_v52, %v3184_v58  ;;  %v7536_v63 = vld [vmem:[%s9354_s2] ss:$0 sm:$0xff]  ;;  %v3868_v58 = vld [vmem:[#allocation2 + $0xe2] sm:$0xff] }
 0x334   : > { %v3023_v20 = vpop.f32.mrf.mxu0  ;;  %v3890_v15 = vpack.c.bf16 %v3868_v58, %v3867_v7  ;;  %v3870_v7 = vld [vmem:[#allocation2 + $0xfa] sm:$0xff] }
 0x335   : > { %v3054_v9 = vadd.f32 %v3016_v24, %v2756_v47  ;;  %v9384_v47 = vld [vmem:[#allocation16_spill] sm:$0xff] }
 0x337   : > { %v3154_v56 = vadd.f32 %v7536_v63, %v3054_v9  ;;  %v8671_v27 = vpop.f32.mrf.mxu3 }
 0x338   : > { %v2422_v17 = vpop.f32.mrf.mxu2 }
 0x339   : > { %v3186_v2 = vmax.f32 %v3154_v56, 0.0  ;;  %v2459_v44 = vadd.f32 %v2422_v17, %v2160_v14  ;;  %v3869_v56 = vld [vmem:[#allocation2 + $0xf2] sm:$0xff] }
 0x33a   : > { %v8666_v57 = vpop.f32.mrf.mxu1  ;;  %v3283_v29 = vld [vmem:[#allocation2 + $0x158] sm:$0xff] }
 0x33b   : > { %3218 = vst [vmem:[#allocation2 + $0x169] sm:$0xff] %v3186_v2  ;;  %v2757_v24 = vadd.f32 %v8616_v30, %v2459_v44  ;;  %v8669_v54 = vpack.c.bf16 %v3283_v29, %v3282_v4 }
 0x33c   : > { %v4301_v60 = vpop.f32.mrf.mxu0  ;;  %4047 = vmatmul.bf16.gmra.mxu3 %v3890_v15 }
 0x33d   : > { %v3055_v51 = vadd.f32 %v3018_v10, %v2757_v24  ;;  %3476 = vmatmul.bf16.gmra.mxu1 %v8669_v54  ;;  %3739 = vmatmul.bf16.gmra.mxu2 %v8493_v11 }
 0x33f   : > { %v3155_v30 = vadd.f32 %v7536_v63, %v3055_v51  ;;  %4340 = vmatmul.bf16.gmra.mxu0 %v8547_v28  ;;  %v8686_v43 = vpop.f32.mrf.mxu3  ;;  %v2162_v28 = vadd.f32 %v8506_v36, %v9384_v47  ;;  %v3891_v36 = vpack.c.bf16 %v3870_v7, %v3869_v56 }
 0x340   : > { %v2425_v49 = vpop.f32.mrf.mxu2 }
 0x341   : > { %v3187_v39 = vmax.f32 %v3155_v30, 0.0  ;;  %v2460_v12 = vadd.f32 %v2425_v49, %v8279_v37  ;;  %v4446_v30 = vld [vmem:[#allocation2 + $0x21] sm:$0xff] }
 0x342   : > { %v8683_v10 = vpop.f32.mrf.mxu1  ;;  %v3284_v17 = vld [vmem:[#allocation2 + $0x168] sm:$0xff] }
 0x343   : > { %3219 = vst [vmem:[#allocation2 + $0x171] sm:$0xff] %v3187_v39  ;;  %v2758_v11 = vadd.f32 %v8629_v8, %v2460_v12  ;;  %v8688_v34 = vpack.c.bf16 %v3187_v39, %v3186_v2  ;;  %v3871_v12 = vld [vmem:[#allocation2 + $0x10a] sm:$0xff] }
 0x344   : > { %v4303_v52 = vpop.f32.mrf.mxu0 }
 0x345   : > { %v3056_v16 = vadd.f32 %v3021_v48, %v2758_v11  ;;  %v3872_v11 = vld [vmem:[#allocation2 + $0x112] sm:$0xff] }
 0x347   : > { %v3156_v23 = vadd.f32 %v7536_v63, %v3056_v16  ;;  %v4010_v4 = vpop.f32.mrf.mxu3 }
 0x348   : > { %v2427_v5 = vpop.f32.mrf.mxu2 }
 0x349   : > { %v3188_v9 = vmax.f32 %v3156_v23, 0.0  ;;  %v2461_v14 = vadd.f32 %v2427_v5, %v2162_v28  ;;  %v7229_v23 = vld [vmem:[%s9355_s3 + $0x1f0] sm:$0xff] }
 0x34a   : > { %v8692_v37 = vpop.f32.mrf.mxu1  ;;  %v3285_v44 = vld [vmem:[#allocation2 + $0x170] sm:$0xff]  ;;  %5485 = vmatpush.bf16.msra.mxu0 %v7229_v23 }
 0x34b   : > { %3220 = vst [vmem:[#allocation2 + $0x181] sm:$0xff] %v3188_v9  ;;  %v2759_v8 = vadd.f32 %v8641_v53, %v2461_v14  ;;  %v8695_v2 = vpack.c.bf16 %v3285_v44, %v3284_v17 }
 0x34c   : > { %v4306_v48 = vpop.f32.mrf.mxu0  ;;  %4052 = vmatmul.bf16.gmra.mxu3 %v3891_v36 }
 0x34d   : > { %v3057_v29 = vadd.f32 %v3023_v20, %v2759_v8  ;;  %3481 = vmatmul.bf16.gmra.mxu1 %v8695_v2  ;;  %3744 = vmatmul.bf16.gmra.mxu2 %v8512_v19  ;;  %v7213_v20 = vld [vmem:[%s9355_s3 + $0x170] sm:$0xff] }
 0x34e   : > { %v7221_v19 = vld [vmem:[%s9355_s3 + $0x1b0] sm:$0xff]  ;;  %4889 = vmatpush.bf16.msra.mxu2 %v7213_v20 }
 0x34f   : > { %v3157_v58 = vadd.f32 %v7536_v63, %v3057_v29  ;;  %4345 = vmatmul.bf16.gmra.mxu0 %v8567_v21  ;;  %v4013_v41 = vpop.f32.mrf.mxu3  ;;  %5187 = vmatpush.bf16.msra.mxu3 %v7221_v19  ;;  %v4448_v29 = vld [vmem:[#allocation2 + $0x39] sm:$0xff] }
 0x350   : > { %v3705_v24 = vpop.f32.mrf.mxu2 }
 0x351   : > { %v3189_v13 = vmax.f32 %v3157_v58, 0.0  ;;  %v3785_v51 = vadd.f32 %v3705_v24, %v8517_v1  ;;  %v3873_v58 = vld [vmem:[#allocation2 + $0x122] sm:$0xff]  ;;  %v3874_v24 = vld [vmem:[#allocation2 + $0x12a] sm:$0xff] }
 0x352   : > { %v8701_v15 = vpop.f32.mrf.mxu1 }
 0x353   : > { %3221 = vst [vmem:[#allocation2 + $0x189] sm:$0xff] %v3189_v13  ;;  %v4083_v53 = vadd.f32 %v8651_v6, %v3785_v51  ;;  %v4445_v6 = vld [vmem:[#allocation2 + $0x19] sm:$0xff] }
 0x354   : > { %v4308_v21 = vpop.f32.mrf.mxu0  ;;  %v4477_v47 = vpack.c.bf16 %v4446_v30, %v4445_v6  ;;  %v7212_v30 = vld [vmem:[%s9355_s3 + $0x168] sm:$0xff]  ;;  %v4450_v6 = vld [vmem:[#allocation2 + $0x51] sm:$0xff] }
 0x355   : > { %v8710_v63 = vadd.f32 %v4301_v60, %v4083_v53  ;;  %v3892_v60 = vpack.c.bf16 %v3872_v11, %v3871_v12  ;;  %4890 = vmatpush.bf16.msra.mxu2 %v7212_v30  ;;  %v3875_v11 = vld [vmem:[#allocation2 + $0x13a] sm:$0xff] }
 0x357   : > { %v4015_v28 = vpop.f32.mrf.mxu3 }
 0x358   : > { %v3707_v1 = vpop.f32.mrf.mxu2 }
 0x359   : > { %v3786_v49 = vadd.f32 %v3707_v1, %v8529_v18  ;;  %v7237_v18 = vld [vmem:[%s9355_s3 + $0x230] sm:$0xff] }
 0x35a   : > { %v8713_v39 = vpop.f32.mrf.mxu1  ;;  %5783 = vmatpush.bf16.msra.mxu1 %v7237_v18  ;;  %v7228_v18 = vld [vmem:[%s9355_s3 + $0x1e8] sm:$0xff] }
 0x35b   : > { %v4084_v16 = vadd.f32 %v8671_v27, %v3786_v49  ;;  %5486 = vmatpush.bf16.msra.mxu0 %v7228_v18  ;;  %v3880_v18 = vld [vmem:[#allocation2 + $0x172] sm:$0xff] }
 0x35c   : > { %v4311_v5 = vpop.f32.mrf.mxu0  ;;  %4057 = vmatmul.bf16.gmra.mxu3 %v3892_v60 }
 0x35d   : > { %3749 = vmatmul.bf16.gmra.mxu2 %v8537_v62  ;;  %4598 = vmatmul.bf16.vlgmr.msrb.gmra.mxu1 %v4477_v47  ;;  %v8723_v9 = vadd.f32 %v4303_v52, %v4084_v16  ;;  %v3876_v16 = vld [vmem:[#allocation2 + $0x142] sm:$0xff] }
 0x35f   : > { %4350 = vmatmul.bf16.gmra.mxu0 %v8592_v33  ;;  %v4018_v17 = vpop.f32.mrf.mxu3  ;;  %v4447_v33 = vld [vmem:[#allocation2 + $0x31] sm:$0xff] }
 0x360   : > { %v3710_v27 = vpop.f32.mrf.mxu2  ;;  %v8735_v51 = vpack.c.bf16 %v4448_v29, %v4447_v33 }
 0x361   : > { %v3787_v14 = vadd.f32 %v3710_v27, %v8542_v50 }
 0x362   : > { %v8727_v56 = vpop.f32.mrf.mxu1 }
 0x363   : > { %v4085_v62 = vadd.f32 %v8686_v43, %v3787_v14  ;;  %v3893_v43 = vpack.c.bf16 %v3874_v24, %v3873_v58  ;;  %v4452_v24 = vld [vmem:[#allocation2 + $0x69] sm:$0xff] }
 0x364   : > { %v4313_v44 = vpop.f32.mrf.mxu0 }
 0x365   : > { %v8730_v7 = vadd.f32 %v4306_v48, %v4085_v62 }
 0x367   : > { %v4020_v50 = vpop.f32.mrf.mxu3 }
 0x368   : > { %v3712_v8 = vpop.f32.mrf.mxu2 }
 0x369   : > { %v3788_v52 = vadd.f32 %v3712_v8, %v8554_v38 }
 0x36a   : > { %v8733_v36 = vpop.f32.mrf.mxu1 }
 0x36b   : > { %v4086_v13 = vadd.f32 %v4010_v4, %v3788_v52 }
 0x36c   : > { %v4316_v53 = vpop.f32.mrf.mxu0  ;;  %4062 = vmatmul.bf16.gmra.mxu3 %v3893_v43  ;;  %v4451_v43 = vld [vmem:[#allocation2 + $0x61] sm:$0xff] }
 0x36d   : > { %3754 = vmatmul.bf16.gmra.mxu2 %v8559_v61  ;;  %4603 = vmatmul.bf16.gmra.mxu1 %v8735_v51  ;;  %v8739_v48 = vadd.f32 %v4308_v21, %v4086_v13  ;;  %v7220_v61 = vld [vmem:[%s9355_s3 + $0x1a8] sm:$0xff] }
 0x36e   : > { %5188 = vmatpush.bf16.msra.mxu3 %v7220_v61 }
 0x36f   : > { %4355 = vmatmul.bf16.gmra.mxu0 %v8614_v40  ;;  %v4023_v1 = vpop.f32.mrf.mxu3 }
 0x370   : > { %v3715_v38 = vpop.f32.mrf.mxu2 }
 0x371   : > { %v3789_v20 = vadd.f32 %v3715_v38, %v8564_v3  ;;  %v3878_v38 = vld [vmem:[#allocation2 + $0x15a] sm:$0xff] }
 0x372   : > { %v8743_v19 = vpop.f32.mrf.mxu1 }
 0x373   : > { %v4087_v4 = vadd.f32 %v4013_v41, %v3789_v20  ;;  %v4449_v41 = vld [vmem:[#allocation2 + $0x49] sm:$0xff] }
 0x374   : > { %v4318_v21 = vpop.f32.mrf.mxu0  ;;  %v8756_v23 = vpack.c.bf16 %v4450_v6, %v4449_v41  ;;  %v4454_v41 = vld [vmem:[#allocation2 + $0x81] sm:$0xff] }
 0x375   : > { %v8751_v40 = vadd.f32 %v4311_v5, %v4087_v4  ;;  %v3894_v5 = vpack.c.bf16 %v3876_v16, %v3875_v11  ;;  %v8777_v4 = vpack.c.bf16 %v4452_v24, %v4451_v43  ;;  %v4453_v16 = vld [vmem:[#allocation2 + $0x79] sm:$0xff] }
 0x377   : > { %v4025_v60 = vpop.f32.mrf.mxu3 }
 0x378   : > { %v3717_v49 = vpop.f32.mrf.mxu2 }
 0x379   : > { %v3790_v3 = vadd.f32 %v3717_v49, %v8576_v32  ;;  %v7236_v32 = vld [vmem:[%s9355_s3 + $0x228] sm:$0xff] }
 0x37a   : > { %v8754_v12 = vpop.f32.mrf.mxu1  ;;  %5784 = vmatpush.bf16.msra.mxu1 %v7236_v32  ;;  %v8804_v32 = vpack.c.bf16 %v4454_v41, %v4453_v16  ;;  %v4178_v16 = vld [vmem:[#allocation2 + $0x188] sm:$0xff] }
 0x37b   : > { %v4088_v47 = vadd.f32 %v4015_v28, %v3790_v3 }
 0x37c   : > { %v4321_v27 = vpop.f32.mrf.mxu0  ;;  %4067 = vmatmul.bf16.gmra.mxu3 %v3894_v5 }
 0x37d   : > { %3759 = vmatmul.bf16.gmra.mxu2 %v8584_v42  ;;  %4608 = vmatmul.bf16.gmra.mxu1 %v8756_v23  ;;  %v8766_v14 = vadd.f32 %v4313_v44, %v4088_v47  ;;  %v3879_v47 = vld [vmem:[#allocation2 + $0x16a] sm:$0xff] }
 0x37f   : > { %4360 = vmatmul.bf16.gmra.mxu0 %v8639_v55  ;;  %v4028_v29 = vpop.f32.mrf.mxu3  ;;  %v3877_v55 = vld [vmem:[#allocation2 + $0x152] sm:$0xff] }
 0x380   : > { %v3720_v28 = vpop.f32.mrf.mxu2 }
 0x381   : > { %v3791_v62 = vadd.f32 %v3720_v28, %v8589_v45 }
 0x382   : > { %v8770_v8 = vpop.f32.mrf.mxu1 }
 0x383   : > { %v4089_v42 = vadd.f32 %v4018_v17, %v3791_v62  ;;  %v3895_v17 = vpack.c.bf16 %v3878_v38, %v3877_v55  ;;  %v7227_v62 = vld [vmem:[%s9355_s3 + $0x1e0] sm:$0xff] }
 0x384   : > { %v4323_v52 = vpop.f32.mrf.mxu0  ;;  %5487 = vmatpush.bf16.msra.mxu0 %v7227_v62 }
 0x385   : > { %v8772_v33 = vadd.f32 %v4316_v53, %v4089_v42  ;;  %v7235_v42 = vld [vmem:[%s9355_s3 + $0x220] sm:$0xff] }
 0x386   : > { %5785 = vmatpush.bf16.msra.mxu1 %v7235_v42  ;;  %v7223_v42 = vld [vmem:[%s9355_s3 + $0x1c0] sm:$0xff] }
 0x387   : > { %v8779_v45 = vpop.f32.mrf.mxu3 }
 0x388   : > { %v3722_v58 = vpop.f32.mrf.mxu2 }
 0x389   : > { %v3792_v44 = vadd.f32 %v3722_v58, %v8601_v26  ;;  %v7218_v58 = vld [vmem:[%s9355_s3 + $0x198] sm:$0xff] }
 0x38a   : > { %v8775_v13 = vpop.f32.mrf.mxu1 }
 0x38b   : > { %v4090_v20 = vadd.f32 %v4020_v50, %v3792_v44 }
 0x38c   : > { %v4326_v30 = vpop.f32.mrf.mxu0  ;;  %4072 = vmatmul.bf16.gmra.mxu3 %v3895_v17  ;;  %v7225_v17 = vld [vmem:[%s9355_s3 + $0x1d0] sm:$0xff] }
 0x38d   : > { %3764 = vmatmul.bf16.gmra.mxu2 %v8606_v22  ;;  %4613 = vmatmul.bf16.gmra.mxu1 %v8777_v4  ;;  %v8783_v53 = vadd.f32 %v4318_v21, %v4090_v20  ;;  %v7211_v22 = vld [vmem:[%s9355_s3 + $0x160] sm:$0xff]  ;;  %v7209_v20 = vld [vmem:[%s9355_s3 + $0x150] sm:$0xff] }
 0x38e   : > { %v7219_v21 = vld [vmem:[%s9355_s3 + $0x1a0] sm:$0xff]  ;;  %4891 = vmatpush.bf16.msra.mxu2 %v7211_v22 }
 0x38f   : > { %4365 = vmatmul.bf16.gmra.mxu0 %v8669_v54  ;;  %v8789_v6 = vpop.f32.mrf.mxu3  ;;  %5189 = vmatpush.bf16.msra.mxu3 %v7219_v21  ;;  %v4456_v21 = vld [vmem:[#allocation2 + $0x99] sm:$0xff] }
 0x390   : > { %v3725_v26 = vpop.f32.mrf.mxu2 }
 0x391   : > { %v3793_v61 = vadd.f32 %v3725_v26, %v8611_v31  ;;  %v7216_v26 = vld [vmem:[%s9355_s3 + $0x188] sm:$0xff] }
 0x392   : > { %v8787_v49 = vpop.f32.mrf.mxu1 }
 0x393   : > { %v4091_v50 = vadd.f32 %v4023_v1, %v3793_v61  ;;  %5190 = vmatpush.bf16.msra.mxu3 %v7218_v58 }
 0x394   : > { %v8797_v3 = vpop.f32.mrf.mxu0 }
 0x395   : > { %v8799_v54 = vadd.f32 %v4321_v27, %v4091_v50  ;;  %v7224_v50 = vld [vmem:[%s9355_s3 + $0x1c8] sm:$0xff] }
 0x397   : > { %v8806_v28 = vpop.f32.mrf.mxu3 }
 0x398   : > { %v3727_v31 = vpop.f32.mrf.mxu2 }
 0x399   : > { %v3794_v1 = vadd.f32 %v3727_v31, %v8623_v0  ;;  %v3896_v0 = vpack.c.bf16 %v3880_v18, %v3879_v47 }
 0x39a   : > { %v8802_v11 = vpop.f32.mrf.mxu1 }
 0x39b   : > { %v4092_v5 = vadd.f32 %v4025_v60, %v3794_v1  ;;  %v7210_v60 = vld [vmem:[%s9355_s3 + $0x158] sm:$0xff] }
 0x39c   : > { %v8811_v27 = vpop.f32.mrf.mxu0  ;;  %4077 = vmatmul.bf16.gmra.mxu3 %v3896_v0  ;;  %4892 = vmatpush.bf16.msra.mxu2 %v7210_v60  ;;  %v4455_v1 = vld [vmem:[#allocation2 + $0x91] sm:$0xff]  ;;  %v4177_v0 = vld [vmem:[#allocation2 + $0x180] sm:$0xff] }
 0x39d   : > { %3769 = vmatmul.bf16.gmra.mxu2 %v8631_v35  ;;  %4618 = vmatmul.bf16.gmra.mxu1 %v8804_v32  ;;  %v8824_v24 = vadd.f32 %v4323_v52, %v4092_v5  ;;  %v7226_v35 = vld [vmem:[%s9355_s3 + $0x1d8] sm:$0xff]  ;;  %v7207_v5 = vld [vmem:[%s9355_s3 + $0x140] sm:$0xff] }
 0x39e   : > { %5488 = vmatpush.bf16.msra.mxu0 %v7226_v35  ;;  %v5042_v60 = vld [vmem:[#allocation2 + $0x38] sm:$0xff]  ;;  %v5041_v35 = vld [vmem:[#allocation2 + $0x30] sm:$0xff] }
 0x39f   : > { %4370 = vmatmul.bf16.gmra.mxu0 %v8695_v2  ;;  %v8833_v52 = vpop.f32.mrf.mxu3  ;;  %v7217_v2 = vld [vmem:[%s9355_s3 + $0x190] sm:$0xff] }
 0x3a0   : > { %v3730_v44 = vpop.f32.mrf.mxu2  ;;  %4893 = vmatpush.bf16.msra.mxu2 %v7209_v20  ;;  %5191 = vmatpush.bf16.msra.mxu3 %v7217_v2 }
 0x3a1   : > { %v3795_v43 = vadd.f32 %v3730_v44, %v8636_v46  ;;  %v5073_v44 = vpack.c.bf16 %v5042_v60, %v5041_v35 }
 0x3a2   : > { %v8831_v55 = vpop.f32.mrf.mxu1  ;;  %5489 = vmatpush.bf16.msra.mxu0 %v7225_v17 }
 0x3a3   : > { %v4093_v38 = vadd.f32 %v4028_v29, %v3795_v43  ;;  %v7208_v29 = vld [vmem:[%s9355_s3 + $0x148] sm:$0xff] }
 0x3a4   : > { %v4333_v46 = vpop.f32.mrf.mxu0  ;;  %4894 = vmatpush.bf16.msra.mxu2 %v7208_v29  ;;  %5192 = vmatpush.bf16.msra.mxu3 %v7216_v26  ;;  %v4458_v26 = vld [vmem:[#allocation2 + $0xb1] sm:$0xff] }
 0x3a5   : > { %v8850_v61 = vadd.f32 %v4326_v30, %v4093_v38  ;;  %v8859_v30 = vpack.c.bf16 %v4456_v21, %v4455_v1  ;;  %v4457_v21 = vld [vmem:[#allocation2 + $0xa9] sm:$0xff] }
 0x3a6   : > { %5490 = vmatpush.bf16.msra.mxu0 %v7224_v50 }
 0x3a7   : > { %v4040_v18 = vpop.f32.mrf.mxu3 }
 0x3a8   : > { %v3732_v22 = vpop.f32.mrf.mxu2  ;;  %4895 = vmatpush.bf16.msra.mxu2 %v7207_v5 }
 0x3a9   : > { %v3796_v31 = vadd.f32 %v3732_v22, %v8648_v59  ;;  %v7215_v59 = vld [vmem:[%s9355_s3 + $0x180] sm:$0xff] }
 0x3aa   : > { %v8856_v41 = vpop.f32.mrf.mxu1  ;;  %5193 = vmatpush.bf16.msra.mxu3 %v7215_v59  ;;  %5491 = vmatpush.bf16.msra.mxu0 %v7223_v42 }
 0x3ab   : > { %v4094_v47 = vadd.f32 %v8779_v45, %v3796_v31  ;;  %v4194_v45 = vpack.c.bf16 %v4178_v16, %v4177_v0 }
 0x3ac   : > { %v4336_v62 = vpop.f32.mrf.mxu0 }
 0x3ad   : > { %3774 = vmatmul.bf16.gmra.mxu2 %v8659_v25  ;;  %4623 = vmatmul.bf16.gmra.mxu1 %v8859_v30  ;;  %v8873_v58 = vadd.f32 %v8797_v3, %v4094_v47  ;;  %v5044_v47 = vld [vmem:[#allocation2 + $0x50] sm:$0xff] }
 0x3ae   : > { %5194 = vmatmul.bf16.vlgmr.msra.gmra.mxu3 %v5073_v44  ;;  %v4743_v44 = vld [vmem:[#allocation2 + $0x1a] sm:$0xff] }
 0x3af   : > { %4375 = vmatmul.bf16.gmra.mxu0 %v4194_v45  ;;  %v4043_v2 = vpop.f32.mrf.mxu3 }
 0x3b0   : > { %v3735_v43 = vpop.f32.mrf.mxu2 }
 0x3b1   : > { %v3797_v38 = vadd.f32 %v3735_v43, %v8666_v57  ;;  %v8886_v57 = vpack.c.bf16 %v4458_v26, %v4457_v21  ;;  %v4744_v43 = vld [vmem:[#allocation2 + $0x22] sm:$0xff] }
 0x3b2   : > { %v8876_v20 = vpop.f32.mrf.mxu1  ;;  %v4775_v26 = vpack.c.bf16 %v4744_v43, %v4743_v44 }
 0x3b3   : > { %v4095_v25 = vadd.f32 %v8789_v6, %v3797_v38  ;;  %v7234_v6 = vld [vmem:[%s9355_s3 + $0x218] sm:$0xff] }
 0x3b4   : > { %v4338_v17 = vpop.f32.mrf.mxu0  ;;  %5786 = vmatpush.bf16.msra.mxu1 %v7234_v6 }
 0x3b5   : > { %v8880_v29 = vadd.f32 %v8811_v27, %v4095_v25  ;;  %v4459_v25 = vld [vmem:[#allocation2 + $0xc1] sm:$0xff] }
 0x3b7   : > { %v4045_v1 = vpop.f32.mrf.mxu3 }
 0x3b8   : > { %v3737_v3 = vpop.f32.mrf.mxu2 }
 0x3b9   : > { %v3798_v50 = vadd.f32 %v3737_v3, %v8683_v10  ;;  %v5043_v10 = vld [vmem:[#allocation2 + $0x48] sm:$0xff] }
 0x3ba   : > { %v8883_v22 = vpop.f32.mrf.mxu1  ;;  %v5074_v5 = vpack.c.bf16 %v5044_v47, %v5043_v10 }
 0x3bb   : > { %v4096_v31 = vadd.f32 %v8806_v28, %v3798_v50 }
 0x3bc   : > { %v4341_v16 = vpop.f32.mrf.mxu0 }
 0x3bd   : > { %3779 = vmatmul.bf16.gmra.mxu2 %v8688_v34  ;;  %4628 = vmatmul.bf16.gmra.mxu1 %v8886_v57  ;;  %v8893_v27 = vadd.f32 %v4333_v46, %v4096_v31  ;;  %v4460_v46 = vld [vmem:[#allocation2 + $0xc9] sm:$0xff]  ;;  %v5045_v31 = vld [vmem:[#allocation2 + $0x60] sm:$0xff] }
 0x3be   : > { %5199 = vmatmul.bf16.gmra.mxu3 %v5074_v5 }
 0x3bf   : > { %5492 = vmatmul.bf16.vlgmr.msra.gmra.mxu0 %v8735_v51  ;;  %v4048_v42 = vpop.f32.mrf.mxu3 }
 0x3c0   : > { %v3740_v28 = vpop.f32.mrf.mxu2 }
 0x3c1   : > { %v3799_v59 = vadd.f32 %v3740_v28, %v8692_v37  ;;  %v8905_v37 = vpack.c.bf16 %v4460_v46, %v4459_v25  ;;  %v4745_v46 = vld [vmem:[#allocation2 + $0x32] sm:$0xff] }
 0x3c2   : > { %v8897_v0 = vpop.f32.mrf.mxu1 }
 0x3c3   : > { %v4097_v34 = vadd.f32 %v8833_v52, %v3799_v59  ;;  %v5046_v52 = vld [vmem:[#allocation2 + $0x68] sm:$0xff] }
 0x3c4   : > { %v4343_v60 = vpop.f32.mrf.mxu0  ;;  %v5075_v47 = vpack.c.bf16 %v5046_v52, %v5045_v31 }
 0x3c5   : > { %v8900_v45 = vadd.f32 %v4336_v62, %v4097_v34 }
 0x3c7   : > { %v4050_v50 = vpop.f32.mrf.mxu3 }
 0x3c8   : > { %v3742_v35 = vpop.f32.mrf.mxu2 }
 0x3c9   : > { %v3800_v51 = vadd.f32 %v3742_v35, %v8701_v15  ;;  %v4462_v35 = vld [vmem:[#allocation2 + $0xe1] sm:$0xff] }
 0x3ca   : > { %v8903_v38 = vpop.f32.mrf.mxu1 }
 0x3cb   : > { %v4098_v3 = vadd.f32 %v4040_v18, %v3800_v51 }
 0x3cc   : > { %v4346_v21 = vpop.f32.mrf.mxu0 }
 0x3cd   : > { %4633 = vmatmul.bf16.gmra.mxu1 %v8905_v37  ;;  %4896 = vmatmul.bf16.vlgmr.msra.gmra.mxu2 %v4775_v26  ;;  %v8908_v62 = vadd.f32 %v4338_v17, %v4098_v3  ;;  %v4746_v17 = vld [vmem:[#allocation2 + $0x3a] sm:$0xff] }
 0x3ce   : > { %5204 = vmatmul.bf16.gmra.mxu3 %v5075_v47  ;;  %v8922_v3 = vpack.c.bf16 %v4746_v17, %v4745_v46  ;;  %v4464_v17 = vld [vmem:[#allocation2 + $0xf9] sm:$0xff] }
 0x3cf   : > { %5497 = vmatmul.bf16.gmra.mxu0 %v8756_v23  ;;  %v4053_v5 = vpop.f32.mrf.mxu3  ;;  %v4461_v23 = vld [vmem:[#allocation2 + $0xd9] sm:$0xff] }
 0x3d0   : > { %v3745_v15 = vpop.f32.mrf.mxu2 }
 0x3d1   : > { %v3801_v6 = vadd.f32 %v3745_v15, %v8713_v39  ;;  %v8920_v39 = vpack.c.bf16 %v4462_v35, %v4461_v23 }
 0x3d2   : > { %v8912_v18 = vpop.f32.mrf.mxu1 }
 0x3d3   : > { %v4099_v10 = vadd.f32 %v4043_v2, %v3801_v6 }
 0x3d4   : > { %v4348_v28 = vpop.f32.mrf.mxu0 }
 0x3d5   : > { %v8914_v59 = vadd.f32 %v4341_v16, %v4099_v10  ;;  %v5048_v16 = vld [vmem:[#allocation2 + $0x80] sm:$0xff] }
 0x3d7   : > { %v4055_v2 = vpop.f32.mrf.mxu3 }
 0x3d8   : > { %v3747_v34 = vpop.f32.mrf.mxu2 }
 0x3d9   : > { %v3802_v44 = vadd.f32 %v3747_v34, %v8727_v56  ;;  %v7233_v56 = vld [vmem:[%s9355_s3 + $0x210] sm:$0xff] }
 0x3da   : > { %v4599_v43 = vpop.f32.mrf.mxu1  ;;  %5787 = vmatpush.bf16.msra.mxu1 %v7233_v56 }
 0x3db   : > { %v4100_v51 = vadd.f32 %v4045_v1, %v3802_v44  ;;  %v8918_v25 = vadd.f32 %v4599_v43, %v8710_v63  ;;  %v5047_v1 = vld [vmem:[#allocation2 + $0x78] sm:$0xff]  ;;  %v4747_v44 = vld [vmem:[#allocation2 + $0x4a] sm:$0xff] }
 0x3dc   : > { %v4351_v26 = vpop.f32.mrf.mxu0  ;;  %v5076_v63 = vpack.c.bf16 %v5048_v16, %v5047_v1  ;;  %v4748_v43 = vld [vmem:[#allocation2 + $0x52] sm:$0xff] }
 0x3dd   : > { %4638 = vmatmul.bf16.gmra.mxu1 %v8920_v39  ;;  %4901 = vmatmul.bf16.gmra.mxu2 %v8922_v3  ;;  %v8929_v52 = vadd.f32 %v4343_v60, %v4100_v51  ;;  %v4463_v51 = vld [vmem:[#allocation2 + $0xf1] sm:$0xff] }
 0x3de   : > { %5209 = vmatmul.bf16.gmra.mxu3 %v5076_v63 }
 0x3df   : > { %5502 = vmatmul.bf16.gmra.mxu0 %v8777_v4  ;;  %v4058_v34 = vpop.f32.mrf.mxu3 }
 0x3e0   : > { %v3750_v31 = vpop.f32.mrf.mxu2 }
 0x3e1   : > { %v3803_v47 = vadd.f32 %v3750_v31, %v8733_v36 }
 0x3e2   : > { %v4601_v15 = vpop.f32.mrf.mxu1 }
 0x3e3   : > { %v4101_v6 = vadd.f32 %v4048_v42, %v3803_v47  ;;  %v8934_v10 = vadd.f32 %v4601_v15, %v8723_v9  ;;  %v8942_v42 = vpack.c.bf16 %v4464_v17, %v4463_v51  ;;  %v8944_v9 = vpack.c.bf16 %v4748_v43, %v4747_v44 }
 0x3e4   : > { %v4353_v35 = vpop.f32.mrf.mxu0 }
 0x3e5   : > { %v8936_v46 = vadd.f32 %v4346_v21, %v4101_v6  ;;  %v5050_v21 = vld [vmem:[#allocation2 + $0x98] sm:$0xff] }
 0x3e7   : > { %v4060_v56 = vpop.f32.mrf.mxu3 }
 0x3e8   : > { %v3752_v60 = vpop.f32.mrf.mxu2 }
 0x3e9   : > { %v3804_v4 = vadd.f32 %v3752_v60, %v8743_v19  ;;  %v5049_v19 = vld [vmem:[#allocation2 + $0x90] sm:$0xff] }
 0x3ea   : > { %v4604_v23 = vpop.f32.mrf.mxu1 }
 0x3eb   : > { %v4102_v16 = vadd.f32 %v4050_v50, %v3804_v4  ;;  %v8940_v36 = vadd.f32 %v4604_v23, %v8730_v7  ;;  %v5077_v50 = vpack.c.bf16 %v5050_v21, %v5049_v19  ;;  %v4749_v4 = vld [vmem:[#allocation2 + $0x62] sm:$0xff]  ;;  %v4750_v23 = vld [vmem:[#allocation2 + $0x6a] sm:$0xff] }
 0x3ec   : > { %v4356_v1 = vpop.f32.mrf.mxu0 }
 0x3ed   : > { %4643 = vmatmul.bf16.gmra.mxu1 %v8942_v42  ;;  %4906 = vmatmul.bf16.gmra.mxu2 %v8944_v9  ;;  %v8948_v63 = vadd.f32 %v4348_v28, %v4102_v16  ;;  %v4466_v28 = vld [vmem:[#allocation2 + $0x111] sm:$0xff]  ;;  %v4465_v16 = vld [vmem:[#allocation2 + $0x109] sm:$0xff] }
 0x3ee   : > { %5214 = vmatmul.bf16.gmra.mxu3 %v5077_v50  ;;  %v5052_v50 = vld [vmem:[#allocation2 + $0xb0] sm:$0xff] }
 0x3ef   : > { %5507 = vmatmul.bf16.gmra.mxu0 %v8804_v32  ;;  %v4063_v17 = vpop.f32.mrf.mxu3 }
 0x3f0   : > { %v3755_v31 = vpop.f32.mrf.mxu2 }
 0x3f1   : > { %v3805_v7 = vadd.f32 %v3755_v31, %v8754_v12  ;;  %v5051_v31 = vld [vmem:[#allocation2 + $0xa8] sm:$0xff] }
 0x3f2   : > { %v4606_v47 = vpop.f32.mrf.mxu1 }
 0x3f3   : > { %v4103_v15 = vadd.f32 %v4053_v5, %v3805_v7  ;;  %v8953_v6 = vadd.f32 %v4606_v47, %v8739_v48  ;;  %v8961_v5 = vpack.c.bf16 %v4466_v28, %v4465_v16  ;;  %v8963_v48 = vpack.c.bf16 %v4750_v23, %v4749_v4  ;;  %v4752_v16 = vld [vmem:[#allocation2 + $0x82] sm:$0xff] }
 0x3f4   : > { %v4358_v60 = vpop.f32.mrf.mxu0 }
 0x3f5   : > { %v8955_v44 = vadd.f32 %v4351_v26, %v4103_v15 }
 0x3f8   : > { %v3757_v43 = vpop.f32.mrf.mxu2 }
 0x3f9   : > { %v3806_v32 = vadd.f32 %v3757_v43, %v8770_v8  ;;  %v7232_v8 = vld [vmem:[%s9355_s3 + $0x208] sm:$0xff] }
 0x3fa   : > { %v4609_v51 = vpop.f32.mrf.mxu1  ;;  %5788 = vmatpush.bf16.msra.mxu1 %v7232_v8  ;;  %v4467_v8 = vld [vmem:[#allocation2 + $0x121] sm:$0xff] }
 0x3fb   : > { %v4104_v21 = vadd.f32 %v4055_v2, %v3806_v32  ;;  %v8959_v12 = vadd.f32 %v4609_v51, %v8751_v40  ;;  %v4065_v2 = vpop.f32.mrf.mxu3  ;;  %v5078_v40 = vpack.c.bf16 %v5052_v50, %v5051_v31  ;;  %v4468_v32 = vld [vmem:[#allocation2 + $0x129] sm:$0xff]  ;;  %v4751_v51 = vld [vmem:[#allocation2 + $0x7a] sm:$0xff] }
 0x3fc   : > { %v4361_v19 = vpop.f32.mrf.mxu0 }
 0x3fd   : > { %4648 = vmatmul.bf16.gmra.mxu1 %v8961_v5  ;;  %4911 = vmatmul.bf16.gmra.mxu2 %v8963_v48  ;;  %v8970_v26 = vadd.f32 %v4353_v35, %v4104_v21 }
 0x3fe   : > { %5219 = vmatmul.bf16.gmra.mxu3 %v5078_v40 }
 0x3ff   : > { %5512 = vmatmul.bf16.gmra.mxu0 %v8859_v30 }
 0x400   : > { %v3760_v7 = vpop.f32.mrf.mxu2 }
 0x401   : > { %v3807_v47 = vadd.f32 %v3760_v7, %v8775_v13 }
 0x402   : > { %v4611_v15 = vpop.f32.mrf.mxu1 }
 0x403   : > { %v4105_v43 = vadd.f32 %v4058_v34, %v3807_v47  ;;  %v8975_v28 = vadd.f32 %v4611_v15, %v8766_v14  ;;  %v4068_v21 = vpop.f32.mrf.mxu3  ;;  %v8983_v34 = vpack.c.bf16 %v4468_v32, %v4467_v8  ;;  %v8985_v14 = vpack.c.bf16 %v4752_v16, %v4751_v51  ;;  %v5053_v47 = vld [vmem:[#allocation2 + $0xc0] sm:$0xff] }
 0x404   : > { %v4363_v4 = vpop.f32.mrf.mxu0  ;;  %v4754_v8 = vld [vmem:[#allocation2 + $0x9a] sm:$0xff] }
 0x405   : > { %v8977_v23 = vadd.f32 %v4356_v1, %v4105_v43  ;;  %v5054_v1 = vld [vmem:[#allocation2 + $0xc8] sm:$0xff] }
 0x408   : > { %v3762_v35 = vpop.f32.mrf.mxu2 }
 0x409   : > { %v3808_v30 = vadd.f32 %v3762_v35, %v8787_v49  ;;  %v5079_v49 = vpack.c.bf16 %v5054_v1, %v5053_v47  ;;  %v4469_v1 = vld [vmem:[#allocation2 + $0x139] sm:$0xff] }
 0x40a   : > { %v4614_v50 = vpop.f32.mrf.mxu1 }
 0x40b   : > { %v4106_v31 = vadd.f32 %v4060_v56, %v3808_v30  ;;  %v8981_v13 = vadd.f32 %v4614_v50, %v8772_v33  ;;  %v4070_v43 = vpop.f32.mrf.mxu3  ;;  %v4753_v50 = vld [vmem:[#allocation2 + $0x92] sm:$0xff] }
 0x40c   : > { %v4366_v40 = vpop.f32.mrf.mxu0 }
 0x40d   : > { %4653 = vmatmul.bf16.gmra.mxu1 %v8983_v34  ;;  %4916 = vmatmul.bf16.gmra.mxu2 %v8985_v14  ;;  %v8989_v7 = vadd.f32 %v4358_v60, %v4106_v31  ;;  %v4470_v60 = vld [vmem:[#allocation2 + $0x141] sm:$0xff] }
 0x40e   : > { %5224 = vmatmul.bf16.gmra.mxu3 %v5079_v49  ;;  %v9002_v49 = vpack.c.bf16 %v4470_v60, %v4469_v1  ;;  %v4755_v1 = vld [vmem:[#allocation2 + $0xaa] sm:$0xff] }
 0x40f   : > { %5517 = vmatmul.bf16.gmra.mxu0 %v8886_v57 }
 0x410   : > { %v3765_v56 = vpop.f32.mrf.mxu2 }
 0x411   : > { %v3809_v33 = vadd.f32 %v3765_v56, %v8802_v11  ;;  %v5056_v56 = vld [vmem:[#allocation2 + $0xe0] sm:$0xff] }
 0x412   : > { %v4616_v15 = vpop.f32.mrf.mxu1 }
 0x413   : > { %v4107_v35 = vadd.f32 %v4063_v17, %v3809_v33  ;;  %v8994_v32 = vadd.f32 %v4616_v15, %v8783_v53  ;;  %v9004_v17 = vpack.c.bf16 %v4754_v8, %v4753_v50  ;;  %v4073_v53 = vpop.f32.mrf.mxu3  ;;  %v5055_v33 = vld [vmem:[#allocation2 + $0xd8] sm:$0xff] }
 0x414   : > { %v4368_v51 = vpop.f32.mrf.mxu0 }
 0x415   : > { %v8996_v16 = vadd.f32 %v4361_v19, %v4107_v35 }
 0x418   : > { %v3767_v30 = vpop.f32.mrf.mxu2 }
 0x419   : > { %v3810_v57 = vadd.f32 %v3767_v30, %v8831_v55  ;;  %v7231_v55 = vld [vmem:[%s9355_s3 + $0x200] sm:$0xff] }
 0x41a   : > { %v4619_v31 = vpop.f32.mrf.mxu1  ;;  %5789 = vmatpush.bf16.msra.mxu1 %v7231_v55  ;;  %v4471_v55 = vld [vmem:[#allocation2 + $0x151] sm:$0xff] }
 0x41b   : > { %v4108_v47 = vadd.f32 %v4065_v2, %v3810_v57  ;;  %v9000_v11 = vadd.f32 %v4619_v31, %v8799_v54  ;;  %v5080_v54 = vpack.c.bf16 %v5056_v56, %v5055_v33  ;;  %v4075_v57 = vpop.f32.mrf.mxu3  ;;  %v4472_v31 = vld [vmem:[#allocation2 + $0x159] sm:$0xff] }
 0x41c   : > { %v4371_v2 = vpop.f32.mrf.mxu0 }
 0x41d   : > { %9385 = vst [vmem:[#allocation6_spill] sm:$0xff] %v9000_v11  ;;  %4658 = vmatmul.bf16.gmra.mxu1 %v9002_v49  ;;  %4921 = vmatmul.bf16.gmra.mxu2 %v9004_v17  ;;  %v9011_v19 = vadd.f32 %v4363_v4, %v4108_v47  ;;  %v4756_v47 = vld [vmem:[#allocation2 + $0xb2] sm:$0xff] }
 0x41e   : > { %5229 = vmatmul.bf16.gmra.mxu3 %v5080_v54 }
 0x41f   : > { %5522 = vmatmul.bf16.gmra.mxu0 %v8905_v37 }
 0x420   : > { %v3770_v15 = vpop.f32.mrf.mxu2 }
 0x421   : > { %v3811_v35 = vadd.f32 %v3770_v15, %v8856_v41  ;;  %v5057_v15 = vld [vmem:[#allocation2 + $0xf0] sm:$0xff] }
 0x422   : > { %v4621_v30 = vpop.f32.mrf.mxu1 }
 0x423   : > { %v4109_v60 = vadd.f32 %v4068_v21, %v3811_v35  ;;  %v9016_v50 = vadd.f32 %v4621_v30, %v8824_v24  ;;  %v9024_v21 = vpack.c.bf16 %v4472_v31, %v4471_v55  ;;  %v9026_v24 = vpack.c.bf16 %v4756_v47, %v4755_v1 }
 0x424   : > { %v4373_v11 = vpop.f32.mrf.mxu0 }
 0x425   : > { %v9018_v8 = vadd.f32 %v4366_v40, %v4109_v60  ;;  %v5058_v40 = vld [vmem:[#allocation2 + $0xf8] sm:$0xff] }
 0x428   : > { %v3772_v4 = vpop.f32.mrf.mxu2 }
 0x429   : > { %v3812_v37 = vadd.f32 %v3772_v4, %v8876_v20  ;;  %v5081_v20 = vpack.c.bf16 %v5058_v40, %v5057_v15 }
 0x42a   : > { %v4624_v56 = vpop.f32.mrf.mxu1 }
 0x42b   : > { %v4110_v33 = vadd.f32 %v4070_v43, %v3812_v37  ;;  %v9022_v41 = vadd.f32 %v4624_v56, %v8850_v61  ;;  %v4078_v43 = vpop.f32.mrf.mxu3  ;;  %v4757_v37 = vld [vmem:[#allocation2 + $0xc2] sm:$0xff]  ;;  %v4758_v56 = vld [vmem:[#allocation2 + $0xca] sm:$0xff] }
 0x42c   : > { %v4376_v60 = vpop.f32.mrf.mxu0 }
 0x42d   : > { %4663 = vmatmul.bf16.gmra.mxu1 %v9024_v21  ;;  %4926 = vmatmul.bf16.gmra.mxu2 %v9026_v24  ;;  %v9030_v54 = vadd.f32 %v4368_v51, %v4110_v33  ;;  %v4474_v51 = vld [vmem:[#allocation2 + $0x171] sm:$0xff]  ;;  %v4473_v33 = vld [vmem:[#allocation2 + $0x169] sm:$0xff] }
 0x42e   : > { %5234 = vmatmul.bf16.gmra.mxu3 %v5081_v20  ;;  %v9043_v20 = vpack.c.bf16 %v4474_v51, %v4473_v33  ;;  %v4760_v33 = vld [vmem:[#allocation2 + $0xe2] sm:$0xff] }
 0x42f   : > { %5527 = vmatmul.bf16.gmra.mxu0 %v8920_v39 }
 0x430   : > { %v3775_v35 = vpop.f32.mrf.mxu2 }
 0x431   : > { %v3813_v61 = vadd.f32 %v3775_v35, %v8883_v22 }
 0x432   : > { %v4626_v30 = vpop.f32.mrf.mxu1 }
 0x433   : > { %v4111_v4 = vadd.f32 %v4073_v53, %v3813_v61  ;;  %v9035_v31 = vadd.f32 %v4626_v30, %v8873_v58  ;;  %v4080_v40 = vpop.f32.mrf.mxu3  ;;  %v9045_v53 = vpack.c.bf16 %v4758_v56, %v4757_v37 }
 0x434   : > { %v4378_v58 = vpop.f32.mrf.mxu0 }
 0x435   : > { %v9037_v1 = vadd.f32 %v4371_v2, %v4111_v4  ;;  %v5060_v2 = vld [vmem:[#allocation2 + $0x110] sm:$0xff] }
 0x438   : > { %v3777_v47 = vpop.f32.mrf.mxu2 }
 0x439   : > { %v3814_v39 = vadd.f32 %v3777_v47, %v8897_v0  ;;  %v5059_v0 = vld [vmem:[#allocation2 + $0x108] sm:$0xff] }
 0x43a   : > { %v4629_v55 = vpop.f32.mrf.mxu1  ;;  %v5082_v61 = vpack.c.bf16 %v5060_v2, %v5059_v0  ;;  %v4475_v2 = vld [vmem:[#allocation2 + $0x181] sm:$0xff] }
 0x43b   : > { %v4112_v15 = vadd.f32 %v4075_v57, %v3814_v39  ;;  %v9041_v22 = vadd.f32 %v4629_v55, %v8880_v29  ;;  %v5195_v51 = vpop.f32.mrf.mxu3  ;;  %v4759_v55 = vld [vmem:[#allocation2 + $0xda] sm:$0xff] }
 0x43c   : > { %v5493_v56 = vpop.f32.mrf.mxu0 }
 0x43d   : > { %4668 = vmatmul.bf16.gmra.mxu1 %v9043_v20  ;;  %4931 = vmatmul.bf16.gmra.mxu2 %v9045_v53  ;;  %v9049_v35 = vadd.f32 %v4373_v11, %v4112_v15  ;;  %v4476_v11 = vld [vmem:[#allocation2 + $0x189] sm:$0xff] }
 0x43e   : > { %5239 = vmatmul.bf16.gmra.mxu3 %v5082_v61  ;;  %v5062_v61 = vld [vmem:[#allocation2 + $0x128] sm:$0xff] }
 0x43f   : > { %5532 = vmatmul.bf16.gmra.mxu0 %v8942_v42 }
 0x440   : > { %v3780_v57 = vpop.f32.mrf.mxu2 }
 0x441   : > { %v3815_v29 = vadd.f32 %v3780_v57, %v8903_v38 }
 0x442   : > { %v4631_v30 = vpop.f32.mrf.mxu1 }
 0x443   : > { %v4113_v4 = vadd.f32 %v4078_v43, %v3815_v29  ;;  %v9054_v47 = vadd.f32 %v4631_v30, %v8893_v27  ;;  %v9062_v43 = vpack.c.bf16 %v4476_v11, %v4475_v2  ;;  %v9064_v27 = vpack.c.bf16 %v4760_v33, %v4759_v55  ;;  %v5197_v57 = vpop.f32.mrf.mxu3  ;;  %v5061_v29 = vld [vmem:[#allocation2 + $0x120] sm:$0xff] }
 0x444   : > { %v5495_v30 = vpop.f32.mrf.mxu0 }
 0x445   : > { %v9056_v37 = vadd.f32 %v4376_v60, %v4113_v4 }
 0x448   : > { %v3782_v39 = vpop.f32.mrf.mxu2 }
 0x449   : > { %v3816_v42 = vadd.f32 %v3782_v39, %v8912_v18  ;;  %v5083_v18 = vpack.c.bf16 %v5062_v61, %v5061_v29 }
 0x44a   : > { %v4634_v15 = vpop.f32.mrf.mxu1 }
 0x44b   : > { %v4114_v0 = vadd.f32 %v4080_v40, %v3816_v42  ;;  %v9060_v38 = vadd.f32 %v4634_v15, %v8900_v45  ;;  %v4762_v42 = vld [vmem:[#allocation2 + $0xfa] sm:$0xff]  ;;  %v5200_v15 = vpop.f32.mrf.mxu3 }
 0x44d   : > { %4673 = vmatmul.bf16.gmra.mxu1 %v9062_v43  ;;  %4936 = vmatmul.bf16.gmra.mxu2 %v9064_v27  ;;  %v9068_v60 = vadd.f32 %v4378_v58, %v4114_v0  ;;  %v4761_v58 = vld [vmem:[#allocation2 + $0xf2] sm:$0xff]  ;;  %v5498_v0 = vpop.f32.mrf.mxu0 }
 0x44e   : > { %5244 = vmatmul.bf16.gmra.mxu3 %v5083_v18 }
 0x44f   : > { %5537 = vmatmul.bf16.gmra.mxu0 %v8961_v5 }
 0x450   : > { %v4897_v40 = vpop.f32.mrf.mxu2 }
 0x451   : > { %v4977_v45 = vadd.f32 %v4897_v40, %v8918_v25  ;;  %v9081_v25 = vpack.c.bf16 %v4762_v42, %v4761_v58  ;;  %v4764_v58 = vld [vmem:[#allocation2 + $0x112] sm:$0xff] }
 0x452   : > { %v4636_v4 = vpop.f32.mrf.mxu1 }
 0x453   : > { %v5275_v39 = vadd.f32 %v5195_v51, %v4977_v45  ;;  %v9073_v11 = vadd.f32 %v4636_v4, %v8908_v62  ;;  %v5064_v51 = vld [vmem:[#allocation2 + $0x140] sm:$0xff] }
 0x455   : > { %v9075_v55 = vadd.f32 %v5493_v56, %v5275_v39  ;;  %v5063_v56 = vld [vmem:[#allocation2 + $0x138] sm:$0xff]  ;;  %v5500_v39 = vpop.f32.mrf.mxu0 }
 0x456   : > { %v5084_v18 = vpack.c.bf16 %v5064_v51, %v5063_v56  ;;  %v5065_v51 = vld [vmem:[#allocation2 + $0x150] sm:$0xff] }
 0x458   : > { %v4899_v33 = vpop.f32.mrf.mxu2 }
 0x459   : > { %v4978_v2 = vadd.f32 %v4899_v33, %v8934_v10 }
 0x45a   : > { %v4639_v5 = vpop.f32.mrf.mxu1 }
 0x45b   : > { %v5276_v61 = vadd.f32 %v5197_v57, %v4978_v2  ;;  %v9079_v29 = vadd.f32 %v4639_v5, %v8914_v59  ;;  %v5202_v59 = vpop.f32.mrf.mxu3 }
 0x45d   : > { %4941 = vmatmul.bf16.gmra.mxu2 %v9081_v25  ;;  %5790 = vmatmul.bf16.vlgmr.msra.gmra.mxu1 %v8922_v3  ;;  %v9085_v62 = vadd.f32 %v5495_v30, %v5276_v61  ;;  %v4763_v30 = vld [vmem:[#allocation2 + $0x10a] sm:$0xff] }
 0x45e   : > { %5249 = vmatmul.bf16.gmra.mxu3 %v5084_v18 }
 0x45f   : > { %5542 = vmatmul.bf16.gmra.mxu0 %v8983_v34 }
 0x460   : > { %v4902_v10 = vpop.f32.mrf.mxu2 }
 0x461   : > { %v4979_v40 = vadd.f32 %v4902_v10, %v8940_v36  ;;  %v9098_v36 = vpack.c.bf16 %v4764_v58, %v4763_v30 }
 0x462   : > { %v4641_v57 = vpop.f32.mrf.mxu1 }
 0x463   : > { %v5277_v45 = vadd.f32 %v5200_v15, %v4979_v40  ;;  %v9090_v4 = vadd.f32 %v4641_v57, %v8929_v52  ;;  %v5205_v61 = vpop.f32.mrf.mxu3  ;;  %v5066_v15 = vld [vmem:[#allocation2 + $0x158] sm:$0xff] }
 0x465   : > { %v9092_v33 = vadd.f32 %v5498_v0, %v5277_v45  ;;  %v5503_v0 = vpop.f32.mrf.mxu0 }
 0x468   : > { %v4904_v3 = vpop.f32.mrf.mxu2 }
 0x469   : > { %v4980_v42 = vadd.f32 %v4904_v3, %v8953_v6  ;;  %v5085_v6 = vpack.c.bf16 %v5066_v15, %v5065_v51  ;;  %v4766_v3 = vld [vmem:[#allocation2 + $0x12a] sm:$0xff] }
 0x46a   : > { %v4644_v34 = vpop.f32.mrf.mxu1 }
 0x46b   : > { %v5278_v2 = vadd.f32 %v5202_v59, %v4980_v42  ;;  %v9096_v5 = vadd.f32 %v4644_v34, %v8936_v46  ;;  %v5207_v59 = vpop.f32.mrf.mxu3  ;;  %v5068_v34 = vld [vmem:[#allocation2 + $0x170] sm:$0xff] }
 0x46d   : > { %4946 = vmatmul.bf16.gmra.mxu2 %v9098_v36  ;;  %5795 = vmatmul.bf16.gmra.mxu1 %v8944_v9  ;;  %v9102_v52 = vadd.f32 %v5500_v39, %v5278_v2  ;;  %v5505_v9 = vpop.f32.mrf.mxu0  ;;  %v4765_v39 = vld [vmem:[#allocation2 + $0x122] sm:$0xff] }
 0x46e   : > { %5254 = vmatmul.bf16.gmra.mxu3 %v5085_v6  ;;  %v5067_v2 = vld [vmem:[#allocation2 + $0x168] sm:$0xff] }
 0x46f   : > { %5547 = vmatmul.bf16.gmra.mxu0 %v9002_v49 }
 0x470   : > { %v4907_v56 = vpop.f32.mrf.mxu2 }
 0x471   : > { %v4981_v18 = vadd.f32 %v4907_v56, %v8959_v12  ;;  %v9115_v12 = vpack.c.bf16 %v4766_v3, %v4765_v39 }
 0x472   : > { %v4646_v46 = vpop.f32.mrf.mxu1 }
 0x473   : > { %v5279_v10 = vadd.f32 %v5205_v61, %v4981_v18  ;;  %v9107_v40 = vadd.f32 %v4646_v46, %v8948_v63  ;;  %v5086_v61 = vpack.c.bf16 %v5068_v34, %v5067_v2  ;;  %v4767_v46 = vld [vmem:[#allocation2 + $0x13a] sm:$0xff] }
 0x474   : > { %v4770_v2 = vld [vmem:[#allocation2 + $0x15a] sm:$0xff] }
 0x475   : > { %v9109_v57 = vadd.f32 %v5503_v0, %v5279_v10  ;;  %v4768_v10 = vld [vmem:[#allocation2 + $0x142] sm:$0xff] }
 0x478   : > { %v4909_v45 = vpop.f32.mrf.mxu2 }
 0x479   : > { %v4982_v30 = vadd.f32 %v4909_v45, %v8975_v28  ;;  %v5210_v28 = vpop.f32.mrf.mxu3 }
 0x47a   : > { %v4649_v49 = vpop.f32.mrf.mxu1 }
 0x47b   : > { %v5280_v58 = vadd.f32 %v5207_v59, %v4982_v30  ;;  %v9113_v42 = vadd.f32 %v4649_v49, %v8955_v44  ;;  %v5508_v44 = vpop.f32.mrf.mxu0  ;;  %v5070_v30 = vld [vmem:[#allocation2 + $0x188] sm:$0xff]  ;;  %v5069_v49 = vld [vmem:[#allocation2 + $0x180] sm:$0xff] }
 0x47d   : > { %4951 = vmatmul.bf16.gmra.mxu2 %v9115_v12  ;;  %5800 = vmatmul.bf16.gmra.mxu1 %v8963_v48  ;;  %v9119_v63 = vadd.f32 %v5505_v9, %v5280_v58 }
 0x47e   : > { %5259 = vmatmul.bf16.gmra.mxu3 %v5086_v61 }
 0x47f   : > { %5552 = vmatmul.bf16.gmra.mxu0 %v9024_v21 }
 0x480   : > { %v4912_v15 = vpop.f32.mrf.mxu2 }
 0x481   : > { %v4983_v0 = vadd.f32 %v4912_v15, %v8981_v13  ;;  %v5212_v21 = vpop.f32.mrf.mxu3  ;;  %v9132_v13 = vpack.c.bf16 %v4768_v10, %v4767_v46 }
 0x482   : > { %v4651_v51 = vpop.f32.mrf.mxu1 }
 0x483   : > { %v5281_v6 = vadd.f32 %v5210_v28, %v4983_v0  ;;  %v9124_v56 = vadd.f32 %v4651_v51, %v8970_v26  ;;  %v5510_v3 = vpop.f32.mrf.mxu0  ;;  %v4772_v51 = vld [vmem:[#allocation2 + $0x172] sm:$0xff] }
 0x485   : > { %v9126_v18 = vadd.f32 %v5508_v44, %v5281_v6  ;;  %v4771_v44 = vld [vmem:[#allocation2 + $0x16a] sm:$0xff]  ;;  %v5369_v6 = vld [vmem:[#allocation2 + $0x199] sm:$0xff] }
 0x486   : > { %v9156_v10 = vpack.c.bf16 %v4772_v51, %v4771_v44 }
 0x488   : > { %v4914_v48 = vpop.f32.mrf.mxu2 }
 0x489   : > { %v4984_v59 = vadd.f32 %v4914_v48, %v8994_v32  ;;  %v5087_v32 = vpack.c.bf16 %v5070_v30, %v5069_v49 }
 0x48a   : > { %v4654_v9 = vpop.f32.mrf.mxu1 }
 0x48b   : > { %v5282_v45 = vadd.f32 %v5212_v21, %v4984_v59  ;;  %v9130_v39 = vadd.f32 %v4654_v9, %v8977_v23  ;;  %v4769_v23 = vld [vmem:[#allocation2 + $0x152] sm:$0xff]  ;;  %v4773_v59 = vld [vmem:[#allocation2 + $0x182] sm:$0xff]  ;;  %v4774_v21 = vld [vmem:[#allocation2 + $0x18a] sm:$0xff]  ;;  %v9195_v44 = vpop.f32.mrf.mxu0 }
 0x48c   : > { %v9145_v28 = vpack.c.bf16 %v4770_v2, %v4769_v23 }
 0x48d   : > { %4956 = vmatmul.bf16.gmra.mxu2 %v9132_v13  ;;  %5805 = vmatmul.bf16.gmra.mxu1 %v8985_v14  ;;  %v9136_v26 = vadd.f32 %v5510_v3, %v5282_v45  ;;  %v7537_v14 = vld [vmem:[#allocation2] sm:$0xff] }
 0x48e   : > { %5264 = vmatmul.bf16.gmra.mxu3 %v5087_v32 }
 0x48f   : > { %5557 = vmatmul.bf16.gmra.mxu0 %v9043_v20  ;;  %v5088_v20 = vpack.c.bf16 %v7537_v14, %v7537_v14 }
 0x492   : > { %v4656_v58 = vpop.f32.mrf.mxu1 }
 0x493   : > { %v9140_v34 = vadd.f32 %v4656_v58, %v8989_v7 }
 0x49a   : > { %v4659_v61 = vpop.f32.mrf.mxu1 }
 0x49b   : > { %v9143_v15 = vadd.f32 %v4659_v61, %v8996_v16  ;;  %v5370_v16 = vld [vmem:[#allocation2 + $0x1a1] sm:$0xff] }
 0x49d   : > { %4961 = vmatmul.bf16.gmra.mxu2 %v9145_v28  ;;  %5810 = vmatmul.bf16.gmra.mxu1 %v9004_v17  ;;  %v5386_v17 = vpack.c.bf16 %v5370_v16, %v5369_v6 }
 0x49e   : > { %5269 = vmatmul.bf16.gmra.mxu3 %v5088_v20  ;;  %v9193_v20 = vpop.f32.mrf.mxu3 }
 0x49f   : > { %5562 = vmatmul.bf16.gmra.mxu0 %v9062_v43 }
 0x4a2   : > { %v4661_v0 = vpop.f32.mrf.mxu1 }
 0x4a3   : > { %v9151_v7 = vadd.f32 %v4661_v0, %v9011_v19 }
 0x4aa   : > { %v4664_v48 = vpop.f32.mrf.mxu1 }
 0x4ab   : > { %v9154_v46 = vadd.f32 %v4664_v48, %v9018_v8  ;;  %v9166_v8 = vpack.c.bf16 %v4774_v21, %v4773_v59 }
 0x4ad   : > { %4966 = vmatmul.bf16.gmra.mxu2 %v9156_v10  ;;  %5815 = vmatmul.bf16.gmra.mxu1 %v9026_v24 }
 0x4af   : > { %5567 = vmatmul.bf16.gmra.mxu0 %v5386_v17  ;;  %v7462_v17 = vld [vmem:[%s7677_s7 + $0x8] sm:$0xff]  }
 0x4b0   : > { %v7309_v21 = vunpack.c.l.bf16 %v7462_v17 }
 0x4b2   : > { %v4666_v43 = vpop.f32.mrf.mxu1 }
 0x4b3   : > { %v9161_v19 = vadd.f32 %v4666_v43, %v9030_v54  ;;  %v9210_v43 = vpop.f32.mrf.mxu3 }
 0x4ba   : > { %v4669_v9 = vpop.f32.mrf.mxu1 }
 0x4bb   : > { %v9164_v45 = vadd.f32 %v4669_v9, %v9037_v1 }
 0x4bd   : > { %4971 = vmatmul.bf16.gmra.mxu2 %v9166_v8  ;;  %5820 = vmatmul.bf16.gmra.mxu1 %v9045_v53  ;;  %v9184_v53 = vld [vmem:[%s9356_s4] ss:$0 sm:$0xff] }
 0x4c2   : > { %v4671_v3 = vpop.f32.mrf.mxu1 }
 0x4c3   : > { %v9171_v24 = vadd.f32 %v4671_v3, %v9049_v35  ;;  %v7304_v35 = vld [vmem:[%s7677_s7] sm:$0xff]   ;;  %v9213_v3 = vpop.f32.mrf.mxu0 }
 0x4c4   : > { %v7305_v23 = vunpack.c.l.bf16 %v7304_v35  ;;  %v7306_v61 = vunpack.c.h.bf16 %v7304_v35 }
 0x4ca   : > { %v4674_v30 = vpop.f32.mrf.mxu1 }
 0x4cb   : > { %v9174_v54 = vadd.f32 %v4674_v30, %v9056_v37  ;;  %v9188_v37 = vpop.f32.mrf.mxu2 }
 0x4cd   : > { %5825 = vmatmul.bf16.gmra.mxu1 %v9064_v27 }
 0x4d2   : > { %v4676_v49 = vpop.f32.mrf.mxu1 }
 0x4d3   : > { %v9178_v1 = vadd.f32 %v4676_v49, %v9068_v60  ;;  %v9197_v6 = vpop.f32.mrf.mxu2  ;;  %v7310_v49 = vunpack.c.h.bf16 %v7462_v17 }
 0x4da   : > { %v5791_v32 = vpop.f32.mrf.mxu1 }
 0x4db   : > { %v5871_v58 = vadd.f32 %v5791_v32, %v9075_v55  ;;  %v9216_v32 = vpop.f32.mrf.mxu2 }
 0x4dd   : > { %5830 = vmatmul.bf16.gmra.mxu1 %v9081_v25  ;;  %v5971_v27 = vadd.f32 %v9184_v53, %v5871_v58 }
 0x4df   : > { %v6067_v55 = vadd.f32 %v7305_v23, %v5971_v27  ;;  %v9219_v23 = vpop.f32.mrf.mxu3 }
 0x4e1   : > { %v6099_v25 = vmax.f32 %v6067_v55, 0.0 }
 0x4e2   : > { %v5793_v2 = vpop.f32.mrf.mxu1 }
 0x4e3   : > { %v5872_v60 = vadd.f32 %v5793_v2, %v9085_v62 }
 0x4e5   : > { %v5972_v14 = vadd.f32 %v9184_v53, %v5872_v60 }
 0x4e7   : > { %v6068_v0 = vadd.f32 %v7306_v61, %v5972_v14  ;;  %v9221_v61 = vpop.f32.mrf.mxu0  ;;  %v7463_v14 = vld [vmem:[%s7677_s7 + $0x10] sm:$0xff]  }
 0x4e9   : > { %v6100_v51 = vmax.f32 %v6068_v0, 0.0 }
 0x4ea   : > { %v5796_v62 = vpop.f32.mrf.mxu1 }
 0x4eb   : > { %v7370_v16 = vpack.c.bf16 %v6100_v51, %v6099_v25  ;;  %v5873_v48 = vadd.f32 %v5796_v62, %v9092_v33  ;;  %v7313_v25 = vunpack.c.l.bf16 %v7463_v14 }
 0x4ed   : > { %7371 = vst [vmem:[%s9204_s22] sm:$0xff] %v7370_v16   ;;  %5835 = vmatmul.bf16.gmra.mxu1 %v9098_v36  ;;  %v5973_v59 = vadd.f32 %v9184_v53, %v5873_v48  ;;  %v7314_v16 = vunpack.c.h.bf16 %v7463_v14  ;;  %v5222_v48 = vpop.f32.mrf.mxu3  ;;  %v9386_v14 = vld [vmem:[#allocation6_spill] sm:$0xff] }
 0x4ef   : > { %v6069_v58 = vadd.f32 %v7309_v21, %v5973_v59  ;;  %v9230_v21 = vpop.f32.mrf.mxu0 }
 0x4f1   : > { %v6101_v35 = vmax.f32 %v6069_v58, 0.0 }
 0x4f2   : > { %v5798_v9 = vpop.f32.mrf.mxu1 }
 0x4f3   : > { %v5874_v30 = vadd.f32 %v5798_v9, %v9102_v52  ;;  %v4924_v52 = vpop.f32.mrf.mxu2 }
 0x4f5   : > { %v5974_v33 = vadd.f32 %v9184_v53, %v5874_v30 }
 0x4f7   : > { %v6070_v36 = vadd.f32 %v7310_v49, %v5974_v33 }
 0x4f9   : > { %v6102_v27 = vmax.f32 %v6070_v36, 0.0  ;;  %v7464_v36 = vld [vmem:[%s7677_s7 + $0x18] sm:$0xff]  }
 0x4fa   : > { %v5801_v2 = vpop.f32.mrf.mxu1 }
 0x4fb   : > { %v7375_v60 = vpack.c.bf16 %v6102_v27, %v6101_v35  ;;  %v5875_v55 = vadd.f32 %v5801_v2, %v9109_v57  ;;  %v9232_v9 = vpop.f32.mrf.mxu2  ;;  %v9240_v35 = vpop.f32.mrf.mxu0  ;;  %v7317_v2 = vunpack.c.l.bf16 %v7464_v36 }
 0x4fd   : > { %7477 = vst [vmem:[%s9204_s22 + $0x8] sm:$0xff] %v7375_v60   ;;  %5840 = vmatmul.bf16.gmra.mxu1 %v9115_v12  ;;  %v5975_v0 = vadd.f32 %v9184_v53, %v5875_v55 }
 0x4ff   : > { %v6071_v17 = vadd.f32 %v7313_v25, %v5975_v0  ;;  %v4985_v0 = vadd.f32 %v9188_v37, %v9386_v14 }
 0x501   : > { %v6103_v12 = vmax.f32 %v6071_v17, 0.0 }
 0x502   : > { %v5803_v51 = vpop.f32.mrf.mxu1 }
 0x503   : > { %v5876_v62 = vadd.f32 %v5803_v51, %v9119_v63  ;;  %v9237_v63 = vpop.f32.mrf.mxu3  ;;  %v9243_v60 = vpop.f32.mrf.mxu2 }
 0x505   : > { %v5976_v59 = vadd.f32 %v9184_v53, %v5876_v62  ;;  %v5283_v62 = vadd.f32 %v9193_v20, %v4985_v0  ;;  %v7465_v20 = vld [vmem:[%s7677_s7 + $0x20] sm:$0xff]  }
 0x506   : > { %v7322_v0 = vunpack.c.h.bf16 %v7465_v20 }
 0x507   : > { %v6072_v57 = vadd.f32 %v7314_v16, %v5976_v59  ;;  %v4986_v59 = vadd.f32 %v9197_v6, %v9016_v50  ;;  %v7321_v50 = vunpack.c.l.bf16 %v7465_v20  ;;  %v4989_v20 = vadd.f32 %v9232_v9, %v9041_v22 }
 0x509   : > { %v6104_v30 = vmax.f32 %v6072_v57, 0.0 }
 0x50a   : > { %v5806_v49 = vpop.f32.mrf.mxu1 }
 0x50b   : > { %v7380_v58 = vpack.c.bf16 %v6104_v30, %v6103_v12  ;;  %v5877_v33 = vadd.f32 %v5806_v49, %v9126_v18  ;;  %v7318_v18 = vunpack.c.h.bf16 %v7464_v36  ;;  %v5227_v17 = vpop.f32.mrf.mxu3  ;;  %v9252_v49 = vpop.f32.mrf.mxu0 }
 0x50d   : > { %7478 = vst [vmem:[%s9204_s22 + $0x10] sm:$0xff] %v7380_v58   ;;  %5845 = vmatmul.bf16.gmra.mxu1 %v9132_v13  ;;  %v5977_v27 = vadd.f32 %v9184_v53, %v5877_v33  ;;  %v9255_v58 = vpop.f32.mrf.mxu2  ;;  %v5284_v33 = vadd.f32 %v9210_v43, %v4986_v59 }
 0x50f   : > { %v6073_v51 = vadd.f32 %v7317_v2, %v5977_v27  ;;  %v5582_v6 = vadd.f32 %v9213_v3, %v5284_v33  ;;  %v4988_v3 = vadd.f32 %v4924_v52, %v9035_v31 }
 0x511   : > { %v6105_v57 = vmax.f32 %v6073_v51, 0.0 }
 0x512   : > { %v5808_v55 = vpop.f32.mrf.mxu1 }
 0x513   : > { %v5878_v25 = vadd.f32 %v5808_v55, %v9136_v26  ;;  %v5581_v26 = vadd.f32 %v9195_v44, %v5283_v62  ;;  %v9263_v2 = vpop.f32.mrf.mxu3  ;;  %v4987_v44 = vadd.f32 %v9216_v32, %v9022_v41  ;;  %v9267_v43 = vpop.f32.mrf.mxu0 }
 0x515   : > { %v5978_v13 = vadd.f32 %v9184_v53, %v5878_v25  ;;  %v5285_v51 = vadd.f32 %v9219_v23, %v4987_v44  ;;  %v4990_v44 = vadd.f32 %v9243_v60, %v9054_v47 }
 0x517   : > { %v6074_v16 = vadd.f32 %v7318_v18, %v5978_v13  ;;  %v4934_v18 = vpop.f32.mrf.mxu2  ;;  %v5583_v41 = vadd.f32 %v9221_v61, %v5285_v51  ;;  %v5288_v51 = vadd.f32 %v5227_v17, %v4990_v44  ;;  %v7468_v44 = vld [vmem:[%s7677_s7 + $0x38] sm:$0xff]  }
 0x519   : > { %v6106_v12 = vmax.f32 %v6074_v16, 0.0  ;;  %v5586_v47 = vadd.f32 %v9252_v49, %v5288_v51  ;;  %v4992_v49 = vadd.f32 %v4934_v18, %v9073_v11 }
 0x51a   : > { %v5811_v30 = vpop.f32.mrf.mxu1 }
 0x51b   : > { %v7385_v37 = vpack.c.bf16 %v6106_v12, %v6105_v57  ;;  %v5879_v36 = vadd.f32 %v5811_v30, %v5581_v26  ;;  %v5232_v32 = vpop.f32.mrf.mxu3  ;;  %v5286_v12 = vadd.f32 %v5222_v48, %v4988_v3  ;;  %v5530_v26 = vpop.f32.mrf.mxu0  ;;  %v7467_v3 = vld [vmem:[%s7677_s7 + $0x30] sm:$0xff]  }
 0x51d   : > { %7479 = vst [vmem:[%s9204_s22 + $0x18] sm:$0xff] %v7385_v37   ;;  %5850 = vmatmul.bf16.gmra.mxu1 %v9145_v28  ;;  %v5979_v27 = vadd.f32 %v9184_v53, %v5879_v36  ;;  %v7466_v37 = vld [vmem:[%s7677_s7 + $0x28] sm:$0xff]   ;;  %v5584_v31 = vadd.f32 %v9230_v21, %v5286_v12  ;;  %v7330_v12 = vunpack.c.h.bf16 %v7467_v3 }
 0x51e   : > { %v7325_v36 = vunpack.c.l.bf16 %v7466_v37  ;;  %v7326_v61 = vunpack.c.h.bf16 %v7466_v37  ;;  %v5668_v37 = vld [vmem:[#allocation2 + $0x1a2] sm:$0xff] }
 0x51f   : > { %v6075_v25 = vadd.f32 %v7321_v50, %v5979_v27  ;;  %v4937_v33 = vpop.f32.mrf.mxu2 }
 0x520   : > { %v4993_v18 = vadd.f32 %v4937_v33, %v9079_v29 }
 0x521   : > { %v6107_v62 = vmax.f32 %v6075_v25, 0.0 }
 0x522   : > { %v5813_v55 = vpop.f32.mrf.mxu1 }
 0x523   : > { %v5880_v14 = vadd.f32 %v5813_v55, %v5582_v6  ;;  %v5287_v6 = vadd.f32 %v9237_v63, %v4989_v20 }
 0x525   : > { %v5980_v28 = vadd.f32 %v9184_v53, %v5880_v14  ;;  %v5533_v14 = vpop.f32.mrf.mxu0  ;;  %v5585_v9 = vadd.f32 %v9240_v35, %v5287_v6 }
 0x527   : > { %v6076_v13 = vadd.f32 %v7322_v0, %v5980_v28  ;;  %v4939_v25 = vpop.f32.mrf.mxu2 }
 0x529   : > { %v6108_v16 = vmax.f32 %v6076_v13, 0.0 }
 0x52a   : > { %v5816_v59 = vpop.f32.mrf.mxu1 }
 0x52b   : > { %v7390_v57 = vpack.c.bf16 %v6108_v16, %v6107_v62  ;;  %v5881_v30 = vadd.f32 %v5816_v59, %v5583_v41  ;;  %v7329_v16 = vunpack.c.l.bf16 %v7467_v3  ;;  %v4991_v59 = vadd.f32 %v9255_v58, %v9060_v38 }
 0x52d   : > { %7480 = vst [vmem:[%s9204_s22 + $0x20] sm:$0xff] %v7390_v57   ;;  %5855 = vmatmul.bf16.gmra.mxu1 %v9156_v10  ;;  %v5981_v23 = vadd.f32 %v9184_v53, %v5881_v30  ;;  %v5235_v10 = vpop.f32.mrf.mxu3  ;;  %v5535_v57 = vpop.f32.mrf.mxu0 }
 0x52f   : > { %v6077_v48 = vadd.f32 %v7325_v36, %v5981_v23  ;;  %v4942_v35 = vpop.f32.mrf.mxu2  ;;  %v5289_v23 = vadd.f32 %v9263_v2, %v4991_v59 }
 0x531   : > { %v6109_v21 = vmax.f32 %v6077_v48, 0.0  ;;  %v5290_v48 = vadd.f32 %v5232_v32, %v4992_v49  ;;  %v5291_v32 = vadd.f32 %v5235_v10, %v4993_v18  ;;  %v4995_v49 = vadd.f32 %v4942_v35, %v9096_v5 }
 0x532   : > { %v5818_v52 = vpop.f32.mrf.mxu1 }
 0x533   : > { %v5882_v27 = vadd.f32 %v5818_v52, %v5584_v31 }
 0x535   : > { %v5982_v50 = vadd.f32 %v9184_v53, %v5882_v27  ;;  %v5237_v62 = vpop.f32.mrf.mxu3 }
 0x537   : > { %v6078_v55 = vadd.f32 %v7326_v61, %v5982_v50  ;;  %v5587_v61 = vadd.f32 %v9267_v43, %v5289_v23  ;;  %v5538_v50 = vpop.f32.mrf.mxu0 }
 0x539   : > { %v6110_v0 = vmax.f32 %v6078_v55, 0.0  ;;  %v4944_v55 = vpop.f32.mrf.mxu2 }
 0x53a   : > { %v5821_v28 = vpop.f32.mrf.mxu1 }
 0x53b   : > { %v7395_v22 = vpack.c.bf16 %v6110_v0, %v6109_v21  ;;  %v5883_v13 = vadd.f32 %v5821_v28, %v5585_v9  ;;  %v7333_v21 = vunpack.c.l.bf16 %v7468_v44  ;;  %v5588_v0 = vadd.f32 %v5530_v26, %v5290_v48 }
 0x53d   : > { %7481 = vst [vmem:[%s9204_s22 + $0x28] sm:$0xff] %v7395_v22   ;;  %5860 = vmatmul.bf16.gmra.mxu1 %v9166_v8  ;;  %v5983_v63 = vadd.f32 %v9184_v53, %v5883_v13  ;;  %v5667_v8 = vld [vmem:[#allocation2 + $0x19a] sm:$0xff]  ;;  %v5240_v38 = vpop.f32.mrf.mxu3  ;;  %v7334_v22 = vunpack.c.h.bf16 %v7468_v44 }
 0x53e   : > { %v5684_v20 = vpack.c.bf16 %v5668_v37, %v5667_v8 }
 0x53f   : > { %v6079_v17 = vadd.f32 %v7329_v16, %v5983_v63  ;;  %v5540_v13 = vpop.f32.mrf.mxu0  ;;  %v4994_v16 = vadd.f32 %v4939_v25, %v9090_v4 }
 0x541   : > { %v6111_v31 = vmax.f32 %v6079_v17, 0.0  ;;  %v4947_v63 = vpop.f32.mrf.mxu2  ;;  %v5292_v29 = vadd.f32 %v5237_v62, %v4994_v16  ;;  %v7469_v17 = vld [vmem:[%s7677_s7 + $0x40] sm:$0xff]   ;;  %v5293_v62 = vadd.f32 %v5240_v38, %v4995_v49 }
 0x542   : > { %v5823_v60 = vpop.f32.mrf.mxu1  ;;  %v7337_v37 = vunpack.c.l.bf16 %v7469_v17  ;;  %v7338_v25 = vunpack.c.h.bf16 %v7469_v17 }
 0x543   : > { %v5884_v41 = vadd.f32 %v5823_v60, %v5586_v47  ;;  %v5590_v10 = vadd.f32 %v5535_v57, %v5292_v29  ;;  %v5591_v44 = vadd.f32 %v5538_v50, %v5293_v62  ;;  %v7471_v29 = vld [vmem:[%s7677_s7 + $0x50] sm:$0xff]  }
 0x545   : > { %v5984_v30 = vadd.f32 %v9184_v53, %v5884_v41  ;;  %v5242_v9 = vpop.f32.mrf.mxu3  ;;  %v5589_v41 = vadd.f32 %v5533_v14, %v5291_v32 }
 0x547   : > { %v6080_v36 = vadd.f32 %v7330_v12, %v5984_v30  ;;  %v5543_v30 = vpop.f32.mrf.mxu0 }
 0x549   : > { %v6112_v52 = vmax.f32 %v6080_v36, 0.0  ;;  %v4949_v23 = vpop.f32.mrf.mxu2 }
 0x54a   : > { %v5826_v58 = vpop.f32.mrf.mxu1  ;;  %v4998_v16 = vadd.f32 %v4949_v23, %v9124_v56  ;;  %v7346_v23 = vunpack.c.h.bf16 %v7471_v29 }
 0x54b   : > { %v7400_v27 = vpack.c.bf16 %v6112_v52, %v6111_v31  ;;  %v5885_v6 = vadd.f32 %v5826_v58, %v5587_v61  ;;  %v4996_v58 = vadd.f32 %v4944_v55, %v9107_v40 }
 0x54d   : > { %7482 = vst [vmem:[%s9204_s22 + $0x30] sm:$0xff] %v7400_v27   ;;  %5865 = vmatmul.bf16.gmra.mxu1 %v5684_v20  ;;  %v5985_v2 = vadd.f32 %v9184_v53, %v5885_v6  ;;  %v5245_v12 = vpop.f32.mrf.mxu3  ;;  %v5294_v5 = vadd.f32 %v5242_v9, %v4996_v58 }
 0x54f   : > { %v6081_v51 = vadd.f32 %v7333_v21, %v5985_v2  ;;  %v5545_v57 = vpop.f32.mrf.mxu0  ;;  %v7470_v21 = vld [vmem:[%s7677_s7 + $0x48] sm:$0xff]   ;;  %v5592_v18 = vadd.f32 %v5540_v13, %v5294_v5 }
 0x550   : > { %v7342_v55 = vunpack.c.h.bf16 %v7470_v21 }
 0x551   : > { %v6113_v47 = vmax.f32 %v6081_v51, 0.0  ;;  %v4952_v2 = vpop.f32.mrf.mxu2 }
 0x552   : > { %v5828_v11 = vpop.f32.mrf.mxu1 }
 0x553   : > { %v5886_v28 = vadd.f32 %v5828_v11, %v5588_v0  ;;  %v7341_v11 = vunpack.c.l.bf16 %v7470_v21 }
 0x555   : > { %v5986_v43 = vadd.f32 %v9184_v53, %v5886_v28  ;;  %v5247_v20 = vpop.f32.mrf.mxu3 }
 0x557   : > { %v6082_v3 = vadd.f32 %v7334_v22, %v5986_v43  ;;  %v4997_v22 = vadd.f32 %v4947_v63, %v9113_v42  ;;  %v5548_v51 = vpop.f32.mrf.mxu0  ;;  %v5296_v42 = vadd.f32 %v5247_v20, %v4998_v16 }
 0x559   : > { %v6114_v60 = vmax.f32 %v6082_v3, 0.0  ;;  %v4954_v9 = vpop.f32.mrf.mxu2  ;;  %v5295_v32 = vadd.f32 %v5245_v12, %v4997_v22 }
 0x55a   : > { %v5831_v26 = vpop.f32.mrf.mxu1 }
 0x55b   : > { %v7405_v59 = vpack.c.bf16 %v6114_v60, %v6113_v47  ;;  %v5887_v33 = vadd.f32 %v5831_v26, %v5589_v41 }
 0x55d   : > { %7483 = vst [vmem:[%s9204_s22 + $0x38] sm:$0xff] %v7405_v59   ;;  %v5987_v8 = vadd.f32 %v9184_v53, %v5887_v33  ;;  %v5250_v38 = vpop.f32.mrf.mxu3  ;;  %v5593_v59 = vadd.f32 %v5543_v30, %v5295_v32 }
 0x55f   : > { %v6083_v31 = vadd.f32 %v7337_v37, %v5987_v8  ;;  %v5550_v33 = vpop.f32.mrf.mxu0  ;;  %v7345_v37 = vunpack.c.l.bf16 %v7471_v29 }
 0x561   : > { %v6115_v27 = vmax.f32 %v6083_v31, 0.0  ;;  %v4957_v17 = vpop.f32.mrf.mxu2 }
 0x562   : > { %v5833_v36 = vpop.f32.mrf.mxu1 }
 0x563   : > { %v5888_v4 = vadd.f32 %v5833_v36, %v5590_v10  ;;  %v5594_v10 = vadd.f32 %v5545_v57, %v5296_v42  ;;  %v4999_v36 = vadd.f32 %v4952_v2, %v9130_v39 }
 0x565   : > { %v5988_v14 = vadd.f32 %v9184_v53, %v5888_v4  ;;  %v5252_v41 = vpop.f32.mrf.mxu3 }
 0x567   : > { %v6084_v52 = vadd.f32 %v7338_v25, %v5988_v14  ;;  %v5297_v25 = vadd.f32 %v5250_v38, %v4999_v36  ;;  %v5000_v14 = vadd.f32 %v4954_v9, %v9140_v34  ;;  %v5553_v62 = vpop.f32.mrf.mxu0 }
 0x569   : > { %v6116_v61 = vmax.f32 %v6084_v52, 0.0  ;;  %v4959_v58 = vpop.f32.mrf.mxu2  ;;  %v5298_v39 = vadd.f32 %v5252_v41, %v5000_v14 }
 0x56a   : > { %v5836_v48 = vpop.f32.mrf.mxu1 }
 0x56b   : > { %v7410_v6 = vpack.c.bf16 %v6116_v61, %v6115_v27  ;;  %v5889_v35 = vadd.f32 %v5836_v48, %v5591_v44  ;;  %v5595_v48 = vadd.f32 %v5548_v51, %v5297_v25  ;;  %v5002_v51 = vadd.f32 %v4959_v58, %v9151_v7 }
 0x56d   : > { %7484 = vst [vmem:[%s9204_s22 + $0x40] sm:$0xff] %v7410_v6   ;;  %v5989_v0 = vadd.f32 %v9184_v53, %v5889_v35  ;;  %v5255_v4 = vpop.f32.mrf.mxu3  ;;  %v7472_v6 = vld [vmem:[%s7677_s7 + $0x58] sm:$0xff]   ;;  %v5596_v35 = vadd.f32 %v5550_v33, %v5298_v39 }
 0x56e   : > { %v7349_v5 = vunpack.c.l.bf16 %v7472_v6 }
 0x56f   : > { %v6085_v43 = vadd.f32 %v7341_v11, %v5989_v0  ;;  %v5001_v0 = vadd.f32 %v4957_v17, %v9143_v15  ;;  %v5555_v34 = vpop.f32.mrf.mxu0 }
 0x571   : > { %v6117_v47 = vmax.f32 %v6085_v43, 0.0  ;;  %v4962_v38 = vpop.f32.mrf.mxu2 }
 0x572   : > { %v5838_v28 = vpop.f32.mrf.mxu1  ;;  %v5003_v29 = vadd.f32 %v4962_v38, %v9154_v46 }
 0x573   : > { %v5890_v40 = vadd.f32 %v5838_v28, %v5592_v18  ;;  %v7350_v18 = vunpack.c.h.bf16 %v7472_v6 }
 0x575   : > { %v5990_v50 = vadd.f32 %v9184_v53, %v5890_v40  ;;  %v5257_v44 = vpop.f32.mrf.mxu3  ;;  %v5299_v40 = vadd.f32 %v5255_v4, %v5001_v0 }
 0x576   : > { %v5300_v15 = vadd.f32 %v5257_v44, %v5002_v51  ;;  %v7475_v51 = vld [vmem:[%s7677_s7 + $0x70] sm:$0xff]  }
 0x577   : > { %v6086_v3 = vadd.f32 %v7342_v55, %v5990_v50  ;;  %v5597_v16 = vadd.f32 %v5553_v62, %v5299_v40 }
 0x578   : > { %v5598_v42 = vadd.f32 %v5555_v34, %v5300_v15  ;;  %v7362_v15 = vunpack.c.h.bf16 %v7475_v51 }
 0x579   : > { %v6118_v60 = vmax.f32 %v6086_v3, 0.0 }
 0x57a   : > { %v5841_v13 = vpop.f32.mrf.mxu1 }
 0x57b   : > { %v7415_v26 = vpack.c.bf16 %v6118_v60, %v6117_v47  ;;  %v5891_v63 = vadd.f32 %v5841_v13, %v5593_v59  ;;  %v5558_v47 = vpop.f32.mrf.mxu0  ;;  %v4964_v13 = vpop.f32.mrf.mxu2 }
 0x57d   : > { %7485 = vst [vmem:[%s9204_s22 + $0x48] sm:$0xff] %v7415_v26   ;;  %v5991_v8 = vadd.f32 %v9184_v53, %v5891_v63  ;;  %v5260_v9 = vpop.f32.mrf.mxu3  ;;  %v7473_v26 = vld [vmem:[%s7677_s7 + $0x60] sm:$0xff]  }
 0x57e   : > { %v7353_v41 = vunpack.c.l.bf16 %v7473_v26  ;;  %v7354_v33 = vunpack.c.h.bf16 %v7473_v26 }
 0x57f   : > { %v6087_v49 = vadd.f32 %v7345_v37, %v5991_v8 }
 0x581   : > { %v6119_v52 = vmax.f32 %v6087_v49, 0.0 }
 0x582   : > { %v5843_v12 = vpop.f32.mrf.mxu1 }
 0x583   : > { %v5892_v56 = vadd.f32 %v5843_v12, %v5594_v10  ;;  %v5301_v10 = vadd.f32 %v5260_v9, %v5003_v29  ;;  %v5560_v12 = vpop.f32.mrf.mxu0  ;;  %v7361_v9 = vunpack.c.l.bf16 %v7475_v51 }
 0x585   : > { %v5992_v30 = vadd.f32 %v9184_v53, %v5892_v56  ;;  %v5262_v17 = vpop.f32.mrf.mxu3  ;;  %v4967_v56 = vpop.f32.mrf.mxu2 }
 0x587   : > { %v6088_v31 = vadd.f32 %v7346_v23, %v5992_v30  ;;  %v5004_v23 = vadd.f32 %v4964_v13, %v9161_v19 }
 0x589   : > { %v6120_v20 = vmax.f32 %v6088_v31, 0.0  ;;  %v5599_v31 = vadd.f32 %v5558_v47, %v5301_v10  ;;  %v5302_v46 = vadd.f32 %v5262_v17, %v5004_v23 }
 0x58a   : > { %v5846_v27 = vpop.f32.mrf.mxu1 }
 0x58b   : > { %v7420_v61 = vpack.c.bf16 %v6120_v20, %v6119_v52  ;;  %v5893_v57 = vadd.f32 %v5846_v27, %v5595_v48  ;;  %v7474_v52 = vld [vmem:[%s7677_s7 + $0x68] sm:$0xff]   ;;  %v5563_v20 = vpop.f32.mrf.mxu0 }
 0x58c   : > { %v7357_v27 = vunpack.c.l.bf16 %v7474_v52  ;;  %v7358_v6 = vunpack.c.h.bf16 %v7474_v52 }
 0x58d   : > { %7486 = vst [vmem:[%s9204_s22 + $0x50] sm:$0xff] %v7420_v61   ;;  %v5993_v2 = vadd.f32 %v9184_v53, %v5893_v57  ;;  %v5265_v62 = vpop.f32.mrf.mxu3  ;;  %v5600_v61 = vadd.f32 %v5560_v12, %v5302_v46  ;;  %v4969_v48 = vpop.f32.mrf.mxu2  ;;  %v5005_v57 = vadd.f32 %v4967_v56, %v9164_v45  ;;  %v7476_v12 = vld [vmem:[%s7677_s7 + $0x78] sm:$0xff]  }
 0x58e   : > { %v5006_v0 = vadd.f32 %v4969_v48, %v9171_v24  ;;  %v7365_v23 = vunpack.c.l.bf16 %v7476_v12 }
 0x58f   : > { %v6089_v28 = vadd.f32 %v7349_v5, %v5993_v2  ;;  %v5303_v5 = vadd.f32 %v5265_v62, %v5005_v57 }
 0x591   : > { %v6121_v43 = vmax.f32 %v6089_v28, 0.0  ;;  %v5601_v28 = vadd.f32 %v5563_v20, %v5303_v5 }
 0x592   : > { %v5848_v21 = vpop.f32.mrf.mxu1 }
 0x593   : > { %v5894_v11 = vadd.f32 %v5848_v21, %v5596_v35 }
 0x595   : > { %v5994_v22 = vadd.f32 %v9184_v53, %v5894_v11  ;;  %v5267_v21 = vpop.f32.mrf.mxu3  ;;  %v4972_v40 = vpop.f32.mrf.mxu2 }
 0x596   : > { %v5304_v45 = vadd.f32 %v5267_v21, %v5006_v0 }
 0x597   : > { %v6090_v55 = vadd.f32 %v7350_v18, %v5994_v22  ;;  %v5565_v22 = vpop.f32.mrf.mxu0 }
 0x599   : > { %v6122_v50 = vmax.f32 %v6090_v55, 0.0 }
 0x59a   : > { %v5851_v32 = vpop.f32.mrf.mxu1 }
 0x59b   : > { %v7425_v3 = vpack.c.bf16 %v6122_v50, %v6121_v43  ;;  %v5895_v60 = vadd.f32 %v5851_v32, %v5597_v16  ;;  %v5602_v32 = vadd.f32 %v5565_v22, %v5304_v45  ;;  %v5007_v16 = vadd.f32 %v4972_v40, %v9174_v54 }
 0x59d   : > { %7487 = vst [vmem:[%s9204_s22 + $0x58] sm:$0xff] %v7425_v3   ;;  %v5995_v59 = vadd.f32 %v9184_v53, %v5895_v60  ;;  %v5270_v43 = vpop.f32.mrf.mxu3  ;;  %v4974_v26 = vpop.f32.mrf.mxu2 }
 0x59f   : > { %v6091_v8 = vadd.f32 %v7353_v41, %v5995_v59  ;;  %v5568_v47 = vpop.f32.mrf.mxu0  ;;  %v5305_v59 = vadd.f32 %v5270_v43, %v5007_v16 }
 0x5a1   : > { %v6123_v49 = vmax.f32 %v6091_v8, 0.0  ;;  %v5603_v17 = vadd.f32 %v5568_v47, %v5305_v59 }
 0x5a2   : > { %v5853_v63 = vpop.f32.mrf.mxu1 }
 0x5a3   : > { %v5896_v7 = vadd.f32 %v5853_v63, %v5598_v42  ;;  %v5008_v42 = vadd.f32 %v4974_v26, %v9178_v1 }
 0x5a5   : > { %v5996_v37 = vadd.f32 %v9184_v53, %v5896_v7  ;;  %v5272_v7 = vpop.f32.mrf.mxu3 }
 0x5a6   : > { %v5306_v54 = vadd.f32 %v5272_v7, %v5008_v42 }
 0x5a7   : > { %v6092_v36 = vadd.f32 %v7354_v33, %v5996_v37  ;;  %v5570_v10 = vpop.f32.mrf.mxu0 }
 0x5a9   : > { %v6124_v30 = vmax.f32 %v6092_v36, 0.0  ;;  %v5604_v36 = vadd.f32 %v5570_v10, %v5306_v54 }
 0x5aa   : > { %v5856_v4 = vpop.f32.mrf.mxu1 }
 0x5ab   : > { %v7430_v25 = vpack.c.bf16 %v6124_v30, %v6123_v49  ;;  %v5897_v14 = vadd.f32 %v5856_v4, %v5599_v31  ;;  %v7366_v4 = vunpack.c.h.bf16 %v7476_v12 }
 0x5ad   : > { %7488 = vst [vmem:[%s9204_s22 + $0x60] sm:$0xff] %v7430_v25   ;;  %v5997_v58 = vadd.f32 %v9184_v53, %v5897_v14 }
 0x5af   : > { %v6093_v44 = vadd.f32 %v7357_v27, %v5997_v58 }
 0x5b1   : > { %v6125_v34 = vmax.f32 %v6093_v44, 0.0 }
 0x5b2   : > { %v5858_v39 = vpop.f32.mrf.mxu1 }
 0x5b3   : > { %v5898_v19 = vadd.f32 %v5858_v39, %v5600_v61 }
 0x5b5   : > { %v5998_v2 = vadd.f32 %v9184_v53, %v5898_v19 }
 0x5b7   : > { %v6094_v35 = vadd.f32 %v7358_v6, %v5998_v2 }
 0x5b9   : > { %v6126_v11 = vmax.f32 %v6094_v35, 0.0 }
 0x5ba   : > { %v5861_v18 = vpop.f32.mrf.mxu1 }
 0x5bb   : > { %v7435_v38 = vpack.c.bf16 %v6126_v11, %v6125_v34  ;;  %v5899_v55 = vadd.f32 %v5861_v18, %v5601_v28 }
 0x5bd   : > { %7489 = vst [vmem:[%s9204_s22 + $0x68] sm:$0xff] %v7435_v38   ;;  %v5999_v50 = vadd.f32 %v9184_v53, %v5899_v55 }
 0x5bf   : > { %v6095_v60 = vadd.f32 %v7361_v9, %v5999_v50 }
 0x5c1   : > { %v6127_v63 = vmax.f32 %v6095_v60, 0.0 }
 0x5c2   : > { %v5863_v3 = vpop.f32.mrf.mxu1 }
 0x5c3   : > { %v5900_v24 = vadd.f32 %v5863_v3, %v5602_v32 }
 0x5c5   : > { %v6000_v13 = vadd.f32 %v9184_v53, %v5900_v24 }
 0x5c7   : > { %v6096_v41 = vadd.f32 %v7362_v15, %v6000_v13 }
 0x5c9   : > { %v6128_v29 = vmax.f32 %v6096_v41, 0.0 }
 0x5ca   : > { %v5866_v33 = vpop.f32.mrf.mxu1 }
 0x5cb   : > { %v7440_v8 = vpack.c.bf16 %v6128_v29, %v6127_v63  ;;  %v5901_v37 = vadd.f32 %v5866_v33, %v5603_v17 }
 0x5cd   : > { %7490 = vst [vmem:[%s9204_s22 + $0x70] sm:$0xff] %v7440_v8   ;;  %v6001_v56 = vadd.f32 %v9184_v53, %v5901_v37 }
 0x5cf   : > { %v6097_v1 = vadd.f32 %v7365_v23, %v6001_v56 }
 0x5d1   : > { %v6129_v46 = vmax.f32 %v6097_v1, 0.0 }
 0x5d2   : > { %v5868_v49 = vpop.f32.mrf.mxu1 }
 0x5d3   : > { %v5902_v30 = vadd.f32 %v5868_v49, %v5604_v36 }
 0x5d5   : > { %v6002_v25 = vadd.f32 %v9184_v53, %v5902_v30 }
 0x5d7   : > { %v6098_v31 = vadd.f32 %v7366_v4, %v6002_v25 }
 0x5d9   : > { %v6130_v14 = vmax.f32 %v6098_v31, 0.0 }
 0x5db   : > { %v7445_v62 = vpack.c.bf16 %v6130_v14, %v6129_v46 }
 0x5dd   : > { %7491 = vst [vmem:[%s9204_s22 + $0x78] sm:$0xff] %v7445_v62  }
 0x5de PF: > { %s15_s18 = sadd.s32 1, %s7544_s18  }
 0x5df   : > { %p12_p4 = scmp.ge.s32.totalorder %s15_s18, 4  }
 0x5e1   :  { %14 = sbr.rel (!%p12_p4) target bundleno = 1 (0x1), region = 88 }

</bundles_post_ra>
